<compile_context>
chip_gen: v6e
topology: v6e:2x2x1
jax: 0.10.0
libtpu: 0.0.40
codegen_flags: <defaults>
</compile_context>

<pallas_src>
import functools

import jax
import jax.numpy as jnp
from jax.experimental import pallas as pl
from jax.experimental.pallas import tpu as pltpu

_VMEM_LIMIT = 48 * 1024 * 1024  # safe on v5e/v6e (128 MiB) and v7x (64 MiB physical)


def _round_up(x, m):
    return ((x + m - 1) // m) * m


def _largest_divisor_le(n, cap):
    for d in range(min(n, cap), 0, -1):
        if n % d == 0:
            return d
    return 1


def _pick_row_tile(n, max_t=512):
    """Pick a query-row tile: full when small, else a divisor (multiple of 8), else pad."""
    if n <= max_t:
        return n, n
    start = max_t - (max_t % 8)
    for t in range(start, 7, -8):
        if n % t == 0:
            return t, n
    return 256, _round_up(n, 256)


# ------------------------------------------------------------------- tanh GELU
# TODO(synk): PyTorch nn.GELU() is exact erf; tanh approximation is used here so the
# transcendental lands on the EUP slot (delta vs exact GELU ~1e-3 absolute).
_GELU_C = 0.7978845608028654  # sqrt(2/pi)


def _gelu_tanh(x):
    return 0.5 * x * (1.0 + jnp.tanh(_GELU_C * (x + 0.044715 * x * x * x)))


# ------------------------------------------------------------- masked row LayerNorm
def _ln_rows(x, g, b, eps, d_real):
    """LayerNorm over the last axis of x (f32). If d_real is given, statistics are
    computed only over the first d_real columns (the rest are zero padding)."""
    D = x.shape[-1]
    if d_real is not None and d_real != D:
        mask = jax.lax.broadcasted_iota(jnp.int32, x.shape, 1) < d_real
        xm = jnp.where(mask, x, 0.0)
        denom = float(d_real)
    else:
        mask = None
        xm = x
        denom = float(D)
    mu = jnp.sum(xm, axis=-1, keepdims=True) / denom
    xc = x - mu
    xc_m = jnp.where(mask, xc, 0.0) if mask is not None else xc
    var = jnp.sum(xc_m * xc_m, axis=-1, keepdims=True) / denom
    y = xc * jax.lax.rsqrt(var + eps)
    return y * g.astype(jnp.float32) + b.astype(jnp.float32)


# -------------------- tiled matmul + bias (+ residual, + pre-LN, + post-LN) --------------------
def _mm_kernel(*refs, has_res, pre, post, k_real, n_real, eps_pre, eps_post):
    x_ref, w_ref, b_ref = refs[0], refs[1], refs[2]
    i = 3
    if pre:
        pg_ref, pb_ref = refs[i], refs[i + 1]
        i += 2
    if post:
        og_ref, ob_ref = refs[i], refs[i + 1]
        i += 2
    if has_res:
        r_ref = refs[i]
        i += 1
    o_ref, acc_ref = refs[i], refs[i + 1]

    k = pl.program_id(2)

    @pl.when(k == 0)
    def _():
        acc_ref[...] = jnp.zeros_like(acc_ref)

    if pre:
        # norm over the full K (single K step enforced by the wrapper).
        xn = _ln_rows(x_ref[...].astype(jnp.float32), pg_ref[...], pb_ref[...],
                      eps_pre, k_real)
        x_in = xn.astype(jnp.bfloat16)
    else:
        x_in = x_ref[...].astype(jnp.bfloat16)

    acc_ref[...] += jnp.dot(x_in, w_ref[...].astype(jnp.bfloat16),
                            preferred_element_type=jnp.float32)

    @pl.when(k == pl.num_programs(2) - 1)
    def _():
        out = acc_ref[...] + b_ref[...].astype(jnp.float32)
        if has_res:
            out = out + r_ref[...].astype(jnp.float32)
        if post:
            out = _ln_rows(out, og_ref[...], ob_ref[...], eps_post, n_real)
        o_ref[...] = out.astype(o_ref.dtype)


def matmul_bias(x, w, b, residual=None, *, pre_ln=None, post_ln=None,
                out_dtype=None, tm=512, tn=512, tk=512):
    """out = [post_ln](  [pre_ln](x) @ w + b [+ residual]  ), tiled over (M, N, K).

    pre_ln / post_ln: optional (gamma, beta, eps) tuples. pre_ln requires K in one tile,
    post_ln requires N in one tile (always true for PVT channel sizes <= 512)."""
    R, K = x.shape
    Kw, N = w.shape
    assert Kw == K
    out_dtype = out_dtype or x.dtype

    tm = min(tm, _round_up(R, 8))
    tk = _round_up(K, 128) if pre_ln is not None else min(tk, _round_up(K, 128))
    tn = _round_up(N, 128) if post_ln is not None else min(tn, _round_up(N, 128))
    Rp, Np, Kp = _round_up(R, tm), _round_up(N, tn), _round_up(K, tk)

    xp = jnp.pad(x, ((0, Rp - R), (0, Kp - K))) if (Rp, Kp) != (R, K) else x
    wp = jnp.pad(w, ((0, Kp - K), (0, Np - N))) if (Kp, Np) != (K, N) else w
    bp = (jnp.pad(b, (0, Np - N)) if Np != N else b).astype(jnp.float32).reshape(1, Np)

    in_specs = [pl.BlockSpec((tm, tk), lambda i, j, k: (i, k)),
                pl.BlockSpec((tk, tn), lambda i, j, k: (k, j)),
                pl.BlockSpec((1, tn), lambda i, j, k: (0, j))]
    inputs = [xp, wp, bp]

    pre = pre_ln is not None
    post = post_ln is not None
    eps_pre = eps_post = 0.0
    if pre:
        g, bb, eps_pre = pre_ln
        gp = (jnp.pad(g, (0, Kp - K)) if Kp != K else g).astype(jnp.float32).reshape(1, Kp)
        bbp = (jnp.pad(bb, (0, Kp - K)) if Kp != K else bb).astype(jnp.float32).reshape(1, Kp)
        in_specs += [pl.BlockSpec((1, tk), lambda i, j, k: (0, k)),
                     pl.BlockSpec((1, tk), lambda i, j, k: (0, k))]
        inputs += [gp, bbp]
    if post:
        g, bb, eps_post = post_ln
        gp = (jnp.pad(g, (0, Np - N)) if Np != N else g).astype(jnp.float32).reshape(1, Np)
        bbp = (jnp.pad(bb, (0, Np - N)) if Np != N else bb).astype(jnp.float32).reshape(1, Np)
        in_specs += [pl.BlockSpec((1, tn), lambda i, j, k: (0, j)),
                     pl.BlockSpec((1, tn), lambda i, j, k: (0, j))]
        inputs += [gp, bbp]

    has_res = residual is not None
    if has_res:
        rp = (jnp.pad(residual, ((0, Rp - R), (0, Np - N)))
              if (Rp, Np) != (R, N) else residual)
        in_specs.append(pl.BlockSpec((tm, tn), lambda i, j, k: (i, j)))
        inputs.append(rp)

    kernel = functools.partial(
        _mm_kernel, has_res=has_res, pre=pre, post=post,
        k_real=(K if (pre and Kp != K) else None),
        n_real=(N if (post and Np != N) else None),
        eps_pre=float(eps_pre), eps_post=float(eps_post))

    out = pl.pallas_call(
        kernel,
        out_shape=jax.ShapeDtypeStruct((Rp, Np), out_dtype),
        grid=(Rp // tm, Np // tn, Kp // tk),
        in_specs=in_specs,
        out_specs=pl.BlockSpec((tm, tn), lambda i, j, k: (i, j)),
        scratch_shapes=[pltpu.VMEM((tm, tn), jnp.float32)],
        compiler_params=pltpu.CompilerParams(
            dimension_semantics=("parallel", "parallel", "arbitrary"),
            vmem_limit_bytes=_VMEM_LIMIT),
    )(*inputs)

    if (Rp, Np) != (R, N):
        out = out[:R, :N]
    return out


# ------------------------------------------------------------ standalone layernorm
def _layernorm_kernel(x_ref, g_ref, b_ref, o_ref, *, eps):
    x = x_ref[...].astype(jnp.float32)
    o_ref[...] = _ln_rows(x, g_ref[...], b_ref[...], eps, None).astype(o_ref.dtype)


def layernorm(x, g, b, eps, *, out_dtype=None, tr=512):
    R, C = x.shape
    out_dtype = out_dtype or x.dtype
    tr = min(tr, _round_up(R, 8))
    Rp = _round_up(R, tr)
    xp = jnp.pad(x, ((0, Rp - R), (0, 0))) if Rp != R else x
    out = pl.pallas_call(
        functools.partial(_layernorm_kernel, eps=eps),
        out_shape=jax.ShapeDtypeStruct((Rp, C), out_dtype),
        grid=(Rp // tr,),
        in_specs=[pl.BlockSpec((tr, C), lambda i: (i, 0)),
                  pl.BlockSpec((1, C), lambda i: (0, 0)),
                  pl.BlockSpec((1, C), lambda i: (0, 0))],
        out_specs=pl.BlockSpec((tr, C), lambda i: (i, 0)),
        compiler_params=pltpu.CompilerParams(
            dimension_semantics=("parallel",),
            vmem_limit_bytes=_VMEM_LIMIT),
    )(xp, g.astype(jnp.float32).reshape(1, C), b.astype(jnp.float32).reshape(1, C))
    return out[:R] if Rp != R else out


# ---------------------------------------------------------------------- attention
def _attn_heads(q, kv, o_ref, *, scale, num_heads, C, k_off, v_off):
    # q: (tN, C);  kv: (M, >=2C) with k at columns [k_off, k_off+C), v at [v_off, v_off+C).
    hd = C // num_heads
    qf = q.astype(jnp.float32) * scale
    for h in range(num_heads):
        lo = h * hd
        qh = qf[:, lo:lo + hd].astype(jnp.bfloat16)
        kh = kv[:, k_off + lo:k_off + lo + hd].astype(jnp.bfloat16)
        vh = kv[:, v_off + lo:v_off + lo + hd].astype(jnp.bfloat16)
        # contract head dims directly -- no explicit k transpose.
        s = jax.lax.dot_general(qh, kh, (((1,), (1,)), ((), ())),
                                preferred_element_type=jnp.float32)      # (tN, M)
        m = jnp.max(s, axis=-1, keepdims=True)
        p = jnp.exp(s - m)
        l = jnp.sum(p, axis=-1, keepdims=True)
        ov = jnp.dot(p.astype(jnp.bfloat16), vh,
                     preferred_element_type=jnp.float32)                  # (tN, hd)
        # per-head direct store (no concat, keeps live state small).
        o_ref[0, :, lo:lo + hd] = (ov / l).astype(o_ref.dtype)


def _attn_kernel(q_ref, kv_ref, o_ref, *, scale, num_heads):
    C = o_ref.shape[2]
    _attn_heads(q_ref[0], kv_ref[0], o_ref, scale=scale, num_heads=num_heads,
                C=C, k_off=0, v_off=C)


def _attn_fused_kernel(qkv_ref, o_ref, *, scale, num_heads):
    C = o_ref.shape[2]
    qkv = qkv_ref[0]
    _attn_heads(qkv[:, :C], qkv, o_ref, scale=scale, num_heads=num_heads,
                C=C, k_off=C, v_off=2 * C)


def attention(q_bnc, kv_bm2c, scale, num_heads):
    """sr_ratio > 1 path: q (B, N, C), kv (B, M, 2C) with M small (sr-reduced)."""
    B, N, C = q_bnc.shape
    M = kv_bm2c.shape[1]
    tN, Npad = _pick_row_tile(N, 512)
    qb = jnp.pad(q_bnc, ((0, 0), (0, Npad - N), (0, 0))) if Npad != N else q_bnc
    out = pl.pallas_call(
        functools.partial(_attn_kernel, scale=scale, num_heads=num_heads),
        out_shape=jax.ShapeDtypeStruct((B, Npad, C), q_bnc.dtype),
        grid=(B, Npad // tN),
        in_specs=[pl.BlockSpec((1, tN, C), lambda b, n: (b, n, 0)),
                  pl.BlockSpec((1, M, 2 * C), lambda b, n: (b, 0, 0))],
        out_specs=pl.BlockSpec((1, tN, C), lambda b, n: (b, n, 0)),
        compiler_params=pltpu.CompilerParams(
            dimension_semantics=("parallel", "parallel"),
            vmem_limit_bytes=_VMEM_LIMIT),
    )(qb, kv_bm2c)
    return out[:, :N] if Npad != N else out


def attention_fused_qkv(qkv_bn3c, scale, num_heads):
    """sr_ratio == 1 path: qkv (B, N, 3C) produced by one fused projection."""
    # TODO(synk): this path holds the full (N, N) score tile per batch; fine for PVT
    # stage-4 sizes (N ~ 49) but needs a flash-style streaming split for very large N.
    B, N, C3 = qkv_bn3c.shape
    C = C3 // 3
    return pl.pallas_call(
        functools.partial(_attn_fused_kernel, scale=scale, num_heads=num_heads),
        out_shape=jax.ShapeDtypeStruct((B, N, C), qkv_bn3c.dtype),
        grid=(B,),
        in_specs=[pl.BlockSpec((1, N, C3), lambda b: (b, 0, 0))],
        out_specs=pl.BlockSpec((1, N, C), lambda b: (b, 0, 0)),
        compiler_params=pltpu.CompilerParams(
            dimension_semantics=("parallel",),
            vmem_limit_bytes=_VMEM_LIMIT),
    )(qkv_bn3c)


# ------------------------------------------- 3x3 depthwise conv (+ bias + GELU)
def _dwconv3x3_kernel(xp_ref, w_ref, b_ref, o_ref, *, apply_gelu, tH):
    # xp_ref: (1, H+2, W+2, tC); w: (3, 3, tC); b: (1, 1, tC).
    H, W, tC = o_ref.shape[1], o_ref.shape[2], o_ref.shape[3]
    w = w_ref[...].astype(jnp.float32)
    bias = b_ref[...].astype(jnp.float32)

    def chunk(ci, carry):
        y0 = pl.multiple_of(ci * tH, tH)
        xs = xp_ref[0, pl.ds(y0, tH + 2), :, :].astype(jnp.float32)   # (tH+2, W+2, tC)
        acc = jnp.zeros((tH, W, tC), jnp.float32)
        for dy in range(3):
            for dx in range(3):
                acc = acc + xs[dy:dy + tH, dx:dx + W, :] * w[dy, dx, :]
        out = acc + bias
        if apply_gelu:
            out = _gelu_tanh(out)
        o_ref[0, pl.ds(y0, tH), :, :] = out.astype(o_ref.dtype)
        return carry

    jax.lax.fori_loop(0, H // tH, chunk, 0)


def dwconv3x3(x_nhwc, w, b, *, apply_gelu=True):
    # x_nhwc: (B, H, W, C), w: (3, 3, C), b: (C,); padding=1, stride=1, groups=C.
    B, H, W, C = x_nhwc.shape
    if C <= 128:
        Cp, tC = C, C
    else:
        Cp, tC = _round_up(C, 128), 128
    if Cp != C:
        x_nhwc = jnp.pad(x_nhwc, ((0, 0), (0, 0), (0, 0), (0, Cp - C)))
        w = jnp.pad(w, ((0, 0), (0, 0), (0, Cp - C)))
        b = jnp.pad(b, (0, Cp - C))
    # TODO(synk): this spatial zero-pad is one extra HBM pass over the hidden map; folding
    # the halo/border handling into the kernel would remove it.
    xp = jnp.pad(x_nhwc, ((0, 0), (1, 1), (1, 1), (0, 0)))
    # rows per in-kernel chunk so the 9-tap f32 accumulator stays ~<=64 KiB (register-friendly).
    tH = _largest_divisor_le(H, max(1, (64 * 1024) // (W * tC * 4)))
    out = pl.pallas_call(
        functools.partial(_dwconv3x3_kernel, apply_gelu=apply_gelu, tH=tH),
        out_shape=jax.ShapeDtypeStruct((B, H, W, Cp), x_nhwc.dtype),
        grid=(B, Cp // tC),
        in_specs=[pl.BlockSpec((1, H + 2, W + 2, tC), lambda i, c: (i, 0, 0, c)),
                  pl.BlockSpec((3, 3, tC), lambda i, c: (0, 0, c)),
                  pl.BlockSpec((1, 1, tC), lambda i, c: (0, 0, c))],
        out_specs=pl.BlockSpec((1, H, W, tC), lambda i, c: (i, 0, 0, c)),
        compiler_params=pltpu.CompilerParams(
            dimension_semantics=("parallel", "parallel"),
            vmem_limit_bytes=_VMEM_LIMIT),
    )(xp, w.astype(jnp.float32), b.astype(jnp.float32).reshape(1, 1, Cp))
    return out[..., :C] if Cp != C else out


# ------------------------------------------------------------------ parameters
def make_params(key, dim, dim_out, depth, num_heads, sr_ratio, mlp_ratio):
    hidden = int(dim_out * mlp_ratio)
    keys = iter(jax.random.split(key, 128))

    def w(shape, s=0.02):
        return (s * jax.random.normal(next(keys), shape)).astype(jnp.float32)

    ones = lambda n: jnp.ones((n,), jnp.float32)
    zeros = lambda n: jnp.zeros((n,), jnp.float32)

    params = {
        # OverlapPatchEmbed: Conv2d(dim, dim_out, 3, stride=2, pad=1) stored (kh,kw,Cin,Cout)
        'ds_w': w((3, 3, dim, dim_out)), 'ds_b': w((dim_out,)),
        'ds_norm_g': ones(dim_out), 'ds_norm_b': zeros(dim_out),
        'norm_g': ones(dim_out), 'norm_b': zeros(dim_out),
        'blocks': [],
    }
    for _ in range(depth):
        blk = {
            'norm1_g': ones(dim_out), 'norm1_b': zeros(dim_out),
            'q_w': w((dim_out, dim_out)), 'q_b': zeros(dim_out),
            'kv_w': w((dim_out, 2 * dim_out)), 'kv_b': zeros(2 * dim_out),
            'proj_w': w((dim_out, dim_out)), 'proj_b': zeros(dim_out),
            'norm2_g': ones(dim_out), 'norm2_b': zeros(dim_out),
            'fc1_w': w((dim_out, hidden)), 'fc1_b': zeros(hidden),
            'dw_w': w((3, 3, hidden)), 'dw_b': zeros(hidden),
            'fc2_w': w((hidden, dim_out)), 'fc2_b': zeros(dim_out),
        }
        if sr_ratio > 1:
            # sr: Conv2d(dim_out, dim_out, sr, stride=sr) stored (kh,kw,Cin,Cout)
            blk['sr_w'] = w((sr_ratio, sr_ratio, dim_out, dim_out))
            blk['sr_b'] = zeros(dim_out)
            blk['srnorm_g'] = ones(dim_out)
            blk['srnorm_b'] = zeros(dim_out)
        params['blocks'].append(blk)
    return params


def prepare_params(params, sr_ratio):
    """Cast large weights to bf16, reshape conv kernels to matmul layout, and
    pre-concatenate q/kv weights when sr_ratio == 1. Call once, outside jit."""
    bf = lambda a: a.astype(jnp.bfloat16)
    f32 = lambda a: a.astype(jnp.float32)
    C = params['ds_w'].shape[-1]
    out = {
        'ds_w': bf(params['ds_w'].reshape(-1, C)), 'ds_b': f32(params['ds_b']),
        'ds_norm_g': f32(params['ds_norm_g']), 'ds_norm_b': f32(params['ds_norm_b']),
        'norm_g': f32(params['norm_g']), 'norm_b': f32(params['norm_b']),
        'blocks': [],
    }
    for blk in params['blocks']:
        nb = {
            'norm1_g': f32(blk['norm1_g']), 'norm1_b': f32(blk['norm1_b']),
            'proj_w': bf(blk['proj_w']), 'proj_b': f32(blk['proj_b']),
            'norm2_g': f32(blk['norm2_g']), 'norm2_b': f32(blk['norm2_b']),
            'fc1_w': bf(blk['fc1_w']), 'fc1_b': f32(blk['fc1_b']),
            'dw_w': f32(blk['dw_w']), 'dw_b': f32(blk['dw_b']),
            'fc2_w': bf(blk['fc2_w']), 'fc2_b': f32(blk['fc2_b']),
        }
        if sr_ratio > 1:
            nb['q_w'] = bf(blk['q_w']); nb['q_b'] = f32(blk['q_b'])
            nb['kv_w'] = bf(blk['kv_w']); nb['kv_b'] = f32(blk['kv_b'])
            nb['sr_w'] = bf(blk['sr_w'].reshape(-1, C)); nb['sr_b'] = f32(blk['sr_b'])
            nb['srnorm_g'] = f32(blk['srnorm_g']); nb['srnorm_b'] = f32(blk['srnorm_b'])
        else:
            nb['qkv_w'] = bf(jnp.concatenate([blk['q_w'], blk['kv_w']], axis=1))
            nb['qkv_b'] = f32(jnp.concatenate([blk['q_b'], blk['kv_b']]))
        out['blocks'].append(nb)
    return out


# --------------------------------------------------------------- stage forward
def pvt_stage_forward(x_nchw, params, *, num_heads, sr_ratio,
                      eps_block=1e-6, eps_embed=1e-5):
    """params must come from prepare_params (bf16 weights, matmul-layout convs)."""
    B, Cin, Hin, Win = x_nchw.shape
    C = params['ds_w'].shape[-1]

    # ---- OverlapPatchEmbed (3x3, stride 2, pad 1): bf16 im2col + matmul with fused LN
    # TODO(synk): im2col gather is materialized in HBM (9x Cin blowup); an in-kernel
    # strided gather via index_map would remove this extra HBM pass.
    x = jnp.transpose(x_nchw, (0, 2, 3, 1)).astype(jnp.bfloat16)       # NHWC bf16
    xp = jnp.pad(x, ((0, 0), (1, 1), (1, 1), (0, 0)))
    H = (Hin + 2 - 3) // 2 + 1
    W = (Win + 2 - 3) // 2 + 1
    taps = [xp[:, dy:dy + 2 * H:2, dx:dx + 2 * W:2, :]
            for dy in range(3) for dx in range(3)]
    patches = jnp.stack(taps, axis=3).reshape(B * H * W, 9 * Cin)
    tok = matmul_bias(patches, params['ds_w'], params['ds_b'],
                      post_ln=(params['ds_norm_g'], params['ds_norm_b'], eps_embed))

    N = H * W
    scale = (C // num_heads) ** -0.5

    for blk in params['blocks']:
        # ---------------- attention branch ----------------
        if sr_ratio > 1:
            y = layernorm(tok, blk['norm1_g'], blk['norm1_b'], eps_block)
            q = matmul_bias(y, blk['q_w'], blk['q_b'])                 # (B*N, C)
            # spatial-reduction conv (kernel=sr, stride=sr, no pad) as a patch-matmul with
            # fused LayerNorm; floor-divide like PyTorch (crop remainder rows/cols).
            Hr, Wr = H // sr_ratio, W // sr_ratio
            ym = y.reshape(B, H, W, C)[:, :Hr * sr_ratio, :Wr * sr_ratio, :]
            ym = ym.reshape(B, Hr, sr_ratio, Wr, sr_ratio, C)
            ym = ym.transpose(0, 1, 3, 2, 4, 5).reshape(B * Hr * Wr,
                                                        sr_ratio * sr_ratio * C)
            kv_in = matmul_bias(ym, blk['sr_w'], blk['sr_b'],
                                post_ln=(blk['srnorm_g'], blk['srnorm_b'], 1e-5))
            kv = matmul_bias(kv_in, blk['kv_w'], blk['kv_b'])          # (B*M, 2C)
            M = Hr * Wr
            o = attention(q.reshape(B, N, C), kv.reshape(B, M, 2 * C), scale, num_heads)
        else:
            # norm1 fused into a single combined qkv projection (one HBM pass over tok).
            qkv = matmul_bias(tok, blk['qkv_w'], blk['qkv_b'],
                              pre_ln=(blk['norm1_g'], blk['norm1_b'], eps_block))
            o = attention_fused_qkv(qkv.reshape(B, N, 3 * C), scale, num_heads)
        # residual add fused into the proj matmul epilogue.
        tok = matmul_bias(o.reshape(B * N, C), blk['proj_w'], blk['proj_b'],
                          residual=tok)

        # ---------------- MLP branch ----------------
        # norm2 fused into the fc1 matmul prologue.
        h = matmul_bias(tok, blk['fc1_w'], blk['fc1_b'],
                        pre_ln=(blk['norm2_g'], blk['norm2_b'], eps_block))
        hidden = h.shape[1]
        hm = dwconv3x3(h.reshape(B, H, W, hidden), blk['dw_w'], blk['dw_b'],
                       apply_gelu=True)                                # bias+GELU fused
        # residual add fused into the fc2 matmul epilogue.
        tok = matmul_bias(hm.reshape(B * N, hidden), blk['fc2_w'], blk['fc2_b'],
                          residual=tok)

    tok = layernorm(tok, params['norm_g'], params['norm_b'], eps_block,
                    out_dtype=jnp.float32)
    out = tok.reshape(B, H, W, C).transpose(0, 3, 1, 2)                # back to NCHW
    return out


if __name__ == "__main__":
    key = jax.random.PRNGKey(0)
    B, dim, Hin, Win = 2, 4, 16, 16
    dim_out, depth, num_heads, mlp_ratio = 32, 2, 2, 4.0

    kx, kp1, kp2 = jax.random.split(key, 3)
    x = jax.random.normal(kx, (B, dim, Hin, Win), dtype=jnp.float32)

    # sr_ratio > 1 path (spatial-reduction attention)
    params = make_params(kp1, dim, dim_out, depth, num_heads, 2, mlp_ratio)
    prepped = prepare_params(params, 2)
    fwd = jax.jit(functools.partial(pvt_stage_forward, num_heads=num_heads, sr_ratio=2))
    out = jax.block_until_ready(fwd(x, prepped))
    assert out.shape == (B, dim_out, Hin // 2, Win // 2), out.shape
    assert bool(jnp.all(jnp.isfinite(out)))

    # sr_ratio == 1 path (fused qkv self-attention)
    params1 = make_params(kp2, dim, dim_out, 1, num_heads, 1, mlp_ratio)
    prepped1 = prepare_params(params1, 1)
    fwd1 = jax.jit(functools.partial(pvt_stage_forward, num_heads=num_heads, sr_ratio=1))
    out1 = jax.block_until_ready(fwd1(x, prepped1))
    assert out1.shape == (B, dim_out, Hin // 2, Win // 2), out1.shape
    assert bool(jnp.all(jnp.isfinite(out1)))

    print("KERNEL_OK")
</pallas_src>

<mosaic_0001>
module attributes {stable_mosaic.version = 11 : i64} {
  func.func @_layernorm_kernel(%arg0: i32, %arg1: memref<128x32xbf16, #tpu.memory_space<vmem>>, %arg2: memref<1x32xf32, #tpu.memory_space<vmem>>, %arg3: memref<1x32xf32, #tpu.memory_space<vmem>>, %arg4: memref<128x32xbf16, #tpu.memory_space<vmem>>) attributes {dimension_semantics = [#tpu.dimension_semantics<parallel>], iteration_bounds = array<i64: 1>, scalar_prefetch = 0 : i64, scratch_operands = 0 : i64, tpu.core_type = #tpu.core_type<tc>, window_params = [{transform_indices = @transform_0, window_bounds = array<i64: 128, 32>}, {pipeline_mode = #tpu.pipeline_mode<synchronous>, transform_indices = @transform_1, window_bounds = array<i64: 1, 32>}, {pipeline_mode = #tpu.pipeline_mode<synchronous>, transform_indices = @transform_2, window_bounds = array<i64: 1, 32>}, {transform_indices = @transform_3, window_bounds = array<i64: 128, 32>}]} {
    %c0 = arith.constant 0 : index
    %c0_0 = arith.constant 0 : index
    %0 = vector.load %arg1[%c0, %c0_0] : memref<128x32xbf16, #tpu.memory_space<vmem>>, vector<128x32xbf16>
    %1 = arith.extf %0 : vector<128x32xbf16> to vector<128x32xf32>
    %c0_1 = arith.constant 0 : index
    %c0_2 = arith.constant 0 : index
    %2 = vector.load %arg2[%c0_1, %c0_2] : memref<1x32xf32, #tpu.memory_space<vmem>>, vector<1x32xf32>
    %c0_3 = arith.constant 0 : index
    %c0_4 = arith.constant 0 : index
    %3 = vector.load %arg3[%c0_3, %c0_4] : memref<1x32xf32, #tpu.memory_space<vmem>>, vector<1x32xf32>
    %cst = arith.constant dense<0.000000e+00> : vector<128xf32>
    %4 = vector.multi_reduction <add>, %1, %cst [1] : vector<128x32xf32> to vector<128xf32>
    %5 = vector.shape_cast %4 : vector<128xf32> to vector<128x1xf32>
    %cst_5 = arith.constant 3.200000e+01 : f32
    %6 = vector.broadcast %cst_5 : f32 to vector<128x1xf32>
    %7 = arith.divf %5, %6 : vector<128x1xf32>
    %8 = vector.broadcast %7 : vector<128x1xf32> to vector<128x32xf32>
    %9 = arith.subf %1, %8 : vector<128x32xf32>
    %10 = arith.mulf %9, %9 : vector<128x32xf32>
    %cst_6 = arith.constant dense<0.000000e+00> : vector<128xf32>
    %11 = vector.multi_reduction <add>, %10, %cst_6 [1] : vector<128x32xf32> to vector<128xf32>
    %12 = vector.shape_cast %11 : vector<128xf32> to vector<128x1xf32>
    %cst_7 = arith.constant 3.200000e+01 : f32
    %13 = vector.broadcast %cst_7 : f32 to vector<128x1xf32>
    %14 = arith.divf %12, %13 : vector<128x1xf32>
    %cst_8 = arith.constant 9.99999997E-7 : f32
    %15 = vector.broadcast %cst_8 : f32 to vector<128x1xf32>
    %16 = arith.addf %14, %15 : vector<128x1xf32>
    %17 = math.rsqrt %16 : vector<128x1xf32>
    %18 = vector.broadcast %17 : vector<128x1xf32> to vector<128x32xf32>
    %19 = arith.mulf %9, %18 : vector<128x32xf32>
    %20 = vector.broadcast %2 : vector<1x32xf32> to vector<128x32xf32>
    %21 = arith.mulf %19, %20 : vector<128x32xf32>
    %22 = vector.broadcast %3 : vector<1x32xf32> to vector<128x32xf32>
    %23 = arith.addf %21, %22 : vector<128x32xf32>
    %24 = arith.truncf %23 : vector<128x32xf32> to vector<128x32xbf16>
    %c0_9 = arith.constant 0 : index
    %c0_10 = arith.constant 0 : index
    %25 = vector.load %arg4[%c0_9, %c0_10] : memref<128x32xbf16, #tpu.memory_space<vmem>>, vector<128x32xbf16>
    tpu.vector_store %arg4[%c0_9, %c0_10], %24 {strides = array<i32>} : memref<128x32xbf16, #tpu.memory_space<vmem>>, vector<128x32xbf16>,
    return
  }
  func.func @transform_0(%arg0: i32) -> (i32, i32) {
    %c0_i32 = arith.constant 0 : i32
    %c0_i32_0 = arith.constant 0 : i32
    return %arg0, %c0_i32 : i32, i32
  }
  func.func @transform_1(%arg0: i32) -> (i32, i32) {
    %c0_i32 = arith.constant 0 : i32
    %c0_i32_0 = arith.constant 0 : i32
    %c0_i32_1 = arith.constant 0 : i32
    return %c0_i32, %c0_i32_0 : i32, i32
  }
  func.func @transform_2(%arg0: i32) -> (i32, i32) {
    %c0_i32 = arith.constant 0 : i32
    %c0_i32_0 = arith.constant 0 : i32
    %c0_i32_1 = arith.constant 0 : i32
    return %c0_i32, %c0_i32_0 : i32, i32
  }
  func.func @transform_3(%arg0: i32) -> (i32, i32) {
    %c0_i32 = arith.constant 0 : i32
    %c0_i32_0 = arith.constant 0 : i32
    return %arg0, %c0_i32 : i32, i32
  }
}

module attributes {stable_mosaic.version = 11 : i64} {
  func.func @_mm_kernel(%arg0: i32, %arg1: i32, %arg2: i32, %arg3: memref<128x128xbf16, #tpu.memory_space<vmem>>, %arg4: memref<128x128xbf16, #tpu.memory_space<vmem>>, %arg5: memref<1x128xf32, #tpu.memory_space<vmem>>, %arg6: memref<1x128xf32, #tpu.memory_space<vmem>>, %arg7: memref<1x128xf32, #tpu.memory_space<vmem>>, %arg8: memref<128x128xbf16, #tpu.memory_space<vmem>>, %arg9: memref<128x128xf32, #tpu.memory_space<vmem>>) attributes {dimension_semantics = [#tpu.dimension_semantics<parallel>, #tpu.dimension_semantics<parallel>, #tpu.dimension_semantics<arbitrary>], iteration_bounds = array<i64: 1, 1, 1>, scalar_prefetch = 0 : i64, scratch_operands = 1 : i64, tpu.core_type = #tpu.core_type<tc>, window_params = [{transform_indices = @transform_0, window_bounds = array<i64: 128, 128>}, {transform_indices = @transform_1, window_bounds = array<i64: 128, 128>}, {transform_indices = @transform_2, window_bounds = array<i64: 1, 128>}, {transform_indices = @transform_3, window_bounds = array<i64: 1, 128>}, {transform_indices = @transform_4, window_bounds = array<i64: 1, 128>}, {transform_indices = @transform_5, window_bounds = array<i64: 128, 128>}]} {
    %c0_i32 = arith.constant 0 : i32
    %0 = arith.cmpi eq, %arg2, %c0_i32 : i32
    %1 = arith.extui %0 : i1 to i32
    %c0_i32_0 = arith.constant 0 : i32
    %2 = arith.cmpi ne, %1, %c0_i32_0 : i32
    scf.if %2 {
      %cst_10 = arith.constant 0.000000e+00 : f32
      %12 = vector.broadcast %cst_10 : f32 to vector<128x128xf32>
      %c0_11 = arith.constant 0 : index
      %c0_12 = arith.constant 0 : index
      %13 = vector.load %arg9[%c0_11, %c0_12] : memref<128x128xf32, #tpu.memory_space<vmem>>, vector<128x128xf32>
      tpu.vector_store %arg9[%c0_11, %c0_12], %12 {strides = array<i32>} : memref<128x128xf32, #tpu.memory_space<vmem>>, vector<128x128xf32>,
    } else {
    }
    %c0 = arith.constant 0 : index
    %c0_1 = arith.constant 0 : index
    %3 = vector.load %arg3[%c0, %c0_1] : memref<128x128xbf16, #tpu.memory_space<vmem>>, vector<128x128xbf16>
    %c0_2 = arith.constant 0 : index
    %c0_3 = arith.constant 0 : index
    %4 = vector.load %arg9[%c0_2, %c0_3] : memref<128x128xf32, #tpu.memory_space<vmem>>, vector<128x128xf32>
    %c0_4 = arith.constant 0 : index
    %c0_5 = arith.constant 0 : index
    %5 = vector.load %arg4[%c0_4, %c0_5] : memref<128x128xbf16, #tpu.memory_space<vmem>>, vector<128x128xbf16>
    %cst = arith.constant dense<0.000000e+00> : vector<128x128xf32>
    %6 = tpu.matmul %3, %5, %cst {dimension_numbers = #tpu.dot_dimension_numbers<[1], [0], [0], [1], [0, 0, 1, 1], [], []>} : vector<128x128xbf16>, vector<128x128xbf16>, vector<128x128xf32> -> vector<128x128xf32>
    %7 = arith.addf %4, %6 : vector<128x128xf32>
    %c0_6 = arith.constant 0 : index
    %c0_7 = arith.constant 0 : index
    %8 = vector.load %arg9[%c0_6, %c0_7] : memref<128x128xf32, #tpu.memory_space<vmem>>, vector<128x128xf32>
    tpu.vector_store %arg9[%c0_6, %c0_7], %7 {strides = array<i32>} : memref<128x128xf32, #tpu.memory_space<vmem>>, vector<128x128xf32>,
    %c0_i32_8 = arith.constant 0 : i32
    %9 = arith.cmpi eq, %arg2, %c0_i32_8 : i32
    %10 = arith.extui %9 : i1 to i32
    %c0_i32_9 = arith.constant 0 : i32
    %11 = arith.cmpi ne, %10, %c0_i32_9 : i32
    scf.if %11 {
      %c0_10 = arith.constant 0 : index
      %c0_11 = arith.constant 0 : index
      %12 = vector.load %arg9[%c0_10, %c0_11] : memref<128x128xf32, #tpu.memory_space<vmem>>, vector<128x128xf32>
      %c0_12 = arith.constant 0 : index
      %c0_13 = arith.constant 0 : index
      %13 = vector.load %arg5[%c0_12, %c0_13] : memref<1x128xf32, #tpu.memory_space<vmem>>, vector<1x128xf32>
      %14 = vector.broadcast %13 : vector<1x128xf32> to vector<128x128xf32>
      %15 = arith.addf %12, %14 : vector<128x128xf32>
      %c0_14 = arith.constant 0 : index
      %c0_15 = arith.constant 0 : index
      %16 = vector.load %arg6[%c0_14, %c0_15] : memref<1x128xf32, #tpu.memory_space<vmem>>, vector<1x128xf32>
      %c0_16 = arith.constant 0 : index
      %c0_17 = arith.constant 0 : index
      %17 = vector.load %arg7[%c0_16, %c0_17] : memref<1x128xf32, #tpu.memory_space<vmem>>, vector<1x128xf32>
      %18 = tpu.iota {dimensions = array<i32: 1>} : vector<128x128xi32>
      %c32_i32 = arith.constant 32 : i32
      %19 = vector.broadcast %c32_i32 : i32 to vector<128x128xi32>
      %20 = arith.cmpi slt, %18, %19 : vector<128x128xi32>
      %cst_18 = arith.constant 0.000000e+00 : f32
      %21 = vector.broadcast %cst_18 : f32 to vector<128x128xf32>
      %22 = arith.select %20, %15, %21 : vector<128x128xi1>, vector<128x128xf32>
      %cst_19 = arith.constant dense<0.000000e+00> : vector<128xf32>
      %23 = vector.multi_reduction <add>, %22, %cst_19 [1] : vector<128x128xf32> to vector<128xf32>
      %24 = vector.shape_cast %23 : vector<128xf32> to vector<128x1xf32>
      %cst_20 = arith.constant 3.200000e+01 : f32
      %25 = vector.broadcast %cst_20 : f32 to vector<128x1xf32>
      %26 = arith.divf %24, %25 : vector<128x1xf32>
      %27 = vector.broadcast %26 : vector<128x1xf32> to vector<128x128xf32>
      %28 = arith.subf %15, %27 : vector<128x128xf32>
      %cst_21 = arith.constant 0.000000e+00 : f32
      %29 = vector.broadcast %cst_21 : f32 to vector<128x128xf32>
      %30 = arith.select %20, %28, %29 : vector<128x128xi1>, vector<128x128xf32>
      %31 = arith.mulf %30, %30 : vector<128x128xf32>
      %cst_22 = arith.constant dense<0.000000e+00> : vector<128xf32>
      %32 = vector.multi_reduction <add>, %31, %cst_22 [1] : vector<128x128xf32> to vector<128xf32>
      %33 = vector.shape_cast %32 : vector<128xf32> to vector<128x1xf32>
      %cst_23 = arith.constant 3.200000e+01 : f32
      %34 = vector.broadcast %cst_23 : f32 to vector<128x1xf32>
      %35 = arith.divf %33, %34 : vector<128x1xf32>
      %cst_24 = arith.constant 9.99999974E-6 : f32
      %36 = vector.broadcast %cst_24 : f32 to vector<128x1xf32>
      %37 = arith.addf %35, %36 : vector<128x1xf32>
      %38 = math.rsqrt %37 : vector<128x1xf32>
      %39 = vector.broadcast %38 : vector<128x1xf32> to vector<128x128xf32>
      %40 = arith.mulf %28, %39 : vector<128x128xf32>
      %41 = vector.broadcast %16 : vector<1x128xf32> to vector<128x128xf32>
      %42 = arith.mulf %40, %41 : vector<128x128xf32>
      %43 = vector.broadcast %17 : vector<1x128xf32> to vector<128x128xf32>
      %44 = arith.addf %42, %43 : vector<128x128xf32>
      %45 = arith.truncf %44 : vector<128x128xf32> to vector<128x128xbf16>
      %c0_25 = arith.constant 0 : index
      %c0_26 = arith.constant 0 : index
      %46 = vector.load %arg8[%c0_25, %c0_26] : memref<128x128xbf16, #tpu.memory_space<vmem>>, vector<128x128xbf16>
      tpu.vector_store %arg8[%c0_25, %c0_26], %45 {strides = array<i32>} : memref<128x128xbf16, #tpu.memory_space<vmem>>, vector<128x128xbf16>,
    } else {
    }
    return
  }
  func.func @transform_0(%arg0: i32, %arg1: i32, %arg2: i32) -> (i32, i32) {
    %c0_i32 = arith.constant 0 : i32
    return %arg0, %arg2 : i32, i32
  }
  func.func @transform_1(%arg0: i32, %arg1: i32, %arg2: i32) -> (i32, i32) {
    %c0_i32 = arith.constant 0 : i32
    return %arg2, %arg1 : i32, i32
  }
  func.func @transform_2(%arg0: i32, %arg1: i32, %arg2: i32) -> (i32, i32) {
    %c0_i32 = arith.constant 0 : i32
    %c0_i32_0 = arith.constant 0 : i32
    return %c0_i32, %arg1 : i32, i32
  }
  func.func @transform_3(%arg0: i32, %arg1: i32, %arg2: i32) -> (i32, i32) {
    %c0_i32 = arith.constant 0 : i32
    %c0_i32_0 = arith.constant 0 : i32
    return %c0_i32, %arg1 : i32, i32
  }
  func.func @transform_4(%arg0: i32, %arg1: i32, %arg2: i32) -> (i32, i32) {
    %c0_i32 = arith.constant 0 : i32
    %c0_i32_0 = arith.constant 0 : i32
    return %c0_i32, %arg1 : i32, i32
  }
  func.func @transform_5(%arg0: i32, %arg1: i32, %arg2: i32) -> (i32, i32) {
    %c0_i32 = arith.constant 0 : i32
    return %arg0, %arg1 : i32, i32
  }
}

module attributes {stable_mosaic.version = 11 : i64} {
  func.func @_mm_kernel(%arg0: i32, %arg1: i32, %arg2: i32, %arg3: memref<32x128xbf16, #tpu.memory_space<vmem>>, %arg4: memref<128x128xbf16, #tpu.memory_space<vmem>>, %arg5: memref<1x128xf32, #tpu.memory_space<vmem>>, %arg6: memref<32x128xbf16, #tpu.memory_space<vmem>>, %arg7: memref<32x128xf32, #tpu.memory_space<vmem>>) attributes {dimension_semantics = [#tpu.dimension_semantics<parallel>, #tpu.dimension_semantics<parallel>, #tpu.dimension_semantics<arbitrary>], iteration_bounds = array<i64: 1, 1, 1>, scalar_prefetch = 0 : i64, scratch_operands = 1 : i64, tpu.core_type = #tpu.core_type<tc>, window_params = [{transform_indices = @transform_0, window_bounds = array<i64: 32, 128>}, {transform_indices = @transform_1, window_bounds = array<i64: 128, 128>}, {transform_indices = @transform_2, window_bounds = array<i64: 1, 128>}, {transform_indices = @transform_3, window_bounds = array<i64: 32, 128>}]} {
    %c0_i32 = arith.constant 0 : i32
    %0 = arith.cmpi eq, %arg2, %c0_i32 : i32
    %1 = arith.extui %0 : i1 to i32
    %c0_i32_0 = arith.constant 0 : i32
    %2 = arith.cmpi ne, %1, %c0_i32_0 : i32
    scf.if %2 {
      %cst_10 = arith.constant 0.000000e+00 : f32
      %12 = vector.broadcast %cst_10 : f32 to vector<32x128xf32>
      %c0_11 = arith.constant 0 : index
      %c0_12 = arith.constant 0 : index
      %13 = vector.load %arg7[%c0_11, %c0_12] : memref<32x128xf32, #tpu.memory_space<vmem>>, vector<32x128xf32>
      tpu.vector_store %arg7[%c0_11, %c0_12], %12 {strides = array<i32>} : memref<32x128xf32, #tpu.memory_space<vmem>>, vector<32x128xf32>,
    } else {
    }
    %c0 = arith.constant 0 : index
    %c0_1 = arith.constant 0 : index
    %3 = vector.load %arg3[%c0, %c0_1] : memref<32x128xbf16, #tpu.memory_space<vmem>>, vector<32x128xbf16>
    %c0_2 = arith.constant 0 : index
    %c0_3 = arith.constant 0 : index
    %4 = vector.load %arg7[%c0_2, %c0_3] : memref<32x128xf32, #tpu.memory_space<vmem>>, vector<32x128xf32>
    %c0_4 = arith.constant 0 : index
    %c0_5 = arith.constant 0 : index
    %5 = vector.load %arg4[%c0_4, %c0_5] : memref<128x128xbf16, #tpu.memory_space<vmem>>, vector<128x128xbf16>
    %cst = arith.constant dense<0.000000e+00> : vector<32x128xf32>
    %6 = tpu.matmul %3, %5, %cst {dimension_numbers = #tpu.dot_dimension_numbers<[1], [0], [0], [1], [0, 0, 1, 1], [], []>} : vector<32x128xbf16>, vector<128x128xbf16>, vector<32x128xf32> -> vector<32x128xf32>
    %7 = arith.addf %4, %6 : vector<32x128xf32>
    %c0_6 = arith.constant 0 : index
    %c0_7 = arith.constant 0 : index
    %8 = vector.load %arg7[%c0_6, %c0_7] : memref<32x128xf32, #tpu.memory_space<vmem>>, vector<32x128xf32>
    tpu.vector_store %arg7[%c0_6, %c0_7], %7 {strides = array<i32>} : memref<32x128xf32, #tpu.memory_space<vmem>>, vector<32x128xf32>,
    %c0_i32_8 = arith.constant 0 : i32
    %9 = arith.cmpi eq, %arg2, %c0_i32_8 : i32
    %10 = arith.extui %9 : i1 to i32
    %c0_i32_9 = arith.constant 0 : i32
    %11 = arith.cmpi ne, %10, %c0_i32_9 : i32
    scf.if %11 {
      %c0_10 = arith.constant 0 : index
      %c0_11 = arith.constant 0 : index
      %12 = vector.load %arg7[%c0_10, %c0_11] : memref<32x128xf32, #tpu.memory_space<vmem>>, vector<32x128xf32>
      %c0_12 = arith.constant 0 : index
      %c0_13 = arith.constant 0 : index
      %13 = vector.load %arg5[%c0_12, %c0_13] : memref<1x128xf32, #tpu.memory_space<vmem>>, vector<1x128xf32>
      %14 = vector.broadcast %13 : vector<1x128xf32> to vector<32x128xf32>
      %15 = arith.addf %12, %14 : vector<32x128xf32>
      %16 = arith.truncf %15 : vector<32x128xf32> to vector<32x128xbf16>
      %c0_14 = arith.constant 0 : index
      %c0_15 = arith.constant 0 : index
      %17 = vector.load %arg6[%c0_14, %c0_15] : memref<32x128xbf16, #tpu.memory_space<vmem>>, vector<32x128xbf16>
      tpu.vector_store %arg6[%c0_14, %c0_15], %16 {strides = array<i32>} : memref<32x128xbf16, #tpu.memory_space<vmem>>, vector<32x128xbf16>,
    } else {
    }
    return
  }
  func.func @transform_0(%arg0: i32, %arg1: i32, %arg2: i32) -> (i32, i32) {
    %c0_i32 = arith.constant 0 : i32
    return %arg0, %arg2 : i32, i32
  }
  func.func @transform_1(%arg0: i32, %arg1: i32, %arg2: i32) -> (i32, i32) {
    %c0_i32 = arith.constant 0 : i32
    return %arg2, %arg1 : i32, i32
  }
  func.func @transform_2(%arg0: i32, %arg1: i32, %arg2: i32) -> (i32, i32) {
    %c0_i32 = arith.constant 0 : i32
    %c0_i32_0 = arith.constant 0 : i32
    return %c0_i32, %arg1 : i32, i32
  }
  func.func @transform_3(%arg0: i32, %arg1: i32, %arg2: i32) -> (i32, i32) {
    %c0_i32 = arith.constant 0 : i32
    return %arg0, %arg1 : i32, i32
  }
}

module attributes {stable_mosaic.version = 11 : i64} {
  func.func @_mm_kernel(%arg0: i32, %arg1: i32, %arg2: i32, %arg3: memref<32x128xbf16, #tpu.memory_space<vmem>>, %arg4: memref<128x128xbf16, #tpu.memory_space<vmem>>, %arg5: memref<1x128xf32, #tpu.memory_space<vmem>>, %arg6: memref<1x128xf32, #tpu.memory_space<vmem>>, %arg7: memref<1x128xf32, #tpu.memory_space<vmem>>, %arg8: memref<32x128xbf16, #tpu.memory_space<vmem>>, %arg9: memref<32x128xf32, #tpu.memory_space<vmem>>) attributes {dimension_semantics = [#tpu.dimension_semantics<parallel>, #tpu.dimension_semantics<parallel>, #tpu.dimension_semantics<arbitrary>], iteration_bounds = array<i64: 1, 1, 1>, scalar_prefetch = 0 : i64, scratch_operands = 1 : i64, tpu.core_type = #tpu.core_type<tc>, window_params = [{transform_indices = @transform_0, window_bounds = array<i64: 32, 128>}, {transform_indices = @transform_1, window_bounds = array<i64: 128, 128>}, {transform_indices = @transform_2, window_bounds = array<i64: 1, 128>}, {transform_indices = @transform_3, window_bounds = array<i64: 1, 128>}, {transform_indices = @transform_4, window_bounds = array<i64: 1, 128>}, {transform_indices = @transform_5, window_bounds = array<i64: 32, 128>}]} {
    %c0_i32 = arith.constant 0 : i32
    %0 = arith.cmpi eq, %arg2, %c0_i32 : i32
    %1 = arith.extui %0 : i1 to i32
    %c0_i32_0 = arith.constant 0 : i32
    %2 = arith.cmpi ne, %1, %c0_i32_0 : i32
    scf.if %2 {
      %cst_10 = arith.constant 0.000000e+00 : f32
      %12 = vector.broadcast %cst_10 : f32 to vector<32x128xf32>
      %c0_11 = arith.constant 0 : index
      %c0_12 = arith.constant 0 : index
      %13 = vector.load %arg9[%c0_11, %c0_12] : memref<32x128xf32, #tpu.memory_space<vmem>>, vector<32x128xf32>
      tpu.vector_store %arg9[%c0_11, %c0_12], %12 {strides = array<i32>} : memref<32x128xf32, #tpu.memory_space<vmem>>, vector<32x128xf32>,
    } else {
    }
    %c0 = arith.constant 0 : index
    %c0_1 = arith.constant 0 : index
    %3 = vector.load %arg3[%c0, %c0_1] : memref<32x128xbf16, #tpu.memory_space<vmem>>, vector<32x128xbf16>
    %c0_2 = arith.constant 0 : index
    %c0_3 = arith.constant 0 : index
    %4 = vector.load %arg9[%c0_2, %c0_3] : memref<32x128xf32, #tpu.memory_space<vmem>>, vector<32x128xf32>
    %c0_4 = arith.constant 0 : index
    %c0_5 = arith.constant 0 : index
    %5 = vector.load %arg4[%c0_4, %c0_5] : memref<128x128xbf16, #tpu.memory_space<vmem>>, vector<128x128xbf16>
    %cst = arith.constant dense<0.000000e+00> : vector<32x128xf32>
    %6 = tpu.matmul %3, %5, %cst {dimension_numbers = #tpu.dot_dimension_numbers<[1], [0], [0], [1], [0, 0, 1, 1], [], []>} : vector<32x128xbf16>, vector<128x128xbf16>, vector<32x128xf32> -> vector<32x128xf32>
    %7 = arith.addf %4, %6 : vector<32x128xf32>
    %c0_6 = arith.constant 0 : index
    %c0_7 = arith.constant 0 : index
    %8 = vector.load %arg9[%c0_6, %c0_7] : memref<32x128xf32, #tpu.memory_space<vmem>>, vector<32x128xf32>
    tpu.vector_store %arg9[%c0_6, %c0_7], %7 {strides = array<i32>} : memref<32x128xf32, #tpu.memory_space<vmem>>, vector<32x128xf32>,
    %c0_i32_8 = arith.constant 0 : i32
    %9 = arith.cmpi eq, %arg2, %c0_i32_8 : i32
    %10 = arith.extui %9 : i1 to i32
    %c0_i32_9 = arith.constant 0 : i32
    %11 = arith.cmpi ne, %10, %c0_i32_9 : i32
    scf.if %11 {
      %c0_10 = arith.constant 0 : index
      %c0_11 = arith.constant 0 : index
      %12 = vector.load %arg9[%c0_10, %c0_11] : memref<32x128xf32, #tpu.memory_space<vmem>>, vector<32x128xf32>
      %c0_12 = arith.constant 0 : index
      %c0_13 = arith.constant 0 : index
      %13 = vector.load %arg5[%c0_12, %c0_13] : memref<1x128xf32, #tpu.memory_space<vmem>>, vector<1x128xf32>
      %14 = vector.broadcast %13 : vector<1x128xf32> to vector<32x128xf32>
      %15 = arith.addf %12, %14 : vector<32x128xf32>
      %c0_14 = arith.constant 0 : index
      %c0_15 = arith.constant 0 : index
      %16 = vector.load %arg6[%c0_14, %c0_15] : memref<1x128xf32, #tpu.memory_space<vmem>>, vector<1x128xf32>
      %c0_16 = arith.constant 0 : index
      %c0_17 = arith.constant 0 : index
      %17 = vector.load %arg7[%c0_16, %c0_17] : memref<1x128xf32, #tpu.memory_space<vmem>>, vector<1x128xf32>
      %18 = tpu.iota {dimensions = array<i32: 1>} : vector<32x128xi32>
      %c32_i32 = arith.constant 32 : i32
      %19 = vector.broadcast %c32_i32 : i32 to vector<32x128xi32>
      %20 = arith.cmpi slt, %18, %19 : vector<32x128xi32>
      %cst_18 = arith.constant 0.000000e+00 : f32
      %21 = vector.broadcast %cst_18 : f32 to vector<32x128xf32>
      %22 = arith.select %20, %15, %21 : vector<32x128xi1>, vector<32x128xf32>
      %cst_19 = arith.constant dense<0.000000e+00> : vector<32xf32>
      %23 = vector.multi_reduction <add>, %22, %cst_19 [1] : vector<32x128xf32> to vector<32xf32>
      %24 = vector.shape_cast %23 : vector<32xf32> to vector<32x1xf32>
      %cst_20 = arith.constant 3.200000e+01 : f32
      %25 = vector.broadcast %cst_20 : f32 to vector<32x1xf32>
      %26 = arith.divf %24, %25 : vector<32x1xf32>
      %27 = vector.broadcast %26 : vector<32x1xf32> to vector<32x128xf32>
      %28 = arith.subf %15, %27 : vector<32x128xf32>
      %cst_21 = arith.constant 0.000000e+00 : f32
      %29 = vector.broadcast %cst_21 : f32 to vector<32x128xf32>
      %30 = arith.select %20, %28, %29 : vector<32x128xi1>, vector<32x128xf32>
      %31 = arith.mulf %30, %30 : vector<32x128xf32>
      %cst_22 = arith.constant dense<0.000000e+00> : vector<32xf32>
      %32 = vector.multi_reduction <add>, %31, %cst_22 [1] : vector<32x128xf32> to vector<32xf32>
      %33 = vector.shape_cast %32 : vector<32xf32> to vector<32x1xf32>
      %cst_23 = arith.constant 3.200000e+01 : f32
      %34 = vector.broadcast %cst_23 : f32 to vector<32x1xf32>
      %35 = arith.divf %33, %34 : vector<32x1xf32>
      %cst_24 = arith.constant 9.99999974E-6 : f32
      %36 = vector.broadcast %cst_24 : f32 to vector<32x1xf32>
      %37 = arith.addf %35, %36 : vector<32x1xf32>
      %38 = math.rsqrt %37 : vector<32x1xf32>
      %39 = vector.broadcast %38 : vector<32x1xf32> to vector<32x128xf32>
      %40 = arith.mulf %28, %39 : vector<32x128xf32>
      %41 = vector.broadcast %16 : vector<1x128xf32> to vector<32x128xf32>
      %42 = arith.mulf %40, %41 : vector<32x128xf32>
      %43 = vector.broadcast %17 : vector<1x128xf32> to vector<32x128xf32>
      %44 = arith.addf %42, %43 : vector<32x128xf32>
      %45 = arith.truncf %44 : vector<32x128xf32> to vector<32x128xbf16>
      %c0_25 = arith.constant 0 : index
      %c0_26 = arith.constant 0 : index
      %46 = vector.load %arg8[%c0_25, %c0_26] : memref<32x128xbf16, #tpu.memory_space<vmem>>, vector<32x128xbf16>
      tpu.vector_store %arg8[%c0_25, %c0_26], %45 {strides = array<i32>} : memref<32x128xbf16, #tpu.memory_space<vmem>>, vector<32x128xbf16>,
    } else {
    }
    return
  }
  func.func @transform_0(%arg0: i32, %arg1: i32, %arg2: i32) -> (i32, i32) {
    %c0_i32 = arith.constant 0 : i32
    return %arg0, %arg2 : i32, i32
  }
  func.func @transform_1(%arg0: i32, %arg1: i32, %arg2: i32) -> (i32, i32) {
    %c0_i32 = arith.constant 0 : i32
    return %arg2, %arg1 : i32, i32
  }
  func.func @transform_2(%arg0: i32, %arg1: i32, %arg2: i32) -> (i32, i32) {
    %c0_i32 = arith.constant 0 : i32
    %c0_i32_0 = arith.constant 0 : i32
    return %c0_i32, %arg1 : i32, i32
  }
  func.func @transform_3(%arg0: i32, %arg1: i32, %arg2: i32) -> (i32, i32) {
    %c0_i32 = arith.constant 0 : i32
    %c0_i32_0 = arith.constant 0 : i32
    return %c0_i32, %arg1 : i32, i32
  }
  func.func @transform_4(%arg0: i32, %arg1: i32, %arg2: i32) -> (i32, i32) {
    %c0_i32 = arith.constant 0 : i32
    %c0_i32_0 = arith.constant 0 : i32
    return %c0_i32, %arg1 : i32, i32
  }
  func.func @transform_5(%arg0: i32, %arg1: i32, %arg2: i32) -> (i32, i32) {
    %c0_i32 = arith.constant 0 : i32
    return %arg0, %arg1 : i32, i32
  }
}

module attributes {stable_mosaic.version = 11 : i64} {
  func.func @_mm_kernel(%arg0: i32, %arg1: i32, %arg2: i32, %arg3: memref<128x128xbf16, #tpu.memory_space<vmem>>, %arg4: memref<128x128xbf16, #tpu.memory_space<vmem>>, %arg5: memref<1x128xf32, #tpu.memory_space<vmem>>, %arg6: memref<128x128xbf16, #tpu.memory_space<vmem>>, %arg7: memref<128x128xf32, #tpu.memory_space<vmem>>) attributes {dimension_semantics = [#tpu.dimension_semantics<parallel>, #tpu.dimension_semantics<parallel>, #tpu.dimension_semantics<arbitrary>], iteration_bounds = array<i64: 1, 1, 1>, scalar_prefetch = 0 : i64, scratch_operands = 1 : i64, tpu.core_type = #tpu.core_type<tc>, window_params = [{transform_indices = @transform_0, window_bounds = array<i64: 128, 128>}, {transform_indices = @transform_1, window_bounds = array<i64: 128, 128>}, {transform_indices = @transform_2, window_bounds = array<i64: 1, 128>}, {transform_indices = @transform_3, window_bounds = array<i64: 128, 128>}]} {
    %c0_i32 = arith.constant 0 : i32
    %0 = arith.cmpi eq, %arg2, %c0_i32 : i32
    %1 = arith.extui %0 : i1 to i32
    %c0_i32_0 = arith.constant 0 : i32
    %2 = arith.cmpi ne, %1, %c0_i32_0 : i32
    scf.if %2 {
      %cst_10 = arith.constant 0.000000e+00 : f32
      %12 = vector.broadcast %cst_10 : f32 to vector<128x128xf32>
      %c0_11 = arith.constant 0 : index
      %c0_12 = arith.constant 0 : index
      %13 = vector.load %arg7[%c0_11, %c0_12] : memref<128x128xf32, #tpu.memory_space<vmem>>, vector<128x128xf32>
      tpu.vector_store %arg7[%c0_11, %c0_12], %12 {strides = array<i32>} : memref<128x128xf32, #tpu.memory_space<vmem>>, vector<128x128xf32>,
    } else {
    }
    %c0 = arith.constant 0 : index
    %c0_1 = arith.constant 0 : index
    %3 = vector.load %arg3[%c0, %c0_1] : memref<128x128xbf16, #tpu.memory_space<vmem>>, vector<128x128xbf16>
    %c0_2 = arith.constant 0 : index
    %c0_3 = arith.constant 0 : index
    %4 = vector.load %arg7[%c0_2, %c0_3] : memref<128x128xf32, #tpu.memory_space<vmem>>, vector<128x128xf32>
    %c0_4 = arith.constant 0 : index
    %c0_5 = arith.constant 0 : index
    %5 = vector.load %arg4[%c0_4, %c0_5] : memref<128x128xbf16, #tpu.memory_space<vmem>>, vector<128x128xbf16>
    %cst = arith.constant dense<0.000000e+00> : vector<128x128xf32>
    %6 = tpu.matmul %3, %5, %cst {dimension_numbers = #tpu.dot_dimension_numbers<[1], [0], [0], [1], [0, 0, 1, 1], [], []>} : vector<128x128xbf16>, vector<128x128xbf16>, vector<128x128xf32> -> vector<128x128xf32>
    %7 = arith.addf %4, %6 : vector<128x128xf32>
    %c0_6 = arith.constant 0 : index
    %c0_7 = arith.constant 0 : index
    %8 = vector.load %arg7[%c0_6, %c0_7] : memref<128x128xf32, #tpu.memory_space<vmem>>, vector<128x128xf32>
    tpu.vector_store %arg7[%c0_6, %c0_7], %7 {strides = array<i32>} : memref<128x128xf32, #tpu.memory_space<vmem>>, vector<128x128xf32>,
    %c0_i32_8 = arith.constant 0 : i32
    %9 = arith.cmpi eq, %arg2, %c0_i32_8 : i32
    %10 = arith.extui %9 : i1 to i32
    %c0_i32_9 = arith.constant 0 : i32
    %11 = arith.cmpi ne, %10, %c0_i32_9 : i32
    scf.if %11 {
      %c0_10 = arith.constant 0 : index
      %c0_11 = arith.constant 0 : index
      %12 = vector.load %arg7[%c0_10, %c0_11] : memref<128x128xf32, #tpu.memory_space<vmem>>, vector<128x128xf32>
      %c0_12 = arith.constant 0 : index
      %c0_13 = arith.constant 0 : index
      %13 = vector.load %arg5[%c0_12, %c0_13] : memref<1x128xf32, #tpu.memory_space<vmem>>, vector<1x128xf32>
      %14 = vector.broadcast %13 : vector<1x128xf32> to vector<128x128xf32>
      %15 = arith.addf %12, %14 : vector<128x128xf32>
      %16 = arith.truncf %15 : vector<128x128xf32> to vector<128x128xbf16>
      %c0_14 = arith.constant 0 : index
      %c0_15 = arith.constant 0 : index
      %17 = vector.load %arg6[%c0_14, %c0_15] : memref<128x128xbf16, #tpu.memory_space<vmem>>, vector<128x128xbf16>
      tpu.vector_store %arg6[%c0_14, %c0_15], %16 {strides = array<i32>} : memref<128x128xbf16, #tpu.memory_space<vmem>>, vector<128x128xbf16>,
    } else {
    }
    return
  }
  func.func @transform_0(%arg0: i32, %arg1: i32, %arg2: i32) -> (i32, i32) {
    %c0_i32 = arith.constant 0 : i32
    return %arg0, %arg2 : i32, i32
  }
  func.func @transform_1(%arg0: i32, %arg1: i32, %arg2: i32) -> (i32, i32) {
    %c0_i32 = arith.constant 0 : i32
    return %arg2, %arg1 : i32, i32
  }
  func.func @transform_2(%arg0: i32, %arg1: i32, %arg2: i32) -> (i32, i32) {
    %c0_i32 = arith.constant 0 : i32
    %c0_i32_0 = arith.constant 0 : i32
    return %c0_i32, %arg1 : i32, i32
  }
  func.func @transform_3(%arg0: i32, %arg1: i32, %arg2: i32) -> (i32, i32) {
    %c0_i32 = arith.constant 0 : i32
    return %arg0, %arg1 : i32, i32
  }
}

module attributes {stable_mosaic.version = 11 : i64} {
  func.func @_attn_kernel(%arg0: i32, %arg1: i32, %arg2: memref<1x64x32xbf16, #tpu.memory_space<vmem>>, %arg3: memref<1x16x64xbf16, #tpu.memory_space<vmem>>, %arg4: memref<1x64x32xbf16, #tpu.memory_space<vmem>>) attributes {dimension_semantics = [#tpu.dimension_semantics<parallel>, #tpu.dimension_semantics<parallel>], iteration_bounds = array<i64: 2, 1>, scalar_prefetch = 0 : i64, scratch_operands = 0 : i64, tpu.core_type = #tpu.core_type<tc>, window_params = [{transform_indices = @transform_0, window_bounds = array<i64: 1, 64, 32>}, {transform_indices = @transform_1, window_bounds = array<i64: 1, 16, 64>}, {transform_indices = @transform_2, window_bounds = array<i64: 1, 64, 32>}]} {
    %c0 = arith.constant 0 : index
    %c0_0 = arith.constant 0 : index
    %c0_1 = arith.constant 0 : index
    %0 = vector.load %arg2[%c0, %c0_0, %c0_1] : memref<1x64x32xbf16, #tpu.memory_space<vmem>>, vector<1x64x32xbf16>
    %1 = vector.shape_cast %0 : vector<1x64x32xbf16> to vector<64x32xbf16>
    %c0_2 = arith.constant 0 : index
    %c0_3 = arith.constant 0 : index
    %c0_4 = arith.constant 0 : index
    %2 = vector.load %arg3[%c0_2, %c0_3, %c0_4] : memref<1x16x64xbf16, #tpu.memory_space<vmem>>, vector<1x16x64xbf16>
    %3 = vector.shape_cast %2 : vector<1x16x64xbf16> to vector<16x64xbf16>
    %4 = arith.extf %1 : vector<64x32xbf16> to vector<64x32xf32>
    %cst = arith.constant 2.500000e-01 : f32
    %5 = vector.broadcast %cst : f32 to vector<64x32xf32>
    %6 = arith.mulf %4, %5 : vector<64x32xf32>
    %7 = vector.extract_strided_slice %6 {offsets = [0, 0], sizes = [64, 16], strides = [1, 1]} : vector<64x32xf32> to vector<64x16xf32>
    %8 = arith.truncf %7 : vector<64x16xf32> to vector<64x16xbf16>
    %9 = vector.extract_strided_slice %3 {offsets = [0, 0], sizes = [16, 16], strides = [1, 1]} : vector<16x64xbf16> to vector<16x16xbf16>
    %10 = vector.extract_strided_slice %3 {offsets = [0, 32], sizes = [16, 16], strides = [1, 1]} : vector<16x64xbf16> to vector<16x16xbf16>
    %cst_5 = arith.constant dense<0.000000e+00> : vector<64x16xf32>
    %11 = tpu.matmul %8, %9, %cst_5 {dimension_numbers = #tpu.dot_dimension_numbers<[1], [1], [0], [0], [0, 0, 1, 0], [], []>} : vector<64x16xbf16>, vector<16x16xbf16>, vector<64x16xf32> -> vector<64x16xf32>
    %cst_6 = arith.constant dense<0xFF800000> : vector<64xf32>
    %12 = vector.multi_reduction <maximumf>, %11, %cst_6 [1] : vector<64x16xf32> to vector<64xf32>
    %13 = vector.shape_cast %12 : vector<64xf32> to vector<64x1xf32>
    %14 = vector.broadcast %13 : vector<64x1xf32> to vector<64x16xf32>
    %15 = arith.subf %11, %14 : vector<64x16xf32>
    %16 = math.exp %15 : vector<64x16xf32>
    %cst_7 = arith.constant dense<0.000000e+00> : vector<64xf32>
    %17 = vector.multi_reduction <add>, %16, %cst_7 [1] : vector<64x16xf32> to vector<64xf32>
    %18 = vector.shape_cast %17 : vector<64xf32> to vector<64x1xf32>
    %19 = arith.truncf %16 : vector<64x16xf32> to vector<64x16xbf16>
    %cst_8 = arith.constant dense<0.000000e+00> : vector<64x16xf32>
    %20 = tpu.matmul %19, %10, %cst_8 {dimension_numbers = #tpu.dot_dimension_numbers<[1], [0], [0], [1], [0, 0, 1, 1], [], []>} : vector<64x16xbf16>, vector<16x16xbf16>, vector<64x16xf32> -> vector<64x16xf32>
    %21 = vector.broadcast %18 : vector<64x1xf32> to vector<64x16xf32>
    %22 = arith.divf %20, %21 : vector<64x16xf32>
    %23 = arith.truncf %22 : vector<64x16xf32> to vector<64x16xbf16>
    %c0_9 = arith.constant 0 : index
    %c0_10 = arith.constant 0 : index
    %c0_11 = arith.constant 0 : index
    %24 = vector.load %arg4[%c0_9, %c0_10, %c0_11] : memref<1x64x32xbf16, #tpu.memory_space<vmem>>, vector<1x64x16xbf16>
    %25 = vector.shape_cast %24 : vector<1x64x16xbf16> to vector<64x16xbf16>
    %26 = vector.shape_cast %23 : vector<64x16xbf16> to vector<1x64x16xbf16>
    tpu.vector_store %arg4[%c0_9, %c0_10, %c0_11], %26 {strides = array<i32>} : memref<1x64x32xbf16, #tpu.memory_space<vmem>>, vector<1x64x16xbf16>,
    %27 = vector.extract_strided_slice %6 {offsets = [0, 16], sizes = [64, 16], strides = [1, 1]} : vector<64x32xf32> to vector<64x16xf32>
    %28 = arith.truncf %27 : vector<64x16xf32> to vector<64x16xbf16>
    %29 = vector.extract_strided_slice %3 {offsets = [0, 16], sizes = [16, 16], strides = [1, 1]} : vector<16x64xbf16> to vector<16x16xbf16>
    %30 = vector.extract_strided_slice %3 {offsets = [0, 48], sizes = [16, 16], strides = [1, 1]} : vector<16x64xbf16> to vector<16x16xbf16>
    %cst_12 = arith.constant dense<0.000000e+00> : vector<64x16xf32>
    %31 = tpu.matmul %28, %29, %cst_12 {dimension_numbers = #tpu.dot_dimension_numbers<[1], [1], [0], [0], [0, 0, 1, 0], [], []>} : vector<64x16xbf16>, vector<16x16xbf16>, vector<64x16xf32> -> vector<64x16xf32>
    %cst_13 = arith.constant dense<0xFF800000> : vector<64xf32>
    %32 = vector.multi_reduction <maximumf>, %31, %cst_13 [1] : vector<64x16xf32> to vector<64xf32>
    %33 = vector.shape_cast %32 : vector<64xf32> to vector<64x1xf32>
    %34 = vector.broadcast %33 : vector<64x1xf32> to vector<64x16xf32>
    %35 = arith.subf %31, %34 : vector<64x16xf32>
    %36 = math.exp %35 : vector<64x16xf32>
    %cst_14 = arith.constant dense<0.000000e+00> : vector<64xf32>
    %37 = vector.multi_reduction <add>, %36, %cst_14 [1] : vector<64x16xf32> to vector<64xf32>
    %38 = vector.shape_cast %37 : vector<64xf32> to vector<64x1xf32>
    %39 = arith.truncf %36 : vector<64x16xf32> to vector<64x16xbf16>
    %cst_15 = arith.constant dense<0.000000e+00> : vector<64x16xf32>
    %40 = tpu.matmul %39, %30, %cst_15 {dimension_numbers = #tpu.dot_dimension_numbers<[1], [0], [0], [1], [0, 0, 1, 1], [], []>} : vector<64x16xbf16>, vector<16x16xbf16>, vector<64x16xf32> -> vector<64x16xf32>
    %41 = vector.broadcast %38 : vector<64x1xf32> to vector<64x16xf32>
    %42 = arith.divf %40, %41 : vector<64x16xf32>
    %43 = arith.truncf %42 : vector<64x16xf32> to vector<64x16xbf16>
    %c0_16 = arith.constant 0 : index
    %c0_17 = arith.constant 0 : index
    %c16 = arith.constant 16 : index
    %44 = vector.load %arg4[%c0_16, %c0_17, %c16] : memref<1x64x32xbf16, #tpu.memory_space<vmem>>, vector<1x64x16xbf16>
    %45 = vector.shape_cast %44 : vector<1x64x16xbf16> to vector<64x16xbf16>
    %46 = vector.shape_cast %43 : vector<64x16xbf16> to vector<1x64x16xbf16>
    tpu.vector_store %arg4[%c0_16, %c0_17, %c16], %46 {strides = array<i32>} : memref<1x64x32xbf16, #tpu.memory_space<vmem>>, vector<1x64x16xbf16>,
    return
  }
  func.func @transform_0(%arg0: i32, %arg1: i32) -> (i32, i32, i32) {
    %c0_i32 = arith.constant 0 : i32
    %c0_i32_0 = arith.constant 0 : i32
    return %arg0, %arg1, %c0_i32 : i32, i32, i32
  }
  func.func @transform_1(%arg0: i32, %arg1: i32) -> (i32, i32, i32) {
    %c0_i32 = arith.constant 0 : i32
    %c0_i32_0 = arith.constant 0 : i32
    %c0_i32_1 = arith.constant 0 : i32
    return %arg0, %c0_i32, %c0_i32_0 : i32, i32, i32
  }
  func.func @transform_2(%arg0: i32, %arg1: i32) -> (i32, i32, i32) {
    %c0_i32 = arith.constant 0 : i32
    %c0_i32_0 = arith.constant 0 : i32
    return %arg0, %arg1, %c0_i32 : i32, i32, i32
  }
}

module attributes {stable_mosaic.version = 11 : i64} {
  func.func @_mm_kernel(%arg0: i32, %arg1: i32, %arg2: i32, %arg3: memref<128x128xbf16, #tpu.memory_space<vmem>>, %arg4: memref<128x128xbf16, #tpu.memory_space<vmem>>, %arg5: memref<1x128xf32, #tpu.memory_space<vmem>>, %arg6: memref<1x128xf32, #tpu.memory_space<vmem>>, %arg7: memref<1x128xf32, #tpu.memory_space<vmem>>, %arg8: memref<128x128xbf16, #tpu.memory_space<vmem>>, %arg9: memref<128x128xf32, #tpu.memory_space<vmem>>) attributes {dimension_semantics = [#tpu.dimension_semantics<parallel>, #tpu.dimension_semantics<parallel>, #tpu.dimension_semantics<arbitrary>], iteration_bounds = array<i64: 1, 1, 1>, scalar_prefetch = 0 : i64, scratch_operands = 1 : i64, tpu.core_type = #tpu.core_type<tc>, window_params = [{transform_indices = @transform_0, window_bounds = array<i64: 128, 128>}, {transform_indices = @transform_1, window_bounds = array<i64: 128, 128>}, {transform_indices = @transform_2, window_bounds = array<i64: 1, 128>}, {transform_indices = @transform_3, window_bounds = array<i64: 1, 128>}, {transform_indices = @transform_4, window_bounds = array<i64: 1, 128>}, {transform_indices = @transform_5, window_bounds = array<i64: 128, 128>}]} {
    %c0_i32 = arith.constant 0 : i32
    %0 = arith.cmpi eq, %arg2, %c0_i32 : i32
    %1 = arith.extui %0 : i1 to i32
    %c0_i32_0 = arith.constant 0 : i32
    %2 = arith.cmpi ne, %1, %c0_i32_0 : i32
    scf.if %2 {
      %cst_21 = arith.constant 0.000000e+00 : f32
      %43 = vector.broadcast %cst_21 : f32 to vector<128x128xf32>
      %c0_22 = arith.constant 0 : index
      %c0_23 = arith.constant 0 : index
      %44 = vector.load %arg9[%c0_22, %c0_23] : memref<128x128xf32, #tpu.memory_space<vmem>>, vector<128x128xf32>
      tpu.vector_store %arg9[%c0_22, %c0_23], %43 {strides = array<i32>} : memref<128x128xf32, #tpu.memory_space<vmem>>, vector<128x128xf32>,
    } else {
    }
    %c0 = arith.constant 0 : index
    %c0_1 = arith.constant 0 : index
    %3 = vector.load %arg3[%c0, %c0_1] : memref<128x128xbf16, #tpu.memory_space<vmem>>, vector<128x128xbf16>
    %4 = arith.extf %3 : vector<128x128xbf16> to vector<128x128xf32>
    %c0_2 = arith.constant 0 : index
    %c0_3 = arith.constant 0 : index
    %5 = vector.load %arg6[%c0_2, %c0_3] : memref<1x128xf32, #tpu.memory_space<vmem>>, vector<1x128xf32>
    %c0_4 = arith.constant 0 : index
    %c0_5 = arith.constant 0 : index
    %6 = vector.load %arg7[%c0_4, %c0_5] : memref<1x128xf32, #tpu.memory_space<vmem>>, vector<1x128xf32>
    %7 = tpu.iota {dimensions = array<i32: 1>} : vector<128x128xi32>
    %c32_i32 = arith.constant 32 : i32
    %8 = vector.broadcast %c32_i32 : i32 to vector<128x128xi32>
    %9 = arith.cmpi slt, %7, %8 : vector<128x128xi32>
    %cst = arith.constant 0.000000e+00 : f32
    %10 = vector.broadcast %cst : f32 to vector<128x128xf32>
    %11 = arith.select %9, %4, %10 : vector<128x128xi1>, vector<128x128xf32>
    %cst_6 = arith.constant dense<0.000000e+00> : vector<128xf32>
    %12 = vector.multi_reduction <add>, %11, %cst_6 [1] : vector<128x128xf32> to vector<128xf32>
    %13 = vector.shape_cast %12 : vector<128xf32> to vector<128x1xf32>
    %cst_7 = arith.constant 3.200000e+01 : f32
    %14 = vector.broadcast %cst_7 : f32 to vector<128x1xf32>
    %15 = arith.divf %13, %14 : vector<128x1xf32>
    %16 = vector.broadcast %15 : vector<128x1xf32> to vector<128x128xf32>
    %17 = arith.subf %4, %16 : vector<128x128xf32>
    %cst_8 = arith.constant 0.000000e+00 : f32
    %18 = vector.broadcast %cst_8 : f32 to vector<128x128xf32>
    %19 = arith.select %9, %17, %18 : vector<128x128xi1>, vector<128x128xf32>
    %20 = arith.mulf %19, %19 : vector<128x128xf32>
    %cst_9 = arith.constant dense<0.000000e+00> : vector<128xf32>
    %21 = vector.multi_reduction <add>, %20, %cst_9 [1] : vector<128x128xf32> to vector<128xf32>
    %22 = vector.shape_cast %21 : vector<128xf32> to vector<128x1xf32>
    %cst_10 = arith.constant 3.200000e+01 : f32
    %23 = vector.broadcast %cst_10 : f32 to vector<128x1xf32>
    %24 = arith.divf %22, %23 : vector<128x1xf32>
    %cst_11 = arith.constant 9.99999997E-7 : f32
    %25 = vector.broadcast %cst_11 : f32 to vector<128x1xf32>
    %26 = arith.addf %24, %25 : vector<128x1xf32>
    %27 = math.rsqrt %26 : vector<128x1xf32>
    %28 = vector.broadcast %27 : vector<128x1xf32> to vector<128x128xf32>
    %29 = arith.mulf %17, %28 : vector<128x128xf32>
    %30 = vector.broadcast %5 : vector<1x128xf32> to vector<128x128xf32>
    %31 = arith.mulf %29, %30 : vector<128x128xf32>
    %32 = vector.broadcast %6 : vector<1x128xf32> to vector<128x128xf32>
    %33 = arith.addf %31, %32 : vector<128x128xf32>
    %34 = arith.truncf %33 : vector<128x128xf32> to vector<128x128xbf16>
    %c0_12 = arith.constant 0 : index
    %c0_13 = arith.constant 0 : index
    %35 = vector.load %arg9[%c0_12, %c0_13] : memref<128x128xf32, #tpu.memory_space<vmem>>, vector<128x128xf32>
    %c0_14 = arith.constant 0 : index
    %c0_15 = arith.constant 0 : index
    %36 = vector.load %arg4[%c0_14, %c0_15] : memref<128x128xbf16, #tpu.memory_space<vmem>>, vector<128x128xbf16>
    %cst_16 = arith.constant dense<0.000000e+00> : vector<128x128xf32>
    %37 = tpu.matmul %34, %36, %cst_16 {dimension_numbers = #tpu.dot_dimension_numbers<[1], [0], [0], [1], [0, 0, 1, 1], [], []>} : vector<128x128xbf16>, vector<128x128xbf16>, vector<128x128xf32> -> vector<128x128xf32>
    %38 = arith.addf %35, %37 : vector<128x128xf32>
    %c0_17 = arith.constant 0 : index
    %c0_18 = arith.constant 0 : index
    %39 = vector.load %arg9[%c0_17, %c0_18] : memref<128x128xf32, #tpu.memory_space<vmem>>, vector<128x128xf32>
    tpu.vector_store %arg9[%c0_17, %c0_18], %38 {strides = array<i32>} : memref<128x128xf32, #tpu.memory_space<vmem>>, vector<128x128xf32>,
    %c0_i32_19 = arith.constant 0 : i32
    %40 = arith.cmpi eq, %arg2, %c0_i32_19 : i32
    %41 = arith.extui %40 : i1 to i32
    %c0_i32_20 = arith.constant 0 : i32
    %42 = arith.cmpi ne, %41, %c0_i32_20 : i32
    scf.if %42 {
      %c0_21 = arith.constant 0 : index
      %c0_22 = arith.constant 0 : index
      %43 = vector.load %arg9[%c0_21, %c0_22] : memref<128x128xf32, #tpu.memory_space<vmem>>, vector<128x128xf32>
      %c0_23 = arith.constant 0 : index
      %c0_24 = arith.constant 0 : index
      %44 = vector.load %arg5[%c0_23, %c0_24] : memref<1x128xf32, #tpu.memory_space<vmem>>, vector<1x128xf32>
      %45 = vector.broadcast %44 : vector<1x128xf32> to vector<128x128xf32>
      %46 = arith.addf %43, %45 : vector<128x128xf32>
      %47 = arith.truncf %46 : vector<128x128xf32> to vector<128x128xbf16>
      %c0_25 = arith.constant 0 : index
      %c0_26 = arith.constant 0 : index
      %48 = vector.load %arg8[%c0_25, %c0_26] : memref<128x128xbf16, #tpu.memory_space<vmem>>, vector<128x128xbf16>
      tpu.vector_store %arg8[%c0_25, %c0_26], %47 {strides = array<i32>} : memref<128x128xbf16, #tpu.memory_space<vmem>>, vector<128x128xbf16>,
    } else {
    }
    return
  }
  func.func @transform_0(%arg0: i32, %arg1: i32, %arg2: i32) -> (i32, i32) {
    %c0_i32 = arith.constant 0 : i32
    return %arg0, %arg2 : i32, i32
  }
  func.func @transform_1(%arg0: i32, %arg1: i32, %arg2: i32) -> (i32, i32) {
    %c0_i32 = arith.constant 0 : i32
    return %arg2, %arg1 : i32, i32
  }
  func.func @transform_2(%arg0: i32, %arg1: i32, %arg2: i32) -> (i32, i32) {
    %c0_i32 = arith.constant 0 : i32
    %c0_i32_0 = arith.constant 0 : i32
    return %c0_i32, %arg1 : i32, i32
  }
  func.func @transform_3(%arg0: i32, %arg1: i32, %arg2: i32) -> (i32, i32) {
    %c0_i32 = arith.constant 0 : i32
    %c0_i32_0 = arith.constant 0 : i32
    return %c0_i32, %arg2 : i32, i32
  }
  func.func @transform_4(%arg0: i32, %arg1: i32, %arg2: i32) -> (i32, i32) {
    %c0_i32 = arith.constant 0 : i32
    %c0_i32_0 = arith.constant 0 : i32
    return %c0_i32, %arg2 : i32, i32
  }
  func.func @transform_5(%arg0: i32, %arg1: i32, %arg2: i32) -> (i32, i32) {
    %c0_i32 = arith.constant 0 : i32
    return %arg0, %arg1 : i32, i32
  }
}

module attributes {stable_mosaic.version = 11 : i64} {
  func.func @_mm_kernel(%arg0: i32, %arg1: i32, %arg2: i32, %arg3: memref<128x128xbf16, #tpu.memory_space<vmem>>, %arg4: memref<128x128xbf16, #tpu.memory_space<vmem>>, %arg5: memref<1x128xf32, #tpu.memory_space<vmem>>, %arg6: memref<128x128xbf16, #tpu.memory_space<vmem>>, %arg7: memref<128x128xbf16, #tpu.memory_space<vmem>>, %arg8: memref<128x128xf32, #tpu.memory_space<vmem>>) attributes {dimension_semantics = [#tpu.dimension_semantics<parallel>, #tpu.dimension_semantics<parallel>, #tpu.dimension_semantics<arbitrary>], iteration_bounds = array<i64: 1, 1, 1>, scalar_prefetch = 0 : i64, scratch_operands = 1 : i64, tpu.core_type = #tpu.core_type<tc>, window_params = [{transform_indices = @transform_0, window_bounds = array<i64: 128, 128>}, {transform_indices = @transform_1, window_bounds = array<i64: 128, 128>}, {transform_indices = @transform_2, window_bounds = array<i64: 1, 128>}, {transform_indices = @transform_3, window_bounds = array<i64: 128, 128>}, {transform_indices = @transform_4, window_bounds = array<i64: 128, 128>}]} {
    %c0_i32 = arith.constant 0 : i32
    %0 = arith.cmpi eq, %arg2, %c0_i32 : i32
    %1 = arith.extui %0 : i1 to i32
    %c0_i32_0 = arith.constant 0 : i32
    %2 = arith.cmpi ne, %1, %c0_i32_0 : i32
    scf.if %2 {
      %cst_10 = arith.constant 0.000000e+00 : f32
      %12 = vector.broadcast %cst_10 : f32 to vector<128x128xf32>
      %c0_11 = arith.constant 0 : index
      %c0_12 = arith.constant 0 : index
      %13 = vector.load %arg8[%c0_11, %c0_12] : memref<128x128xf32, #tpu.memory_space<vmem>>, vector<128x128xf32>
      tpu.vector_store %arg8[%c0_11, %c0_12], %12 {strides = array<i32>} : memref<128x128xf32, #tpu.memory_space<vmem>>, vector<128x128xf32>,
    } else {
    }
    %c0 = arith.constant 0 : index
    %c0_1 = arith.constant 0 : index
    %3 = vector.load %arg3[%c0, %c0_1] : memref<128x128xbf16, #tpu.memory_space<vmem>>, vector<128x128xbf16>
    %c0_2 = arith.constant 0 : index
    %c0_3 = arith.constant 0 : index
    %4 = vector.load %arg8[%c0_2, %c0_3] : memref<128x128xf32, #tpu.memory_space<vmem>>, vector<128x128xf32>
    %c0_4 = arith.constant 0 : index
    %c0_5 = arith.constant 0 : index
    %5 = vector.load %arg4[%c0_4, %c0_5] : memref<128x128xbf16, #tpu.memory_space<vmem>>, vector<128x128xbf16>
    %cst = arith.constant dense<0.000000e+00> : vector<128x128xf32>
    %6 = tpu.matmul %3, %5, %cst {dimension_numbers = #tpu.dot_dimension_numbers<[1], [0], [0], [1], [0, 0, 1, 1], [], []>} : vector<128x128xbf16>, vector<128x128xbf16>, vector<128x128xf32> -> vector<128x128xf32>
    %7 = arith.addf %4, %6 : vector<128x128xf32>
    %c0_6 = arith.constant 0 : index
    %c0_7 = arith.constant 0 : index
    %8 = vector.load %arg8[%c0_6, %c0_7] : memref<128x128xf32, #tpu.memory_space<vmem>>, vector<128x128xf32>
    tpu.vector_store %arg8[%c0_6, %c0_7], %7 {strides = array<i32>} : memref<128x128xf32, #tpu.memory_space<vmem>>, vector<128x128xf32>,
    %c0_i32_8 = arith.constant 0 : i32
    %9 = arith.cmpi eq, %arg2, %c0_i32_8 : i32
    %10 = arith.extui %9 : i1 to i32
    %c0_i32_9 = arith.constant 0 : i32
    %11 = arith.cmpi ne, %10, %c0_i32_9 : i32
    scf.if %11 {
      %c0_10 = arith.constant 0 : index
      %c0_11 = arith.constant 0 : index
      %12 = vector.load %arg8[%c0_10, %c0_11] : memref<128x128xf32, #tpu.memory_space<vmem>>, vector<128x128xf32>
      %c0_12 = arith.constant 0 : index
      %c0_13 = arith.constant 0 : index
      %13 = vector.load %arg5[%c0_12, %c0_13] : memref<1x128xf32, #tpu.memory_space<vmem>>, vector<1x128xf32>
      %14 = vector.broadcast %13 : vector<1x128xf32> to vector<128x128xf32>
      %15 = arith.addf %12, %14 : vector<128x128xf32>
      %c0_14 = arith.constant 0 : index
      %c0_15 = arith.constant 0 : index
      %16 = vector.load %arg6[%c0_14, %c0_15] : memref<128x128xbf16, #tpu.memory_space<vmem>>, vector<128x128xbf16>
      %17 = arith.extf %16 : vector<128x128xbf16> to vector<128x128xf32>
      %18 = arith.addf %15, %17 : vector<128x128xf32>
      %19 = arith.truncf %18 : vector<128x128xf32> to vector<128x128xbf16>
      %c0_16 = arith.constant 0 : index
      %c0_17 = arith.constant 0 : index
      %20 = vector.load %arg7[%c0_16, %c0_17] : memref<128x128xbf16, #tpu.memory_space<vmem>>, vector<128x128xbf16>
      tpu.vector_store %arg7[%c0_16, %c0_17], %19 {strides = array<i32>} : memref<128x128xbf16, #tpu.memory_space<vmem>>, vector<128x128xbf16>,
    } else {
    }
    return
  }
  func.func @transform_0(%arg0: i32, %arg1: i32, %arg2: i32) -> (i32, i32) {
    %c0_i32 = arith.constant 0 : i32
    return %arg0, %arg2 : i32, i32
  }
  func.func @transform_1(%arg0: i32, %arg1: i32, %arg2: i32) -> (i32, i32) {
    %c0_i32 = arith.constant 0 : i32
    return %arg2, %arg1 : i32, i32
  }
  func.func @transform_2(%arg0: i32, %arg1: i32, %arg2: i32) -> (i32, i32) {
    %c0_i32 = arith.constant 0 : i32
    %c0_i32_0 = arith.constant 0 : i32
    return %c0_i32, %arg1 : i32, i32
  }
  func.func @transform_3(%arg0: i32, %arg1: i32, %arg2: i32) -> (i32, i32) {
    %c0_i32 = arith.constant 0 : i32
    return %arg0, %arg1 : i32, i32
  }
  func.func @transform_4(%arg0: i32, %arg1: i32, %arg2: i32) -> (i32, i32) {
    %c0_i32 = arith.constant 0 : i32
    return %arg0, %arg1 : i32, i32
  }
}

module attributes {stable_mosaic.version = 11 : i64} {
  func.func @_layernorm_kernel(%arg0: i32, %arg1: memref<128x32xbf16, #tpu.memory_space<vmem>>, %arg2: memref<1x32xf32, #tpu.memory_space<vmem>>, %arg3: memref<1x32xf32, #tpu.memory_space<vmem>>, %arg4: memref<128x32xf32, #tpu.memory_space<vmem>>) attributes {dimension_semantics = [#tpu.dimension_semantics<parallel>], iteration_bounds = array<i64: 1>, scalar_prefetch = 0 : i64, scratch_operands = 0 : i64, tpu.core_type = #tpu.core_type<tc>, window_params = [{transform_indices = @transform_0, window_bounds = array<i64: 128, 32>}, {pipeline_mode = #tpu.pipeline_mode<synchronous>, transform_indices = @transform_1, window_bounds = array<i64: 1, 32>}, {pipeline_mode = #tpu.pipeline_mode<synchronous>, transform_indices = @transform_2, window_bounds = array<i64: 1, 32>}, {transform_indices = @transform_3, window_bounds = array<i64: 128, 32>}]} {
    %c0 = arith.constant 0 : index
    %c0_0 = arith.constant 0 : index
    %0 = vector.load %arg1[%c0, %c0_0] : memref<128x32xbf16, #tpu.memory_space<vmem>>, vector<128x32xbf16>
    %1 = arith.extf %0 : vector<128x32xbf16> to vector<128x32xf32>
    %c0_1 = arith.constant 0 : index
    %c0_2 = arith.constant 0 : index
    %2 = vector.load %arg2[%c0_1, %c0_2] : memref<1x32xf32, #tpu.memory_space<vmem>>, vector<1x32xf32>
    %c0_3 = arith.constant 0 : index
    %c0_4 = arith.constant 0 : index
    %3 = vector.load %arg3[%c0_3, %c0_4] : memref<1x32xf32, #tpu.memory_space<vmem>>, vector<1x32xf32>
    %cst = arith.constant dense<0.000000e+00> : vector<128xf32>
    %4 = vector.multi_reduction <add>, %1, %cst [1] : vector<128x32xf32> to vector<128xf32>
    %5 = vector.shape_cast %4 : vector<128xf32> to vector<128x1xf32>
    %cst_5 = arith.constant 3.200000e+01 : f32
    %6 = vector.broadcast %cst_5 : f32 to vector<128x1xf32>
    %7 = arith.divf %5, %6 : vector<128x1xf32>
    %8 = vector.broadcast %7 : vector<128x1xf32> to vector<128x32xf32>
    %9 = arith.subf %1, %8 : vector<128x32xf32>
    %10 = arith.mulf %9, %9 : vector<128x32xf32>
    %cst_6 = arith.constant dense<0.000000e+00> : vector<128xf32>
    %11 = vector.multi_reduction <add>, %10, %cst_6 [1] : vector<128x32xf32> to vector<128xf32>
    %12 = vector.shape_cast %11 : vector<128xf32> to vector<128x1xf32>
    %cst_7 = arith.constant 3.200000e+01 : f32
    %13 = vector.broadcast %cst_7 : f32 to vector<128x1xf32>
    %14 = arith.divf %12, %13 : vector<128x1xf32>
    %cst_8 = arith.constant 9.99999997E-7 : f32
    %15 = vector.broadcast %cst_8 : f32 to vector<128x1xf32>
    %16 = arith.addf %14, %15 : vector<128x1xf32>
    %17 = math.rsqrt %16 : vector<128x1xf32>
    %18 = vector.broadcast %17 : vector<128x1xf32> to vector<128x32xf32>
    %19 = arith.mulf %9, %18 : vector<128x32xf32>
    %20 = vector.broadcast %2 : vector<1x32xf32> to vector<128x32xf32>
    %21 = arith.mulf %19, %20 : vector<128x32xf32>
    %22 = vector.broadcast %3 : vector<1x32xf32> to vector<128x32xf32>
    %23 = arith.addf %21, %22 : vector<128x32xf32>
    %c0_9 = arith.constant 0 : index
    %c0_10 = arith.constant 0 : index
    %24 = vector.load %arg4[%c0_9, %c0_10] : memref<128x32xf32, #tpu.memory_space<vmem>>, vector<128x32xf32>
    tpu.vector_store %arg4[%c0_9, %c0_10], %23 {strides = array<i32>} : memref<128x32xf32, #tpu.memory_space<vmem>>, vector<128x32xf32>,
    return
  }
  func.func @transform_0(%arg0: i32) -> (i32, i32) {
    %c0_i32 = arith.constant 0 : i32
    %c0_i32_0 = arith.constant 0 : i32
    return %arg0, %c0_i32 : i32, i32
  }
  func.func @transform_1(%arg0: i32) -> (i32, i32) {
    %c0_i32 = arith.constant 0 : i32
    %c0_i32_0 = arith.constant 0 : i32
    %c0_i32_1 = arith.constant 0 : i32
    return %c0_i32, %c0_i32_0 : i32, i32
  }
  func.func @transform_2(%arg0: i32) -> (i32, i32) {
    %c0_i32 = arith.constant 0 : i32
    %c0_i32_0 = arith.constant 0 : i32
    %c0_i32_1 = arith.constant 0 : i32
    return %c0_i32, %c0_i32_0 : i32, i32
  }
  func.func @transform_3(%arg0: i32) -> (i32, i32) {
    %c0_i32 = arith.constant 0 : i32
    %c0_i32_0 = arith.constant 0 : i32
    return %arg0, %c0_i32 : i32, i32
  }
}

module attributes {stable_mosaic.version = 11 : i64} {
  func.func @_dwconv3x3_kernel(%arg0: i32, %arg1: i32, %arg2: memref<1x10x10x128xbf16, #tpu.memory_space<vmem>>, %arg3: memref<3x3x128xf32, #tpu.memory_space<vmem>>, %arg4: memref<1x1x128xf32, #tpu.memory_space<vmem>>, %arg5: memref<1x8x8x128xbf16, #tpu.memory_space<vmem>>) attributes {dimension_semantics = [#tpu.dimension_semantics<parallel>, #tpu.dimension_semantics<parallel>], iteration_bounds = array<i64: 2, 1>, scalar_prefetch = 0 : i64, scratch_operands = 0 : i64, tpu.core_type = #tpu.core_type<tc>, window_params = [{transform_indices = @transform_0, window_bounds = array<i64: 1, 10, 10, 128>}, {transform_indices = @transform_1, window_bounds = array<i64: 3, 3, 128>}, {transform_indices = @transform_2, window_bounds = array<i64: 1, 1, 128>}, {transform_indices = @transform_3, window_bounds = array<i64: 1, 8, 8, 128>}]} {
    %c0 = arith.constant 0 : index
    %c0_0 = arith.constant 0 : index
    %c0_1 = arith.constant 0 : index
    %0 = vector.load %arg3[%c0, %c0_0, %c0_1] : memref<3x3x128xf32, #tpu.memory_space<vmem>>, vector<3x3x128xf32>
    %c0_2 = arith.constant 0 : index
    %c0_3 = arith.constant 0 : index
    %c0_4 = arith.constant 0 : index
    %1 = vector.load %arg4[%c0_2, %c0_3, %c0_4] : memref<1x1x128xf32, #tpu.memory_space<vmem>>, vector<1x1x128xf32>
    %c0_i32 = arith.constant 0 : i32
    %c8_i32 = arith.constant 8 : i32
    %2 = arith.muli %c0_i32, %c8_i32 : i32
    %3 = tpu.assume_multiple %2, 8 : i32
    %c0_5 = arith.constant 0 : index
    %4 = arith.index_cast %3 : i32 to index
    %c0_6 = arith.constant 0 : index
    %c0_7 = arith.constant 0 : index
    %5 = vector.load %arg2[%c0_5, %4, %c0_6, %c0_7] : memref<1x10x10x128xbf16, #tpu.memory_space<vmem>>, vector<1x10x10x128xbf16>
    %6 = vector.shape_cast %5 : vector<1x10x10x128xbf16> to vector<10x10x128xbf16>
    %7 = arith.extf %6 : vector<10x10x128xbf16> to vector<10x10x128xf32>
    %cst = arith.constant 0.000000e+00 : f32
    %8 = vector.broadcast %cst : f32 to vector<8x8x128xf32>
    %9 = vector.extract_strided_slice %7 {offsets = [0, 0, 0], sizes = [8, 8, 128], strides = [1, 1, 1]} : vector<10x10x128xf32> to vector<8x8x128xf32>
    %10 = vector.extract_strided_slice %0 {offsets = [0, 0, 0], sizes = [1, 1, 128], strides = [1, 1, 1]} : vector<3x3x128xf32> to vector<1x1x128xf32>
    %11 = vector.shape_cast %10 : vector<1x1x128xf32> to vector<128xf32>
    %12 = vector.shape_cast %11 : vector<128xf32> to vector<1x1x128xf32>
    %13 = vector.broadcast %12 : vector<1x1x128xf32> to vector<8x8x128xf32>
    %14 = arith.mulf %9, %13 : vector<8x8x128xf32>
    %15 = arith.addf %8, %14 : vector<8x8x128xf32>
    %16 = vector.extract_strided_slice %7 {offsets = [0, 1, 0], sizes = [8, 8, 128], strides = [1, 1, 1]} : vector<10x10x128xf32> to vector<8x8x128xf32>
    %17 = vector.extract_strided_slice %0 {offsets = [0, 1, 0], sizes = [1, 1, 128], strides = [1, 1, 1]} : vector<3x3x128xf32> to vector<1x1x128xf32>
    %18 = vector.shape_cast %17 : vector<1x1x128xf32> to vector<128xf32>
    %19 = vector.shape_cast %18 : vector<128xf32> to vector<1x1x128xf32>
    %20 = vector.broadcast %19 : vector<1x1x128xf32> to vector<8x8x128xf32>
    %21 = arith.mulf %16, %20 : vector<8x8x128xf32>
    %22 = arith.addf %15, %21 : vector<8x8x128xf32>
    %23 = vector.extract_strided_slice %7 {offsets = [0, 2, 0], sizes = [8, 8, 128], strides = [1, 1, 1]} : vector<10x10x128xf32> to vector<8x8x128xf32>
    %24 = vector.extract_strided_slice %0 {offsets = [0, 2, 0], sizes = [1, 1, 128], strides = [1, 1, 1]} : vector<3x3x128xf32> to vector<1x1x128xf32>
    %25 = vector.shape_cast %24 : vector<1x1x128xf32> to vector<128xf32>
    %26 = vector.shape_cast %25 : vector<128xf32> to vector<1x1x128xf32>
    %27 = vector.broadcast %26 : vector<1x1x128xf32> to vector<8x8x128xf32>
    %28 = arith.mulf %23, %27 : vector<8x8x128xf32>
    %29 = arith.addf %22, %28 : vector<8x8x128xf32>
    %30 = vector.extract_strided_slice %7 {offsets = [1, 0, 0], sizes = [8, 8, 128], strides = [1, 1, 1]} : vector<10x10x128xf32> to vector<8x8x128xf32>
    %31 = vector.extract_strided_slice %0 {offsets = [1, 0, 0], sizes = [1, 1, 128], strides = [1, 1, 1]} : vector<3x3x128xf32> to vector<1x1x128xf32>
    %32 = vector.shape_cast %31 : vector<1x1x128xf32> to vector<128xf32>
    %33 = vector.shape_cast %32 : vector<128xf32> to vector<1x1x128xf32>
    %34 = vector.broadcast %33 : vector<1x1x128xf32> to vector<8x8x128xf32>
    %35 = arith.mulf %30, %34 : vector<8x8x128xf32>
    %36 = arith.addf %29, %35 : vector<8x8x128xf32>
    %37 = vector.extract_strided_slice %7 {offsets = [1, 1, 0], sizes = [8, 8, 128], strides = [1, 1, 1]} : vector<10x10x128xf32> to vector<8x8x128xf32>
    %38 = vector.extract_strided_slice %0 {offsets = [1, 1, 0], sizes = [1, 1, 128], strides = [1, 1, 1]} : vector<3x3x128xf32> to vector<1x1x128xf32>
    %39 = vector.shape_cast %38 : vector<1x1x128xf32> to vector<128xf32>
    %40 = vector.shape_cast %39 : vector<128xf32> to vector<1x1x128xf32>
    %41 = vector.broadcast %40 : vector<1x1x128xf32> to vector<8x8x128xf32>
    %42 = arith.mulf %37, %41 : vector<8x8x128xf32>
    %43 = arith.addf %36, %42 : vector<8x8x128xf32>
    %44 = vector.extract_strided_slice %7 {offsets = [1, 2, 0], sizes = [8, 8, 128], strides = [1, 1, 1]} : vector<10x10x128xf32> to vector<8x8x128xf32>
    %45 = vector.extract_strided_slice %0 {offsets = [1, 2, 0], sizes = [1, 1, 128], strides = [1, 1, 1]} : vector<3x3x128xf32> to vector<1x1x128xf32>
    %46 = vector.shape_cast %45 : vector<1x1x128xf32> to vector<128xf32>
    %47 = vector.shape_cast %46 : vector<128xf32> to vector<1x1x128xf32>
    %48 = vector.broadcast %47 : vector<1x1x128xf32> to vector<8x8x128xf32>
    %49 = arith.mulf %44, %48 : vector<8x8x128xf32>
    %50 = arith.addf %43, %49 : vector<8x8x128xf32>
    %51 = vector.extract_strided_slice %7 {offsets = [2, 0, 0], sizes = [8, 8, 128], strides = [1, 1, 1]} : vector<10x10x128xf32> to vector<8x8x128xf32>
    %52 = vector.extract_strided_slice %0 {offsets = [2, 0, 0], sizes = [1, 1, 128], strides = [1, 1, 1]} : vector<3x3x128xf32> to vector<1x1x128xf32>
    %53 = vector.shape_cast %52 : vector<1x1x128xf32> to vector<128xf32>
    %54 = vector.shape_cast %53 : vector<128xf32> to vector<1x1x128xf32>
    %55 = vector.broadcast %54 : vector<1x1x128xf32> to vector<8x8x128xf32>
    %56 = arith.mulf %51, %55 : vector<8x8x128xf32>
    %57 = arith.addf %50, %56 : vector<8x8x128xf32>
    %58 = vector.extract_strided_slice %7 {offsets = [2, 1, 0], sizes = [8, 8, 128], strides = [1, 1, 1]} : vector<10x10x128xf32> to vector<8x8x128xf32>
    %59 = vector.extract_strided_slice %0 {offsets = [2, 1, 0], sizes = [1, 1, 128], strides = [1, 1, 1]} : vector<3x3x128xf32> to vector<1x1x128xf32>
    %60 = vector.shape_cast %59 : vector<1x1x128xf32> to vector<128xf32>
    %61 = vector.shape_cast %60 : vector<128xf32> to vector<1x1x128xf32>
    %62 = vector.broadcast %61 : vector<1x1x128xf32> to vector<8x8x128xf32>
    %63 = arith.mulf %58, %62 : vector<8x8x128xf32>
    %64 = arith.addf %57, %63 : vector<8x8x128xf32>
    %65 = vector.extract_strided_slice %7 {offsets = [2, 2, 0], sizes = [8, 8, 128], strides = [1, 1, 1]} : vector<10x10x128xf32> to vector<8x8x128xf32>
    %66 = vector.extract_strided_slice %0 {offsets = [2, 2, 0], sizes = [1, 1, 128], strides = [1, 1, 1]} : vector<3x3x128xf32> to vector<1x1x128xf32>
    %67 = vector.shape_cast %66 : vector<1x1x128xf32> to vector<128xf32>
    %68 = vector.shape_cast %67 : vector<128xf32> to vector<1x1x128xf32>
    %69 = vector.broadcast %68 : vector<1x1x128xf32> to vector<8x8x128xf32>
    %70 = arith.mulf %65, %69 : vector<8x8x128xf32>
    %71 = arith.addf %64, %70 : vector<8x8x128xf32>
    %72 = vector.broadcast %1 : vector<1x1x128xf32> to vector<8x8x128xf32>
    %73 = arith.addf %71, %72 : vector<8x8x128xf32>
    %cst_8 = arith.constant 5.000000e-01 : f32
    %74 = vector.broadcast %cst_8 : f32 to vector<8x8x128xf32>
    %75 = arith.mulf %74, %73 : vector<8x8x128xf32>
    %cst_9 = arith.constant 4.471500e-02 : f32
    %76 = vector.broadcast %cst_9 : f32 to vector<8x8x128xf32>
    %77 = arith.mulf %76, %73 : vector<8x8x128xf32>
    %78 = arith.mulf %77, %73 : vector<8x8x128xf32>
    %79 = arith.mulf %78, %73 : vector<8x8x128xf32>
    %80 = arith.addf %73, %79 : vector<8x8x128xf32>
    %cst_10 = arith.constant 0.797884583 : f32
    %81 = vector.broadcast %cst_10 : f32 to vector<8x8x128xf32>
    %82 = arith.mulf %81, %80 : vector<8x8x128xf32>
    %83 = math.tanh %82 : vector<8x8x128xf32>
    %cst_11 = arith.constant 1.000000e+00 : f32
    %84 = vector.broadcast %cst_11 : f32 to vector<8x8x128xf32>
    %85 = arith.addf %84, %83 : vector<8x8x128xf32>
    %86 = arith.mulf %75, %85 : vector<8x8x128xf32>
    %87 = arith.truncf %86 : vector<8x8x128xf32> to vector<8x8x128xbf16>
    %c0_12 = arith.constant 0 : index
    %88 = arith.index_cast %3 : i32 to index
    %c0_13 = arith.constant 0 : index
    %c0_14 = arith.constant 0 : index
    %89 = vector.load %arg5[%c0_12, %88, %c0_13, %c0_14] : memref<1x8x8x128xbf16, #tpu.memory_space<vmem>>, vector<1x8x8x128xbf16>
    %90 = vector.shape_cast %89 : vector<1x8x8x128xbf16> to vector<8x8x128xbf16>
    %91 = vector.shape_cast %87 : vector<8x8x128xbf16> to vector<1x8x8x128xbf16>
    tpu.vector_store %arg5[%c0_12, %88, %c0_13, %c0_14], %91 {strides = array<i32>} : memref<1x8x8x128xbf16, #tpu.memory_space<vmem>>, vector<1x8x8x128xbf16>,
    %c1_i32 = arith.constant 1 : i32
    return
  }
  func.func @transform_0(%arg0: i32, %arg1: i32) -> (i32, i32, i32, i32) {
    %c0_i32 = arith.constant 0 : i32
    %c0_i32_0 = arith.constant 0 : i32
    %c0_i32_1 = arith.constant 0 : i32
    return %arg0, %c0_i32, %c0_i32_0, %arg1 : i32, i32, i32, i32
  }
  func.func @transform_1(%arg0: i32, %arg1: i32) -> (i32, i32, i32) {
    %c0_i32 = arith.constant 0 : i32
    %c0_i32_0 = arith.constant 0 : i32
    %c0_i32_1 = arith.constant 0 : i32
    return %c0_i32, %c0_i32_0, %arg1 : i32, i32, i32
  }
  func.func @transform_2(%arg0: i32, %arg1: i32) -> (i32, i32, i32) {
    %c0_i32 = arith.constant 0 : i32
    %c0_i32_0 = arith.constant 0 : i32
    %c0_i32_1 = arith.constant 0 : i32
    return %c0_i32, %c0_i32_0, %arg1 : i32, i32, i32
  }
  func.func @transform_3(%arg0: i32, %arg1: i32) -> (i32, i32, i32, i32) {
    %c0_i32 = arith.constant 0 : i32
    %c0_i32_0 = arith.constant 0 : i32
    %c0_i32_1 = arith.constant 0 : i32
    return %arg0, %c0_i32, %c0_i32_0, %arg1 : i32, i32, i32, i32
  }
}

</mosaic_0001>

<bundles_post_ra>
// kernel: pvt_stage_forward.21
= control target key start
LH: loop header
LB: loop body
LE: loop exit
PB: predicated region body
PF: predicated region fallthrough
CT: control target
= control target key end

     0   :  { %vm48_vm0 = vcmask 261120   ;;  %vm366_vm1 = vcmask 257024   ;;  %s842_s0 = inlined_call_operand.vmem [shape: bf16[128,32], index: 0, kind: input, shape index: {}]   ;;  %s843_s1 = inlined_call_operand.vmem [shape: f32[1,32], index: 1, kind: input, shape index: {}]   ;;  %s844_s2 = inlined_call_operand.vmem [shape: f32[1,32], index: 2, kind: input, shape index: {}]   ;;  %s845_s3 = inlined_call_operand.vmem [shape: bf16[128,32], index: 3, kind: output, shape index: {}]  }
   0x1   :  { %v515_v0 = vld [vmem:[%s842_s0] sm:$0xff]   ;;  %v520_v1 = vld [vmem:[%s842_s0 + $0x8] sm:$0xff]   ;;  %v529_v6 = vld [vmem:[%s842_s0 + $0x10] sm:$0xff]  }
   0x2   :  { %v423_v2 = vunpack.c.l.bf16 %v515_v0  ;;  %v427_v3 = vunpack.c.l.bf16 %v520_v1  ;;  %v424_v4 = vunpack.c.h.bf16 %v515_v0  ;;  %v428_v5 = vunpack.c.h.bf16 %v520_v1  ;;  %v544_v13 = vld [vmem:[%s842_s0 + $0x18] sm:$0xff]   ;;  %v557_v18 = vld [vmem:[%s842_s0 + $0x20] sm:$0xff]   ;;  %v570_v23 = vld [vmem:[%s842_s0 + $0x28] sm:$0xff]  }
   0x3   :  { %v431_v11 = vunpack.c.l.bf16 %v529_v6  ;;  %v432_v12 = vunpack.c.h.bf16 %v529_v6  ;;  %v435_v16 = vunpack.c.l.bf16 %v544_v13  ;;  %v436_v17 = vunpack.c.h.bf16 %v544_v13  ;;  %v583_v28 = vld [vmem:[%s842_s0 + $0x30] sm:$0xff]   ;;  %v596_v33 = vld [vmem:[%s842_s0 + $0x38] sm:$0xff]  }
   0x4   :  { %v49_v7 = vsel %vm48_vm0, %v423_v2, 0.0  ;;  %v55_v8 = vsel %vm48_vm0, %v427_v3, 0.0  ;;  %v52_v9 = vsel %vm48_vm0, %v424_v4, 0.0  ;;  %v58_v10 = vsel %vm48_vm0, %v428_v5, 0.0 }
   0x5   :  { %50 = vadd.xlane.f32.xlu0 %v49_v7  ;;  %56 = vadd.xlane.f32.xlu1 %v55_v8  ;;  %v61_v14 = vsel %vm48_vm0, %v431_v11, 0.0  ;;  %v64_v15 = vsel %vm48_vm0, %v432_v12, 0.0  ;;  %v67_v19 = vsel %vm48_vm0, %v435_v16, 0.0  ;;  %v70_v20 = vsel %vm48_vm0, %v436_v17, 0.0 }
   0x6   :  { %v439_v21 = vunpack.c.l.bf16 %v557_v18  ;;  %v440_v22 = vunpack.c.h.bf16 %v557_v18  ;;  %v443_v26 = vunpack.c.l.bf16 %v570_v23  ;;  %v444_v27 = vunpack.c.h.bf16 %v570_v23 }
   0x7   :  { %v447_v31 = vunpack.c.l.bf16 %v583_v28  ;;  %v448_v32 = vunpack.c.h.bf16 %v583_v28  ;;  %v451_v36 = vunpack.c.l.bf16 %v596_v33  ;;  %v452_v37 = vunpack.c.h.bf16 %v596_v33 }
   0x8   :  { %v73_v24 = vsel %vm48_vm0, %v439_v21, 0.0  ;;  %v76_v25 = vsel %vm48_vm0, %v440_v22, 0.0  ;;  %v79_v29 = vsel %vm48_vm0, %v443_v26, 0.0  ;;  %v82_v30 = vsel %vm48_vm0, %v444_v27, 0.0 }
   0x9   :  { %53 = vadd.xlane.f32.xlu0 %v52_v9  ;;  %59 = vadd.xlane.f32.xlu1 %v58_v10  ;;  %v85_v34 = vsel %vm48_vm0, %v447_v31, 0.0  ;;  %v88_v35 = vsel %vm48_vm0, %v448_v32, 0.0  ;;  %v91_v38 = vsel %vm48_vm0, %v451_v36, 0.0  ;;  %v94_v39 = vsel %vm48_vm0, %v452_v37, 0.0 }
   0xd   :  { %62 = vadd.xlane.f32.xlu0 %v61_v14  ;;  %65 = vadd.xlane.f32.xlu1 %v64_v15 }
  0x11   :  { %68 = vadd.xlane.f32.xlu0 %v67_v19  ;;  %71 = vadd.xlane.f32.xlu1 %v70_v20 }
  0x15   :  { %74 = vadd.xlane.f32.xlu0 %v73_v24  ;;  %77 = vadd.xlane.f32.xlu1 %v76_v25 }
  0x19   :  { %80 = vadd.xlane.f32.xlu0 %v79_v29  ;;  %83 = vadd.xlane.f32.xlu1 %v82_v30 }
  0x1d   :  { %86 = vadd.xlane.f32.xlu0 %v85_v34  ;;  %89 = vadd.xlane.f32.xlu1 %v88_v35 }
  0x21   :  { %92 = vadd.xlane.f32.xlu0 %v91_v38  ;;  %95 = vadd.xlane.f32.xlu1 %v94_v39 }
  0x8e   :  { %v51_v40 = vpop.xlane.xlu0 %50  ;;  %v57_v41 = vpop.xlane.xlu1 %56 }
  0x8f   :  { %v98_v42 = vmul.f32 0.03125, %v51_v40  ;;  %v100_v43 = vmul.f32 0.03125, %v57_v41 }
  0x91   :  { %v612_v44 = vsub.f32 %v423_v2, %v98_v42  ;;  %v614_v45 = vsub.f32 %v427_v3, %v100_v43 }
  0x92   :  { %v54_v46 = vpop.xlane.xlu0 %53  ;;  %v60_v47 = vpop.xlane.xlu1 %59 }
  0x93   :  { %v99_v48 = vmul.f32 0.03125, %v54_v46  ;;  %v101_v49 = vmul.f32 0.03125, %v60_v47  ;;  %v130_v50 = vmul.f32 %v612_v44, %v612_v44  ;;  %v132_v51 = vmul.f32 %v614_v45, %v614_v45 }
  0x95   :  { %v622_v52 = vsub.f32 %v424_v4, %v99_v48  ;;  %v626_v53 = vsub.f32 %v428_v5, %v101_v49  ;;  %v146_v54 = vsel %vm48_vm0, %v130_v50, 0.0  ;;  %v152_v57 = vsel %vm48_vm0, %v132_v51, 0.0 }
  0x96   :  { %147 = vadd.xlane.f32.xlu0 %v146_v54  ;;  %v63_v55 = vpop.xlane.xlu0 %62  ;;  %v66_v56 = vpop.xlane.xlu1 %65 }
  0x97   :  { %v102_v58 = vmul.f32 0.03125, %v63_v55  ;;  %v103_v59 = vmul.f32 0.03125, %v66_v56  ;;  %v131_v60 = vmul.f32 %v622_v52, %v622_v52  ;;  %v133_v61 = vmul.f32 %v626_v53, %v626_v53 }
  0x99   :  { %v636_v62 = vsub.f32 %v431_v11, %v102_v58  ;;  %v640_v63 = vsub.f32 %v432_v12, %v103_v59  ;;  %v149_v0 = vsel %vm48_vm0, %v131_v60, 0.0  ;;  %v155_v3 = vsel %vm48_vm0, %v133_v61, 0.0 }
  0x9a   :  { %153 = vadd.xlane.f32.xlu0 %v152_v57  ;;  %150 = vadd.xlane.f32.xlu1 %v149_v0  ;;  %v69_v1 = vpop.xlane.xlu0 %68  ;;  %v72_v2 = vpop.xlane.xlu1 %71 }
  0x9b   :  { %v104_v4 = vmul.f32 0.03125, %v69_v1  ;;  %v105_v5 = vmul.f32 0.03125, %v72_v2  ;;  %v134_v7 = vmul.f32 %v636_v62, %v636_v62  ;;  %v135_v8 = vmul.f32 %v640_v63, %v640_v63 }
  0x9d   :  { %v650_v6 = vsub.f32 %v435_v16, %v104_v4  ;;  %v654_v9 = vsub.f32 %v436_v17, %v105_v5  ;;  %v158_v10 = vsel %vm48_vm0, %v134_v7, 0.0  ;;  %v161_v14 = vsel %vm48_vm0, %v135_v8, 0.0 }
  0x9e   :  { %156 = vadd.xlane.f32.xlu1 %v155_v3  ;;  %159 = vadd.xlane.f32.xlu0 %v158_v10  ;;  %v75_v11 = vpop.xlane.xlu0 %74  ;;  %v78_v12 = vpop.xlane.xlu1 %77 }
  0x9f   :  { %v106_v15 = vmul.f32 0.03125, %v75_v11  ;;  %v107_v19 = vmul.f32 0.03125, %v78_v12  ;;  %v136_v20 = vmul.f32 %v650_v6, %v650_v6  ;;  %v137_v16 = vmul.f32 %v654_v9, %v654_v9 }
  0xa1   :  { %v664_v13 = vsub.f32 %v439_v21, %v106_v15  ;;  %v668_v17 = vsub.f32 %v440_v22, %v107_v19  ;;  %v164_v24 = vsel %vm48_vm0, %v136_v20, 0.0  ;;  %v167_v30 = vsel %vm48_vm0, %v137_v16, 0.0 }
  0xa2   :  { %162 = vadd.xlane.f32.xlu1 %v161_v14  ;;  %165 = vadd.xlane.f32.xlu0 %v164_v24  ;;  %v81_v25 = vpop.xlane.xlu0 %80  ;;  %v84_v29 = vpop.xlane.xlu1 %83 }
  0xa3   :  { %v108_v34 = vmul.f32 0.03125, %v81_v25  ;;  %v109_v35 = vmul.f32 0.03125, %v84_v29  ;;  %v138_v38 = vmul.f32 %v664_v13, %v664_v13  ;;  %v139_v21 = vmul.f32 %v668_v17, %v668_v17 }
  0xa5   :  { %v678_v18 = vsub.f32 %v443_v26, %v108_v34  ;;  %v682_v22 = vsub.f32 %v444_v27, %v109_v35  ;;  %v170_v39 = vsel %vm48_vm0, %v138_v38, 0.0  ;;  %v173_v42 = vsel %vm48_vm0, %v139_v21, 0.0 }
  0xa6   :  { %168 = vadd.xlane.f32.xlu1 %v167_v30  ;;  %171 = vadd.xlane.f32.xlu0 %v170_v39  ;;  %v87_v40 = vpop.xlane.xlu0 %86  ;;  %v90_v41 = vpop.xlane.xlu1 %89  ;;  %v723_v39 = vld [vmem:[%s843_s1] ss:$0 sm:$0xff] }
  0xa7   :  { %v110_v43 = vmul.f32 0.03125, %v87_v40  ;;  %v111_v46 = vmul.f32 0.03125, %v90_v41  ;;  %v140_v47 = vmul.f32 %v678_v18, %v678_v18  ;;  %v141_v26 = vmul.f32 %v682_v22, %v682_v22 }
  0xa9   :  { %v692_v23 = vsub.f32 %v447_v31, %v110_v43  ;;  %v696_v27 = vsub.f32 %v448_v32, %v111_v46  ;;  %v176_v48 = vsel %vm48_vm0, %v140_v47, 0.0  ;;  %v179_v51 = vsel %vm48_vm0, %v141_v26, 0.0  ;;  %v729_v43 = vld [vmem:[%s844_s2] ss:$0 sm:$0xff] }
  0xaa   :  { %174 = vadd.xlane.f32.xlu1 %v173_v42  ;;  %177 = vadd.xlane.f32.xlu0 %v176_v48  ;;  %v93_v49 = vpop.xlane.xlu0 %92  ;;  %v96_v50 = vpop.xlane.xlu1 %95 }
  0xab   :  { %v112_v54 = vmul.f32 0.03125, %v93_v49  ;;  %v113_v55 = vmul.f32 0.03125, %v96_v50  ;;  %v142_v56 = vmul.f32 %v692_v23, %v692_v23  ;;  %v143_v31 = vmul.f32 %v696_v27, %v696_v27 }
  0xad   :  { %v706_v28 = vsub.f32 %v451_v36, %v112_v54  ;;  %v710_v32 = vsub.f32 %v452_v37, %v113_v55  ;;  %v182_v57 = vsel %vm48_vm0, %v142_v56, 0.0  ;;  %v185_v58 = vsel %vm48_vm0, %v143_v31, 0.0 }
  0xae   :  { %180 = vadd.xlane.f32.xlu1 %v179_v51  ;;  %183 = vadd.xlane.f32.xlu0 %v182_v57 }
  0xaf   :  { %v144_v59 = vmul.f32 %v706_v28, %v706_v28  ;;  %v145_v60 = vmul.f32 %v710_v32, %v710_v32 }
  0xb1   :  { %v188_v61 = vsel %vm48_vm0, %v144_v59, 0.0  ;;  %v191_v33 = vsel %vm48_vm0, %v145_v60, 0.0 }
  0xb2   :  { %186 = vadd.xlane.f32.xlu1 %v185_v58  ;;  %189 = vadd.xlane.f32.xlu0 %v188_v61 }
  0xb6   :  { %192 = vadd.xlane.f32.xlu1 %v191_v33 }
 0x11f   :  { %v148_v36 = vpop.xlane.xlu0 %147 }
 0x120   :  { %v194_v37 = vmul.f32 0.03125, %v148_v36 }
 0x122   :  { %v210_v0 = vadd.f32 1e-06, %v194_v37 }
 0x123   :  { %v151_v1 = vpop.xlane.xlu1 %150  ;;  %v154_v2 = vpop.xlane.xlu0 %153 }
 0x124   :  { %460 = vrsqrt.f32 %v210_v0  ;;  %v195_v3 = vmul.f32 0.03125, %v151_v1  ;;  %v196_v4 = vmul.f32 0.03125, %v154_v2 }
 0x126   :  { %v211_v5 = vadd.f32 1e-06, %v195_v3  ;;  %v212_v7 = vadd.f32 1e-06, %v196_v4 }
 0x127   :  { %v157_v8 = vpop.xlane.xlu1 %156  ;;  %v160_v10 = vpop.xlane.xlu0 %159 }
 0x128   :  { %462 = vrsqrt.f32 %v211_v5  ;;  %v197_v11 = vmul.f32 0.03125, %v157_v8  ;;  %v198_v12 = vmul.f32 0.03125, %v160_v10 }
 0x129   :  { %464 = vrsqrt.f32 %v212_v7 }
 0x12a   :  { %v213_v14 = vadd.f32 1e-06, %v197_v11  ;;  %v214_v15 = vadd.f32 1e-06, %v198_v12 }
 0x12b   :  { %v163_v19 = vpop.xlane.xlu1 %162  ;;  %v166_v20 = vpop.xlane.xlu0 %165 }
 0x12c   :  { %466 = vrsqrt.f32 %v213_v14  ;;  %v199_v16 = vmul.f32 0.03125, %v163_v19  ;;  %v200_v24 = vmul.f32 0.03125, %v166_v20 }
 0x12d   :  { %468 = vrsqrt.f32 %v214_v15 }
 0x12e   :  { %v215_v25 = vadd.f32 1e-06, %v199_v16  ;;  %v216_v29 = vadd.f32 1e-06, %v200_v24 }
 0x12f   :  { %v169_v30 = vpop.xlane.xlu1 %168  ;;  %v172_v34 = vpop.xlane.xlu0 %171 }
 0x130   :  { %470 = vrsqrt.f32 %v215_v25  ;;  %v201_v35 = vmul.f32 0.03125, %v169_v30  ;;  %v202_v38 = vmul.f32 0.03125, %v172_v34 }
 0x131   :  { %v461_v21 = vpop.eup %460  ;;  %472 = vrsqrt.f32 %v216_v29 }
 0x132   :  { %v242_v40 = vmul.f32 %v461_v21, %v612_v44  ;;  %v217_v41 = vadd.f32 1e-06, %v201_v35  ;;  %v218_v42 = vadd.f32 1e-06, %v202_v38 }
 0x133   :  { %v175_v46 = vpop.xlane.xlu1 %174  ;;  %v178_v47 = vpop.xlane.xlu0 %177 }
 0x134   :  { %v264_v26 = vmul.f32 %v723_v39, %v242_v40  ;;  %474 = vrsqrt.f32 %v217_v41  ;;  %v203_v48 = vmul.f32 0.03125, %v175_v46  ;;  %v204_v49 = vmul.f32 0.03125, %v178_v47 }
 0x135   :  { %v463_v50 = vpop.eup %462  ;;  %476 = vrsqrt.f32 %v218_v42 }
 0x136   :  { %v465_v51 = vpop.eup %464  ;;  %v286_v54 = vadd.f32 %v729_v43, %v264_v26  ;;  %v243_v44 = vmul.f32 %v463_v50, %v622_v52  ;;  %v219_v55 = vadd.f32 1e-06, %v203_v48  ;;  %v220_v56 = vadd.f32 1e-06, %v204_v49 }
 0x137   :  { %v244_v31 = vmul.f32 %v465_v51, %v614_v45  ;;  %v181_v57 = vpop.xlane.xlu1 %180  ;;  %v184_v58 = vpop.xlane.xlu0 %183 }
 0x138   :  { %v405_v59 = vpack.c.bf16 %v286_v54, %v286_v54  ;;  %v265_v60 = vmul.f32 %v723_v39, %v243_v44  ;;  %478 = vrsqrt.f32 %v219_v55  ;;  %v205_v61 = vmul.f32 0.03125, %v181_v57 }
 0x139   :  { %v467_v33 = vpop.eup %466  ;;  %v266_v36 = vmul.f32 %v723_v39, %v244_v31  ;;  %480 = vrsqrt.f32 %v220_v56  ;;  %v206_v37 = vmul.f32 0.03125, %v184_v58 }
 0x13a   :  { %v469_v0 = vpop.eup %468  ;;  %367 = vst.msk [vmem:[%s845_s3] sm:$0xf] %vm366_vm1, %v405_v59  ;;  %v287_v45 = vadd.f32 %v729_v43, %v265_v60  ;;  %v245_v52 = vmul.f32 %v467_v33, %v626_v53  ;;  %v221_v1 = vadd.f32 1e-06, %v205_v61 }
 0x13b   :  { %v288_v2 = vadd.f32 %v729_v43, %v266_v36  ;;  %v246_v3 = vmul.f32 %v469_v0, %v636_v62  ;;  %v222_v4 = vadd.f32 1e-06, %v206_v37  ;;  %v187_v5 = vpop.xlane.xlu1 %186  ;;  %v190_v7 = vpop.xlane.xlu0 %189 }
 0x13c   :  { %v406_v8 = vpack.c.bf16 %v287_v45, %v287_v45  ;;  %v267_v10 = vmul.f32 %v723_v39, %v245_v52  ;;  %482 = vrsqrt.f32 %v221_v1  ;;  %v207_v11 = vmul.f32 0.03125, %v187_v5 }
 0x13d   :  { %v471_v12 = vpop.eup %470  ;;  %v407_v14 = vpack.c.bf16 %v288_v2, %v288_v2  ;;  %v268_v15 = vmul.f32 %v723_v39, %v246_v3  ;;  %484 = vrsqrt.f32 %v222_v4  ;;  %v208_v19 = vmul.f32 0.03125, %v190_v7 }
 0x13e   :  { %v473_v53 = vpop.eup %472  ;;  %368 = vst.msk [vmem:[%s845_s3 + $0x4] sm:$0xf] %vm366_vm1, %v406_v8  ;;  %v289_v62 = vadd.f32 %v729_v43, %v267_v10  ;;  %v247_v20 = vmul.f32 %v471_v12, %v640_v63  ;;  %v223_v16 = vadd.f32 1e-06, %v207_v11 }
 0x13f   :  { %369 = vst.msk [vmem:[%s845_s3 + $0x8] sm:$0xf] %vm366_vm1, %v407_v14  ;;  %v290_v24 = vadd.f32 %v729_v43, %v268_v15  ;;  %v248_v25 = vmul.f32 %v473_v53, %v650_v6  ;;  %v224_v29 = vadd.f32 1e-06, %v208_v19  ;;  %v193_v30 = vpop.xlane.xlu1 %192 }
 0x140   :  { %v408_v34 = vpack.c.bf16 %v289_v62, %v289_v62  ;;  %v269_v35 = vmul.f32 %v723_v39, %v247_v20  ;;  %486 = vrsqrt.f32 %v223_v16  ;;  %v209_v38 = vmul.f32 0.03125, %v193_v30 }
 0x141   :  { %v475_v21 = vpop.eup %474  ;;  %v409_v40 = vpack.c.bf16 %v290_v24, %v290_v24  ;;  %v270_v63 = vmul.f32 %v723_v39, %v248_v25  ;;  %488 = vrsqrt.f32 %v224_v29 }
 0x142   :  { %v477_v41 = vpop.eup %476  ;;  %370 = vst.msk [vmem:[%s845_s3 + $0xc] sm:$0xf] %vm366_vm1, %v408_v34  ;;  %v291_v6 = vadd.f32 %v729_v43, %v269_v35  ;;  %v249_v42 = vmul.f32 %v475_v21, %v654_v9  ;;  %v225_v46 = vadd.f32 1e-06, %v209_v38 }
 0x143   :  { %371 = vst.msk [vmem:[%s845_s3 + $0x10] sm:$0xf] %vm366_vm1, %v409_v40  ;;  %v292_v47 = vadd.f32 %v729_v43, %v270_v63  ;;  %v250_v26 = vmul.f32 %v477_v41, %v664_v13 }
 0x144   :  { %v410_v48 = vpack.c.bf16 %v291_v6, %v291_v6  ;;  %v271_v49 = vmul.f32 %v723_v39, %v249_v42  ;;  %490 = vrsqrt.f32 %v225_v46 }
 0x145   :  { %v479_v50 = vpop.eup %478  ;;  %v411_v51 = vpack.c.bf16 %v292_v47, %v292_v47  ;;  %v272_v54 = vmul.f32 %v723_v39, %v250_v26 }
 0x146   :  { %v481_v44 = vpop.eup %480  ;;  %372 = vst.msk [vmem:[%s845_s3 + $0x14] sm:$0xf] %vm366_vm1, %v410_v48  ;;  %v293_v9 = vadd.f32 %v729_v43, %v271_v49  ;;  %v251_v55 = vmul.f32 %v479_v50, %v668_v17 }
 0x147   :  { %373 = vst.msk [vmem:[%s845_s3 + $0x18] sm:$0xf] %vm366_vm1, %v411_v51  ;;  %v294_v13 = vadd.f32 %v729_v43, %v272_v54  ;;  %v252_v56 = vmul.f32 %v481_v44, %v678_v18 }
 0x148   :  { %v412_v31 = vpack.c.bf16 %v293_v9, %v293_v9  ;;  %v273_v57 = vmul.f32 %v723_v39, %v251_v55 }
 0x149   :  { %v483_v58 = vpop.eup %482  ;;  %v413_v59 = vpack.c.bf16 %v294_v13, %v294_v13  ;;  %v274_v60 = vmul.f32 %v723_v39, %v252_v56 }
 0x14a   :  { %v485_v61 = vpop.eup %484  ;;  %374 = vst.msk [vmem:[%s845_s3 + $0x1c] sm:$0xf] %vm366_vm1, %v412_v31  ;;  %v295_v17 = vadd.f32 %v729_v43, %v273_v57  ;;  %v253_v33 = vmul.f32 %v483_v58, %v682_v22 }
 0x14b   :  { %375 = vst.msk [vmem:[%s845_s3 + $0x20] sm:$0xf] %vm366_vm1, %v413_v59  ;;  %v296_v18 = vadd.f32 %v729_v43, %v274_v60  ;;  %v254_v36 = vmul.f32 %v485_v61, %v692_v23 }
 0x14c   :  { %v414_v37 = vpack.c.bf16 %v295_v17, %v295_v17  ;;  %v275_v0 = vmul.f32 %v723_v39, %v253_v33 }
 0x14d   :  { %v487_v45 = vpop.eup %486  ;;  %v415_v52 = vpack.c.bf16 %v296_v18, %v296_v18  ;;  %v276_v1 = vmul.f32 %v723_v39, %v254_v36 }
 0x14e   :  { %v489_v2 = vpop.eup %488  ;;  %376 = vst.msk [vmem:[%s845_s3 + $0x24] sm:$0xf] %vm366_vm1, %v414_v37  ;;  %v297_v22 = vadd.f32 %v729_v43, %v275_v0  ;;  %v255_v3 = vmul.f32 %v487_v45, %v696_v27 }
 0x14f   :  { %377 = vst.msk [vmem:[%s845_s3 + $0x28] sm:$0xf] %vm366_vm1, %v415_v52  ;;  %v298_v23 = vadd.f32 %v729_v43, %v276_v1  ;;  %v256_v4 = vmul.f32 %v489_v2, %v706_v28 }
 0x150   :  { %v416_v5 = vpack.c.bf16 %v297_v22, %v297_v22  ;;  %v277_v7 = vmul.f32 %v723_v39, %v255_v3 }
 0x151   :  { %v491_v8 = vpop.eup %490  ;;  %v417_v10 = vpack.c.bf16 %v298_v23, %v298_v23  ;;  %v278_v11 = vmul.f32 %v723_v39, %v256_v4 }
 0x152   :  { %378 = vst.msk [vmem:[%s845_s3 + $0x2c] sm:$0xf] %vm366_vm1, %v416_v5  ;;  %v299_v27 = vadd.f32 %v729_v43, %v277_v7  ;;  %v257_v12 = vmul.f32 %v491_v8, %v710_v32 }
 0x153   :  { %379 = vst.msk [vmem:[%s845_s3 + $0x30] sm:$0xf] %vm366_vm1, %v417_v10  ;;  %v300_v28 = vadd.f32 %v729_v43, %v278_v11 }
 0x154   :  { %v418_v14 = vpack.c.bf16 %v299_v27, %v299_v27  ;;  %v279_v15 = vmul.f32 %v723_v39, %v257_v12 }
 0x155   :  { %v419_v19 = vpack.c.bf16 %v300_v28, %v300_v28 }
 0x156   :  { %380 = vst.msk [vmem:[%s845_s3 + $0x34] sm:$0xf] %vm366_vm1, %v418_v14  ;;  %v301_v53 = vadd.f32 %v729_v43, %v279_v15 }
 0x157   :  { %381 = vst.msk [vmem:[%s845_s3 + $0x38] sm:$0xf] %vm366_vm1, %v419_v19 }
 0x158   :  { %v420_v32 = vpack.c.bf16 %v301_v53, %v301_v53 }
 0x15a   :  { %382 = vst.msk [vmem:[%s845_s3 + $0x3c] sm:$0xf] %vm366_vm1, %v420_v32 }

// kernel: pvt_stage_forward.20
= control target key start
LH: loop header
LB: loop body
LE: loop exit
PB: predicated region body
PF: predicated region fallthrough
CT: control target
= control target key end

     0   :  { %v358_v16 = vlaneseq  ;;  %s1250_s1 = inlined_call_operand.vmem [shape: bf16[128,128], index: 1, kind: input, shape index: {}]   ;;  %s1251_s0 = inlined_call_operand.vmem [shape: bf16[128,128], index: 0, kind: input, shape index: {}]   ;;  %s1252_s2 = inlined_call_operand.vmem [shape: f32[1,128], index: 2, kind: input, shape index: {}]   ;;  %s1253_s3 = inlined_call_operand.vmem [shape: f32[1,128], index: 3, kind: input, shape index: {}]   ;;  %s1254_s4 = inlined_call_operand.vmem [shape: f32[1,128], index: 4, kind: input, shape index: {}]   ;;  %s1255_s5 = inlined_call_operand.vmem [shape: bf16[128,128], index: 5, kind: output, shape index: {}]  }
   0x1   :  { %v860_v0 = vld [vmem:[%s1250_s1 + $0x38] sm:$0xff]   ;;  %v861_v1 = vld [vmem:[%s1250_s1 + $0x30] sm:$0xff]   ;;  %v862_v2 = vld [vmem:[%s1250_s1 + $0x28] sm:$0xff]  }
   0x2   :  { %812 = vmatprep.subr.bf16.mxu0 %v860_v0  ;;  %844 = vmatprep.subr.bf16.mxu1 %v860_v0  ;;  %v863_v3 = vld [vmem:[%s1250_s1 + $0x20] sm:$0xff]   ;;  %v864_v6 = vld [vmem:[%s1250_s1 + $0x18] sm:$0xff]   ;;  %v865_v7 = vld [vmem:[%s1250_s1 + $0x10] sm:$0xff]   ;;  %v986_v17 = vand.u32 127, %v358_v16 }
   0x3   :  { %813 = vmatpush3.bf16.msra.mxu0 %v860_v0  ;;  %852 = vmatpush3.bf16.msra.mxu1 %v860_v0  ;;  %v868_v4 = vld [vmem:[%s1251_s0] sm:$0xff]   ;;  %v866_v8 = vld [vmem:[%s1250_s1 + $0x8] sm:$0xff]   ;;  %v872_v12 = vld [vmem:[%s1251_s0 + $0x10] sm:$0xff]  }
   0x4   :  { %814 = vmatprep.subr.bf16.mxu0 %v861_v1  ;;  %845 = vmatprep.subr.bf16.mxu1 %v861_v1  ;;  %v869_v5 = vld [vmem:[%s1251_s0 + $0x20] sm:$0xff]   ;;  %v870_v10 = vld [vmem:[%s1251_s0 + $0x8] sm:$0xff]   ;;  %v874_v13 = vld [vmem:[%s1251_s0 + $0x30] sm:$0xff]   ;;  %vm360_vm0 = vcmp.lt.s32.totalorder %v986_v17, 32 }
   0x5   :  { %828 = vmatprep.mubr.bf16.mxu0 %v868_v4  ;;  %836 = vmatprep.mubr.bf16.mxu1 %v869_v5  ;;  %v867_v9 = vld [vmem:[%s1250_s1] sm:$0xff]   ;;  %v871_v11 = vld [vmem:[%s1251_s0 + $0x28] sm:$0xff]   ;;  %v873_v14 = vld [vmem:[%s1251_s0 + $0x18] sm:$0xff]  }
   0x6   :  { %v875_v15 = vld [vmem:[%s1251_s0 + $0x38] sm:$0xff]   ;;  %v714_v18 = vld [vmem:[%s1252_s2] ss:$0 sm:$0xff] }
   0x7   :  { %815 = vmatpush3.bf16.msra.mxu0 %v861_v1  ;;  %853 = vmatpush3.bf16.msra.mxu1 %v861_v1 }
   0x8   :  { %816 = vmatprep.subr.bf16.mxu0 %v862_v2  ;;  %846 = vmatprep.subr.bf16.mxu1 %v862_v2 }
   0xb   :  { %817 = vmatpush3.bf16.msra.mxu0 %v862_v2  ;;  %854 = vmatpush3.bf16.msra.mxu1 %v862_v2 }
   0xc   :  { %818 = vmatprep.subr.bf16.mxu0 %v863_v3  ;;  %847 = vmatprep.subr.bf16.mxu1 %v863_v3 }
   0xf   :  { %819 = vmatpush3.bf16.msra.mxu0 %v863_v3  ;;  %855 = vmatpush3.bf16.msra.mxu1 %v863_v3 }
  0x10   :  { %820 = vmatprep.subr.bf16.mxu0 %v864_v6  ;;  %848 = vmatprep.subr.bf16.mxu1 %v864_v6 }
  0x13   :  { %821 = vmatpush3.bf16.msra.mxu0 %v864_v6  ;;  %856 = vmatpush3.bf16.msra.mxu1 %v864_v6 }
  0x14   :  { %822 = vmatprep.subr.bf16.mxu0 %v865_v7  ;;  %849 = vmatprep.subr.bf16.mxu1 %v865_v7 }
  0x17   :  { %823 = vmatpush3.bf16.msra.mxu0 %v865_v7  ;;  %857 = vmatpush3.bf16.msra.mxu1 %v865_v7 }
  0x18   :  { %824 = vmatprep.subr.bf16.mxu0 %v866_v8  ;;  %850 = vmatprep.subr.bf16.mxu1 %v866_v8 }
  0x1b   :  { %825 = vmatpush3.bf16.msra.mxu0 %v866_v8  ;;  %858 = vmatpush3.bf16.msra.mxu1 %v866_v8 }
  0x1c   :  { %826 = vmatprep.subr.bf16.mxu0 %v867_v9  ;;  %851 = vmatprep.subr.bf16.mxu1 %v867_v9 }
  0x1f   :  { %827 = vmatpush3.bf16.msra.mxu0 %v867_v9  ;;  %859 = vmatpush3.bf16.msra.mxu1 %v867_v9 }
  0x22   :  { %829 = vmatmul.mubr.bf16.vlgmr.msra.gmra.mxu0 %v870_v10  ;;  %837 = vmatmul.mubr.bf16.vlgmr.msra.gmra.mxu1 %v871_v11 }
  0x23   :  { %832 = vmatprep.mubr.bf16.mxu0 %v872_v12  ;;  %840 = vmatprep.mubr.bf16.mxu1 %v874_v13 }
  0x2a   :  { %833 = vmatmul.mubr.bf16.gmra.mxu0 %v873_v14  ;;  %841 = vmatmul.mubr.bf16.gmra.mxu1 %v875_v15 }
  0xe2   :  { %v830_v19 = vpop.f32.mrf.mxu0  ;;  %v838_v20 = vpop.f32.mrf.mxu1 }
  0xe3   :  { %v992_v21 = vadd.f32 %v830_v19, %v714_v18  ;;  %v994_v22 = vadd.f32 %v838_v20, %v714_v18 }
  0xe4   :  { %v219_v23 = vpop.f32.mrf.mxu0  ;;  %v251_v24 = vpop.f32.mrf.mxu1 }
  0xe5   :  { %v996_v25 = vadd.f32 %v714_v18, %v219_v23  ;;  %v371_v26 = vsel %vm360_vm0, %v994_v22, 0.0  ;;  %v363_v27 = vsel %vm360_vm0, %v992_v21, 0.0  ;;  %v1006_v33 = vadd.f32 %v714_v18, %v251_v24 }
  0xe6   :  { %397 = vadd.xlane.f32.xlu0 %v371_v26  ;;  %v839_v28 = vpop.f32.mrf.mxu1  ;;  %381 = vadd.xlane.f32.xlu1 %v363_v27  ;;  %v831_v29 = vpop.f32.mrf.mxu0 }
  0xe7   :  { %v1004_v30 = vadd.f32 %v831_v29, %v714_v18  ;;  %v1008_v34 = vadd.f32 %v839_v28, %v714_v18  ;;  %v361_v35 = vsel %vm360_vm0, %v996_v25, 0.0  ;;  %v369_v42 = vsel %vm360_vm0, %v1006_v33, 0.0 }
  0xe8   :  { %v222_v31 = vpop.f32.mrf.mxu0  ;;  %v254_v32 = vpop.f32.mrf.mxu1 }
  0xe9   :  { %v364_v36 = vsel %vm360_vm0, %v1004_v30, 0.0  ;;  %v1016_v40 = vadd.f32 %v714_v18, %v222_v31  ;;  %v1018_v41 = vadd.f32 %v714_v18, %v254_v32  ;;  %v372_v43 = vsel %vm360_vm0, %v1008_v34, 0.0 }
  0xea   :  { %377 = vadd.xlane.f32.xlu0 %v361_v35  ;;  %383 = vadd.xlane.f32.xlu1 %v364_v36  ;;  %v834_v37 = vpop.f32.mrf.mxu0  ;;  %v842_v38 = vpop.f32.mrf.mxu1 }
  0xeb   :  { %v1026_v46 = vadd.f32 %v834_v37, %v714_v18  ;;  %v370_v48 = vsel %vm360_vm0, %v1018_v41, 0.0  ;;  %v362_v49 = vsel %vm360_vm0, %v1016_v40, 0.0  ;;  %v1056_v61 = vadd.f32 %v842_v38, %v714_v18 }
  0xec   :  { %v235_v39 = vpop.f32.mrf.mxu0  ;;  %v267_v45 = vpop.f32.mrf.mxu1 }
  0xed   :  { %v367_v52 = vsel %vm360_vm0, %v1026_v46, 0.0  ;;  %v1042_v54 = vadd.f32 %v714_v18, %v235_v39  ;;  %v1046_v57 = vadd.f32 %v714_v18, %v267_v45  ;;  %v375_v1 = vsel %vm360_vm0, %v1056_v61, 0.0 }
  0xee   :  { %393 = vadd.xlane.f32.xlu0 %v369_v42  ;;  %399 = vadd.xlane.f32.xlu1 %v372_v43  ;;  %v835_v44 = vpop.f32.mrf.mxu0  ;;  %v843_v51 = vpop.f32.mrf.mxu1 }
  0xef   :  { %v1028_v47 = vadd.f32 %v835_v44, %v714_v18  ;;  %v365_v59 = vsel %vm360_vm0, %v1042_v54, 0.0  ;;  %v1058_v62 = vadd.f32 %v843_v51, %v714_v18  ;;  %v373_v63 = vsel %vm360_vm0, %v1046_v57, 0.0 }
  0xf0   :  { %v238_v50 = vpop.f32.mrf.mxu0  ;;  %v270_v56 = vpop.f32.mrf.mxu1 }
  0xf1   :  { %v368_v53 = vsel %vm360_vm0, %v1028_v47, 0.0  ;;  %v1044_v55 = vadd.f32 %v714_v18, %v238_v50  ;;  %v1048_v58 = vadd.f32 %v714_v18, %v270_v56  ;;  %v376_v2 = vsel %vm360_vm0, %v1058_v62, 0.0 }
  0xf2   :  { %395 = vadd.xlane.f32.xlu1 %v370_v48  ;;  %379 = vadd.xlane.f32.xlu0 %v362_v49 }
  0xf3   :  { %v366_v60 = vsel %vm360_vm0, %v1044_v55, 0.0  ;;  %v374_v0 = vsel %vm360_vm0, %v1048_v58, 0.0 }
  0xf6   :  { %389 = vadd.xlane.f32.xlu0 %v367_v52  ;;  %391 = vadd.xlane.f32.xlu1 %v368_v53 }
  0xfa   :  { %385 = vadd.xlane.f32.xlu0 %v365_v59  ;;  %387 = vadd.xlane.f32.xlu1 %v366_v60 }
  0xfe   :  { %401 = vadd.xlane.f32.xlu0 %v373_v63  ;;  %403 = vadd.xlane.f32.xlu1 %v374_v0 }
 0x102   :  { %405 = vadd.xlane.f32.xlu0 %v375_v1  ;;  %407 = vadd.xlane.f32.xlu1 %v376_v2 }
 0x16f   :  { %v398_v3 = vpop.xlane.xlu0 %397  ;;  %v382_v4 = vpop.xlane.xlu1 %381 }
 0x170   :  { %v420_v5 = vmul.f32 0.03125, %v398_v3  ;;  %v412_v6 = vmul.f32 0.03125, %v382_v4 }
 0x172   :  { %v1073_v7 = vsub.f32 %v994_v22, %v420_v5  ;;  %v1076_v8 = vsub.f32 %v992_v21, %v412_v6 }
 0x173   :  { %v378_v9 = vpop.xlane.xlu0 %377  ;;  %v384_v10 = vpop.xlane.xlu1 %383 }
 0x174   :  { %v410_v11 = vmul.f32 0.03125, %v378_v9  ;;  %v413_v12 = vmul.f32 0.03125, %v384_v10  ;;  %v444_v13 = vsel %vm360_vm0, %v1076_v8, 0.0  ;;  %v452_v18 = vsel %vm360_vm0, %v1073_v7, 0.0 }
 0x175   :  { %v460_v14 = vmul.f32 %v444_v13, %v444_v13  ;;  %v468_v24 = vmul.f32 %v452_v18, %v452_v18 }
 0x176   :  { %v1082_v15 = vsub.f32 %v996_v25, %v410_v11  ;;  %v1085_v16 = vsub.f32 %v1004_v30, %v413_v12 }
 0x177   :  { %v394_v19 = vpop.xlane.xlu0 %393  ;;  %v400_v20 = vpop.xlane.xlu1 %399  ;;  %478 = vadd.xlane.f32.xlu0 %v460_v14 }
 0x178   :  { %v418_v21 = vmul.f32 0.03125, %v394_v19  ;;  %v421_v22 = vmul.f32 0.03125, %v400_v20  ;;  %v445_v23 = vsel %vm360_vm0, %v1085_v16, 0.0  ;;  %v442_v28 = vsel %vm360_vm0, %v1082_v15, 0.0 }
 0x179   :  { %v461_v26 = vmul.f32 %v445_v23, %v445_v23  ;;  %v458_v36 = vmul.f32 %v442_v28, %v442_v28 }
 0x17a   :  { %v1094_v25 = vsub.f32 %v1006_v33, %v418_v21  ;;  %v1097_v27 = vsub.f32 %v1008_v34, %v421_v22 }
 0x17b   :  { %v396_v29 = vpop.xlane.xlu1 %395  ;;  %v380_v30 = vpop.xlane.xlu0 %379  ;;  %494 = vadd.xlane.f32.xlu0 %v468_v24  ;;  %480 = vadd.xlane.f32.xlu1 %v461_v26 }
 0x17c   :  { %v419_v31 = vmul.f32 0.03125, %v396_v29  ;;  %v411_v32 = vmul.f32 0.03125, %v380_v30  ;;  %v453_v35 = vsel %vm360_vm0, %v1097_v27, 0.0  ;;  %v450_v38 = vsel %vm360_vm0, %v1094_v25, 0.0 }
 0x17d   :  { %v469_v33 = vmul.f32 %v453_v35, %v453_v35  ;;  %v466_v48 = vmul.f32 %v450_v38, %v450_v38 }
 0x17e   :  { %v1106_v37 = vsub.f32 %v1018_v41, %v419_v31  ;;  %v1109_v34 = vsub.f32 %v1016_v40, %v411_v32 }
 0x17f   :  { %v390_v39 = vpop.xlane.xlu0 %389  ;;  %474 = vadd.xlane.f32.xlu0 %v458_v36  ;;  %v392_v42 = vpop.xlane.xlu1 %391  ;;  %496 = vadd.xlane.f32.xlu1 %v469_v33 }
 0x180   :  { %v416_v43 = vmul.f32 0.03125, %v390_v39  ;;  %v417_v44 = vmul.f32 0.03125, %v392_v42  ;;  %v443_v45 = vsel %vm360_vm0, %v1109_v34, 0.0  ;;  %v451_v50 = vsel %vm360_vm0, %v1106_v37, 0.0 }
 0x181   :  { %v459_v41 = vmul.f32 %v443_v45, %v443_v45 }
 0x182   :  { %v1118_v49 = vsub.f32 %v1026_v46, %v416_v43  ;;  %v1121_v40 = vsub.f32 %v1028_v47, %v417_v44  ;;  %v467_v46 = vmul.f32 %v451_v50, %v451_v50 }
 0x183   :  { %490 = vadd.xlane.f32.xlu0 %v466_v48  ;;  %v386_v51 = vpop.xlane.xlu0 %385  ;;  %476 = vadd.xlane.f32.xlu1 %v459_v41  ;;  %v388_v52 = vpop.xlane.xlu1 %387 }
 0x184   :  { %v414_v53 = vmul.f32 0.03125, %v386_v51  ;;  %v415_v56 = vmul.f32 0.03125, %v388_v52  ;;  %v448_v59 = vsel %vm360_vm0, %v1118_v49, 0.0  ;;  %v449_v0 = vsel %vm360_vm0, %v1121_v40, 0.0 }
 0x185   :  { %v464_v60 = vmul.f32 %v448_v59, %v448_v59 }
 0x186   :  { %v1130_v63 = vsub.f32 %v1042_v54, %v414_v53  ;;  %v1133_v47 = vsub.f32 %v1044_v55, %v415_v56  ;;  %v465_v54 = vmul.f32 %v449_v0, %v449_v0 }
 0x187   :  { %486 = vadd.xlane.f32.xlu0 %v464_v60  ;;  %v402_v1 = vpop.xlane.xlu0 %401  ;;  %492 = vadd.xlane.f32.xlu1 %v467_v46  ;;  %v404_v2 = vpop.xlane.xlu1 %403 }
 0x188   :  { %v422_v3 = vmul.f32 0.03125, %v402_v1  ;;  %v423_v4 = vmul.f32 0.03125, %v404_v2  ;;  %v446_v5 = vsel %vm360_vm0, %v1130_v63, 0.0  ;;  %v447_v10 = vsel %vm360_vm0, %v1133_v47, 0.0 }
 0x189   :  { %v462_v6 = vmul.f32 %v446_v5, %v446_v5  ;;  %v1172_v5 = vld [vmem:[%s1253_s3] ss:$0 sm:$0xff] }
 0x18a   :  { %v1142_v9 = vsub.f32 %v1046_v57, %v422_v3  ;;  %v1145_v55 = vsub.f32 %v1048_v58, %v423_v4  ;;  %v463_v57 = vmul.f32 %v447_v10, %v447_v10 }
 0x18b   :  { %482 = vadd.xlane.f32.xlu0 %v462_v6  ;;  %v406_v11 = vpop.xlane.xlu0 %405  ;;  %488 = vadd.xlane.f32.xlu1 %v465_v54  ;;  %v408_v12 = vpop.xlane.xlu1 %407 }
 0x18c   :  { %v424_v13 = vmul.f32 0.03125, %v406_v11  ;;  %v425_v14 = vmul.f32 0.03125, %v408_v12  ;;  %v454_v18 = vsel %vm360_vm0, %v1142_v9, 0.0  ;;  %v455_v21 = vsel %vm360_vm0, %v1145_v55, 0.0 }
 0x18d   :  { %v470_v19 = vmul.f32 %v454_v18, %v454_v18  ;;  %v471_v24 = vmul.f32 %v455_v21, %v455_v21  ;;  %v1180_v21 = vld [vmem:[%s1254_s4] ss:$0 sm:$0xff] }
 0x18e   :  { %v1154_v20 = vsub.f32 %v1056_v61, %v424_v13  ;;  %v1157_v58 = vsub.f32 %v1058_v62, %v425_v14 }
 0x18f   :  { %498 = vadd.xlane.f32.xlu0 %v470_v19  ;;  %484 = vadd.xlane.f32.xlu1 %v463_v57 }
 0x190   :  { %v456_v22 = vsel %vm360_vm0, %v1154_v20, 0.0  ;;  %v457_v61 = vsel %vm360_vm0, %v1157_v58, 0.0 }
 0x191   :  { %v472_v23 = vmul.f32 %v456_v22, %v456_v22  ;;  %v473_v62 = vmul.f32 %v457_v61, %v457_v61 }
 0x193   :  { %502 = vadd.xlane.f32.xlu0 %v472_v23  ;;  %500 = vadd.xlane.f32.xlu1 %v471_v24 }
 0x197   :  { %504 = vadd.xlane.f32.xlu1 %v473_v62 }
 0x200   :  { %v479_v26 = vpop.xlane.xlu0 %478 }
 0x201   :  { %v508_v28 = vmul.f32 0.03125, %v479_v26 }
 0x203   :  { %v524_v29 = vadd.f32 1e-05, %v508_v28 }
 0x204   :  { %v495_v30 = vpop.xlane.xlu0 %494  ;;  %v481_v31 = vpop.xlane.xlu1 %480 }
 0x205   :  { %876 = vrsqrt.f32 %v524_v29  ;;  %v516_v32 = vmul.f32 0.03125, %v495_v30  ;;  %v509_v35 = vmul.f32 0.03125, %v481_v31 }
 0x207   :  { %v532_v36 = vadd.f32 1e-05, %v516_v32  ;;  %v525_v33 = vadd.f32 1e-05, %v509_v35 }
 0x208   :  { %v475_v38 = vpop.xlane.xlu0 %474  ;;  %v497_v39 = vpop.xlane.xlu1 %496 }
 0x209   :  { %878 = vrsqrt.f32 %v532_v36  ;;  %v506_v42 = vmul.f32 0.03125, %v475_v38  ;;  %v517_v17 = vmul.f32 0.03125, %v497_v39 }
 0x20a   :  { %880 = vrsqrt.f32 %v525_v33 }
 0x20b   :  { %v522_v43 = vadd.f32 1e-05, %v506_v42  ;;  %v533_v44 = vadd.f32 1e-05, %v517_v17 }
 0x20c   :  { %v491_v45 = vpop.xlane.xlu0 %490  ;;  %v477_v48 = vpop.xlane.xlu1 %476 }
 0x20d   :  { %882 = vrsqrt.f32 %v522_v43  ;;  %v514_v41 = vmul.f32 0.03125, %v491_v45  ;;  %v507_v50 = vmul.f32 0.03125, %v477_v48 }
 0x20e   :  { %884 = vrsqrt.f32 %v533_v44 }
 0x20f   :  { %v530_v51 = vadd.f32 1e-05, %v514_v41  ;;  %v523_v52 = vadd.f32 1e-05, %v507_v50 }
 0x210   :  { %v487_v53 = vpop.xlane.xlu0 %486  ;;  %v493_v56 = vpop.xlane.xlu1 %492 }
 0x211   :  { %886 = vrsqrt.f32 %v530_v51  ;;  %v512_v59 = vmul.f32 0.03125, %v487_v53  ;;  %v515_v60 = vmul.f32 0.03125, %v493_v56 }
 0x212   :  { %v877_v46 = vpop.eup %876  ;;  %888 = vrsqrt.f32 %v523_v52 }
 0x213   :  { %v528_v0 = vadd.f32 1e-05, %v512_v59  ;;  %v531_v1 = vadd.f32 1e-05, %v515_v60  ;;  %v556_v2 = vmul.f32 %v877_v46, %v1076_v8 }
 0x214   :  { %v483_v3 = vpop.xlane.xlu0 %482  ;;  %v489_v4 = vpop.xlane.xlu1 %488 }
 0x215   :  { %890 = vrsqrt.f32 %v528_v0  ;;  %v510_v6 = vmul.f32 0.03125, %v483_v3  ;;  %v513_v54 = vmul.f32 0.03125, %v489_v4  ;;  %v578_v18 = vmul.f32 %v1172_v5, %v556_v2 }
 0x216   :  { %v879_v10 = vpop.eup %878  ;;  %892 = vrsqrt.f32 %v531_v1 }
 0x217   :  { %v881_v11 = vpop.eup %880  ;;  %v564_v12 = vmul.f32 %v879_v10, %v1073_v7  ;;  %v526_v13 = vadd.f32 1e-05, %v510_v6  ;;  %v529_v14 = vadd.f32 1e-05, %v513_v54 }
 0x218   :  { %v557_v8 = vmul.f32 %v881_v11, %v1085_v16  ;;  %v499_v19 = vpop.xlane.xlu0 %498  ;;  %v485_v57 = vpop.xlane.xlu1 %484  ;;  %v600_v16 = vadd.f32 %v1180_v21, %v578_v18 }
 0x219   :  { %894 = vrsqrt.f32 %v526_v13  ;;  %v518_v22 = vmul.f32 0.03125, %v499_v19  ;;  %v511_v23 = vmul.f32 0.03125, %v485_v57  ;;  %v586_v62 = vmul.f32 %v1172_v5, %v564_v12 }
 0x21a   :  { %v883_v24 = vpop.eup %882  ;;  %v579_v61 = vmul.f32 %v1172_v5, %v557_v8  ;;  %896 = vrsqrt.f32 %v529_v14 }
 0x21b   :  { %v885_v7 = vpop.eup %884  ;;  %v534_v26 = vadd.f32 1e-05, %v518_v22  ;;  %v527_v28 = vadd.f32 1e-05, %v511_v23  ;;  %v554_v30 = vmul.f32 %v883_v24, %v1082_v15  ;;  %v608_v43 = vadd.f32 %v1180_v21, %v586_v62 }
 0x21c   :  { %v601_v29 = vadd.f32 %v1180_v21, %v579_v61  ;;  %v565_v31 = vmul.f32 %v885_v7, %v1097_v27  ;;  %v503_v32 = vpop.xlane.xlu0 %502  ;;  %v501_v35 = vpop.xlane.xlu1 %500 }
 0x21d   :  { %898 = vrsqrt.f32 %v534_v26  ;;  %v520_v36 = vmul.f32 0.03125, %v503_v32  ;;  %v519_v33 = vmul.f32 0.03125, %v501_v35  ;;  %v576_v15 = vmul.f32 %v1172_v5, %v554_v30 }
 0x21e   :  { %v887_v38 = vpop.eup %886  ;;  %v757_v39 = vpack.c.bf16 %v601_v29, %v600_v16  ;;  %v587_v42 = vmul.f32 %v1172_v5, %v565_v31  ;;  %900 = vrsqrt.f32 %v527_v28 }
 0x21f   :  { %v889_v17 = vpop.eup %888  ;;  %v536_v44 = vadd.f32 1e-05, %v520_v36  ;;  %v535_v45 = vadd.f32 1e-05, %v519_v33  ;;  %v562_v48 = vmul.f32 %v887_v38, %v1094_v25  ;;  %v598_v0 = vadd.f32 %v1180_v21, %v576_v15 }
 0x220   :  { %789 = vst [vmem:[%s1255_s5 + $0x8] sm:$0xff] %v757_v39   ;;  %v609_v27 = vadd.f32 %v1180_v21, %v587_v42  ;;  %v555_v41 = vmul.f32 %v889_v17, %v1109_v34  ;;  %v505_v50 = vpop.xlane.xlu1 %504 }
 0x221   :  { %902 = vrsqrt.f32 %v536_v44  ;;  %v521_v51 = vmul.f32 0.03125, %v505_v50  ;;  %v584_v25 = vmul.f32 %v1172_v5, %v562_v48 }
 0x222   :  { %v891_v52 = vpop.eup %890  ;;  %v777_v53 = vpack.c.bf16 %v609_v27, %v608_v43  ;;  %v577_v56 = vmul.f32 %v1172_v5, %v555_v41  ;;  %904 = vrsqrt.f32 %v535_v45 }
 0x223   :  { %v893_v59 = vpop.eup %892  ;;  %v560_v60 = vmul.f32 %v891_v52, %v1118_v49  ;;  %v537_v46 = vadd.f32 1e-05, %v521_v51  ;;  %v606_v54 = vadd.f32 %v1180_v21, %v584_v25 }
 0x224   :  { %793 = vst [vmem:[%s1255_s5 + $0x28] sm:$0xff] %v777_v53   ;;  %v599_v34 = vadd.f32 %v1180_v21, %v577_v56  ;;  %v563_v1 = vmul.f32 %v893_v59, %v1106_v37 }
 0x225   :  { %906 = vrsqrt.f32 %v537_v46  ;;  %v582_v49 = vmul.f32 %v1172_v5, %v560_v60 }
 0x226   :  { %v895_v2 = vpop.eup %894  ;;  %v752_v3 = vpack.c.bf16 %v599_v34, %v598_v0  ;;  %v585_v4 = vmul.f32 %v1172_v5, %v563_v1 }
 0x227   :  { %v897_v6 = vpop.eup %896  ;;  %v558_v11 = vmul.f32 %v895_v2, %v1130_v63  ;;  %v604_v8 = vadd.f32 %v1180_v21, %v582_v49 }
 0x228   :  { %753 = vst [vmem:[%s1255_s5] sm:$0xff] %v752_v3   ;;  %v607_v10 = vadd.f32 %v1180_v21, %v585_v4  ;;  %v561_v37 = vmul.f32 %v897_v6, %v1121_v40 }
 0x229   :  { %v580_v19 = vmul.f32 %v1172_v5, %v558_v11 }
 0x22a   :  { %v899_v12 = vpop.eup %898  ;;  %v772_v13 = vpack.c.bf16 %v607_v10, %v606_v54  ;;  %v583_v14 = vmul.f32 %v1172_v5, %v561_v37 }
 0x22b   :  { %v901_v18 = vpop.eup %900  ;;  %v566_v22 = vmul.f32 %v899_v12, %v1142_v9  ;;  %v602_v62 = vadd.f32 %v1180_v21, %v580_v19 }
 0x22c   :  { %792 = vst [vmem:[%s1255_s5 + $0x20] sm:$0xff] %v772_v13   ;;  %v605_v57 = vadd.f32 %v1180_v21, %v583_v14  ;;  %v559_v63 = vmul.f32 %v901_v18, %v1133_v47 }
 0x22d   :  { %v588_v26 = vmul.f32 %v1172_v5, %v566_v22 }
 0x22e   :  { %v903_v40 = vpop.eup %902  ;;  %v767_v23 = vpack.c.bf16 %v605_v57, %v604_v8  ;;  %v581_v24 = vmul.f32 %v1172_v5, %v559_v63 }
 0x22f   :  { %v905_v61 = vpop.eup %904  ;;  %v568_v7 = vmul.f32 %v903_v40, %v1154_v20  ;;  %v610_v31 = vadd.f32 %v1180_v21, %v588_v26 }
 0x230   :  { %791 = vst [vmem:[%s1255_s5 + $0x18] sm:$0xff] %v767_v23   ;;  %v603_v28 = vadd.f32 %v1180_v21, %v581_v24  ;;  %v567_v9 = vmul.f32 %v905_v61, %v1145_v55 }
 0x231   :  { %v590_v30 = vmul.f32 %v1172_v5, %v568_v7 }
 0x232   :  { %v907_v47 = vpop.eup %906  ;;  %v762_v16 = vpack.c.bf16 %v603_v28, %v602_v62  ;;  %v589_v29 = vmul.f32 %v1172_v5, %v567_v9 }
 0x233   :  { %v569_v20 = vmul.f32 %v907_v47, %v1157_v58  ;;  %v612_v55 = vadd.f32 %v1180_v21, %v590_v30 }
 0x234   :  { %790 = vst [vmem:[%s1255_s5 + $0x10] sm:$0xff] %v762_v16   ;;  %v611_v32 = vadd.f32 %v1180_v21, %v589_v29 }
 0x235   :  { %v591_v35 = vmul.f32 %v1172_v5, %v569_v20 }
 0x236   :  { %v782_v36 = vpack.c.bf16 %v611_v32, %v610_v31 }
 0x237   :  { %v613_v33 = vadd.f32 %v1180_v21, %v591_v35 }
 0x238   :  { %794 = vst [vmem:[%s1255_s5 + $0x30] sm:$0xff] %v782_v36  }
 0x239   :  { %v787_v58 = vpack.c.bf16 %v613_v33, %v612_v55 }
 0x23b   :  { %795 = vst [vmem:[%s1255_s5 + $0x38] sm:$0xff] %v787_v58  }

// kernel: pvt_stage_forward.24
= control target key start
LH: loop header
LB: loop body
LE: loop exit
PB: predicated region body
PF: predicated region fallthrough
CT: control target
= control target key end

     0   :  { %s335_s1 = inlined_call_operand.vmem [shape: bf16[128,128], index: 1, kind: input, shape index: {}]   ;;  %s336_s0 = inlined_call_operand.vmem [shape: bf16[32,128], index: 0, kind: input, shape index: {}]   ;;  %s337_s2 = inlined_call_operand.vmem [shape: f32[1,128], index: 2, kind: input, shape index: {}]   ;;  %s338_s3 = inlined_call_operand.vmem [shape: bf16[32,128], index: 3, kind: output, shape index: {}]  }
   0x1   :  { %v266_v0 = vld [vmem:[%s335_s1 + $0x38] sm:$0xff]   ;;  %v267_v1 = vld [vmem:[%s335_s1 + $0x30] sm:$0xff]   ;;  %v268_v2 = vld [vmem:[%s335_s1 + $0x28] sm:$0xff]  }
   0x2   :  { %246 = vmatprep.subr.bf16.mxu0 %v266_v0  ;;  %v269_v3 = vld [vmem:[%s335_s1 + $0x20] sm:$0xff]   ;;  %v270_v5 = vld [vmem:[%s335_s1 + $0x18] sm:$0xff]   ;;  %v271_v6 = vld [vmem:[%s335_s1 + $0x10] sm:$0xff]  }
   0x3   :  { %247 = vmatpush3.bf16.msra.mxu0 %v266_v0  ;;  %v274_v4 = vld [vmem:[%s336_s0] sm:$0xff]   ;;  %v272_v7 = vld [vmem:[%s335_s1 + $0x8] sm:$0xff]  }
   0x4   :  { %248 = vmatprep.subr.bf16.mxu0 %v267_v1  ;;  %262 = vmatprep.mubr.bf16.mxu0 %v274_v4  ;;  %v273_v8 = vld [vmem:[%s335_s1] sm:$0xff]   ;;  %v275_v9 = vld [vmem:[%s336_s0 + $0x8] sm:$0xff]  }
   0x5   :  { %v216_v11 = vld [vmem:[%s337_s2] ss:$0 sm:$0xff] }
   0x7   :  { %249 = vmatpush3.bf16.msra.mxu0 %v267_v1 }
   0x8   :  { %250 = vmatprep.subr.bf16.mxu0 %v268_v2 }
   0xb   :  { %251 = vmatpush3.bf16.msra.mxu0 %v268_v2 }
   0xc   :  { %252 = vmatprep.subr.bf16.mxu0 %v269_v3 }
   0xf   :  { %253 = vmatpush3.bf16.msra.mxu0 %v269_v3 }
  0x10   :  { %254 = vmatprep.subr.bf16.mxu0 %v270_v5 }
  0x13   :  { %255 = vmatpush3.bf16.msra.mxu0 %v270_v5 }
  0x14   :  { %256 = vmatprep.subr.bf16.mxu0 %v271_v6 }
  0x17   :  { %257 = vmatpush3.bf16.msra.mxu0 %v271_v6 }
  0x18   :  { %258 = vmatprep.subr.bf16.mxu0 %v272_v7 }
  0x1b   :  { %259 = vmatpush3.bf16.msra.mxu0 %v272_v7 }
  0x1c   :  { %260 = vmatprep.subr.bf16.mxu0 %v273_v8 }
  0x1f   :  { %261 = vmatpush3.bf16.msra.mxu0 %v273_v8 }
  0x22   :  { %263 = vmatmul.mubr.bf16.vlgmr.msra.gmra.mxu0 %v275_v9 }
  0xe2   :  { %v264_v10 = vpop.f32.mrf.mxu0 }
  0xe3   :  { %v180_v14 = vadd.f32 %v264_v10, %v216_v11 }
  0xe4   :  { %v141_v12 = vpop.f32.mrf.mxu0 }
  0xe5   :  { %v178_v17 = vadd.f32 %v216_v11, %v141_v12 }
  0xe6   :  { %v265_v13 = vpop.f32.mrf.mxu0 }
  0xe7   :  { %v181_v15 = vadd.f32 %v265_v13, %v216_v11 }
  0xe8   :  { %v144_v16 = vpop.f32.mrf.mxu0 }
  0xe9   :  { %v233_v18 = vpack.c.bf16 %v181_v15, %v180_v14  ;;  %v179_v19 = vadd.f32 %v216_v11, %v144_v16 }
  0xeb   :  { %235 = vst [vmem:[%s338_s3 + $0x8] sm:$0xff] %v233_v18   ;;  %v228_v20 = vpack.c.bf16 %v179_v19, %v178_v17 }
  0xed   :  { %229 = vst [vmem:[%s338_s3] sm:$0xff] %v228_v20  }

// kernel: pvt_stage_forward.23
= control target key start
LH: loop header
LB: loop body
LE: loop exit
PB: predicated region body
PF: predicated region fallthrough
CT: control target
= control target key end

     0   :  { %v190_v10 = vlaneseq  ;;  %s453_s1 = inlined_call_operand.vmem [shape: bf16[128,128], index: 1, kind: input, shape index: {}]   ;;  %s454_s0 = inlined_call_operand.vmem [shape: bf16[32,128], index: 0, kind: input, shape index: {}]   ;;  %s455_s2 = inlined_call_operand.vmem [shape: f32[1,128], index: 2, kind: input, shape index: {}]   ;;  %s456_s3 = inlined_call_operand.vmem [shape: f32[1,128], index: 3, kind: input, shape index: {}]   ;;  %s457_s4 = inlined_call_operand.vmem [shape: f32[1,128], index: 4, kind: input, shape index: {}]   ;;  %s458_s5 = inlined_call_operand.vmem [shape: bf16[32,128], index: 5, kind: output, shape index: {}]  }
   0x1   :  { %v352_v0 = vld [vmem:[%s453_s1 + $0x38] sm:$0xff]   ;;  %v353_v1 = vld [vmem:[%s453_s1 + $0x30] sm:$0xff]   ;;  %v354_v2 = vld [vmem:[%s453_s1 + $0x28] sm:$0xff]  }
   0x2   :  { %332 = vmatprep.subr.bf16.mxu0 %v352_v0  ;;  %v355_v3 = vld [vmem:[%s453_s1 + $0x20] sm:$0xff]   ;;  %v356_v5 = vld [vmem:[%s453_s1 + $0x18] sm:$0xff]   ;;  %v357_v6 = vld [vmem:[%s453_s1 + $0x10] sm:$0xff]   ;;  %v191_v11 = vand.u32 127, %v190_v10 }
   0x3   :  { %333 = vmatpush3.bf16.msra.mxu0 %v352_v0  ;;  %v360_v4 = vld [vmem:[%s454_s0] sm:$0xff]   ;;  %v358_v7 = vld [vmem:[%s453_s1 + $0x8] sm:$0xff]  }
   0x4   :  { %334 = vmatprep.subr.bf16.mxu0 %v353_v1  ;;  %348 = vmatprep.mubr.bf16.mxu0 %v360_v4  ;;  %v359_v8 = vld [vmem:[%s453_s1] sm:$0xff]   ;;  %v361_v9 = vld [vmem:[%s454_s0 + $0x8] sm:$0xff]   ;;  %vm192_vm0 = vcmp.lt.s32.totalorder %v191_v11, 32 }
   0x5   :  { %v300_v12 = vld [vmem:[%s455_s2] ss:$0 sm:$0xff] }
   0x6   :  { %v301_v59 = vld [vmem:[%s456_s3] ss:$0 sm:$0xff] }
   0x7   :  { %335 = vmatpush3.bf16.msra.mxu0 %v353_v1  ;;  %v302_v0 = vld [vmem:[%s457_s4] ss:$0 sm:$0xff] }
   0x8   :  { %336 = vmatprep.subr.bf16.mxu0 %v354_v2 }
   0xb   :  { %337 = vmatpush3.bf16.msra.mxu0 %v354_v2 }
   0xc   :  { %338 = vmatprep.subr.bf16.mxu0 %v355_v3 }
   0xf   :  { %339 = vmatpush3.bf16.msra.mxu0 %v355_v3 }
  0x10   :  { %340 = vmatprep.subr.bf16.mxu0 %v356_v5 }
  0x13   :  { %341 = vmatpush3.bf16.msra.mxu0 %v356_v5 }
  0x14   :  { %342 = vmatprep.subr.bf16.mxu0 %v357_v6 }
  0x17   :  { %343 = vmatpush3.bf16.msra.mxu0 %v357_v6 }
  0x18   :  { %344 = vmatprep.subr.bf16.mxu0 %v358_v7 }
  0x1b   :  { %345 = vmatpush3.bf16.msra.mxu0 %v358_v7 }
  0x1c   :  { %346 = vmatprep.subr.bf16.mxu0 %v359_v8 }
  0x1f   :  { %347 = vmatpush3.bf16.msra.mxu0 %v359_v8 }
  0x22   :  { %349 = vmatmul.mubr.bf16.vlgmr.msra.gmra.mxu0 %v361_v9 }
  0xe2   :  { %v350_v13 = vpop.f32.mrf.mxu0 }
  0xe3   :  { %v186_v14 = vadd.f32 %v350_v13, %v300_v12 }
  0xe4   :  { %v147_v15 = vpop.f32.mrf.mxu0 }
  0xe5   :  { %v184_v16 = vadd.f32 %v300_v12, %v147_v15  ;;  %v195_v17 = vsel %vm192_vm0, %v186_v14, 0.0 }
  0xe6   :  { %201 = vadd.xlane.f32.xlu1 %v195_v17  ;;  %v351_v18 = vpop.f32.mrf.mxu0 }
  0xe7   :  { %v187_v19 = vadd.f32 %v351_v18, %v300_v12  ;;  %v193_v20 = vsel %vm192_vm0, %v184_v16, 0.0 }
  0xe8   :  { %197 = vadd.xlane.f32.xlu0 %v193_v20  ;;  %v150_v21 = vpop.f32.mrf.mxu0 }
  0xe9   :  { %v185_v22 = vadd.f32 %v300_v12, %v150_v21  ;;  %v196_v23 = vsel %vm192_vm0, %v187_v19, 0.0 }
  0xea   :  { %203 = vadd.xlane.f32.xlu1 %v196_v23 }
  0xeb   :  { %v194_v24 = vsel %vm192_vm0, %v185_v22, 0.0 }
  0xec   :  { %199 = vadd.xlane.f32.xlu0 %v194_v24 }
 0x16f   :  { %v202_v25 = vpop.xlane.xlu1 %201 }
 0x170   :  { %v208_v26 = vmul.f32 0.03125, %v202_v25 }
 0x171   :  { %v198_v27 = vpop.xlane.xlu0 %197 }
 0x172   :  { %v206_v28 = vmul.f32 0.03125, %v198_v27  ;;  %v212_v30 = vsub.f32 %v186_v14, %v208_v26 }
 0x173   :  { %v204_v29 = vpop.xlane.xlu1 %203 }
 0x174   :  { %v210_v31 = vsub.f32 %v184_v16, %v206_v28  ;;  %v209_v32 = vmul.f32 0.03125, %v204_v29  ;;  %v216_v39 = vsel %vm192_vm0, %v212_v30, 0.0 }
 0x175   :  { %v200_v33 = vpop.xlane.xlu0 %199  ;;  %v220_v41 = vmul.f32 %v216_v39, %v216_v39 }
 0x176   :  { %v207_v34 = vmul.f32 0.03125, %v200_v33  ;;  %v214_v35 = vsel %vm192_vm0, %v210_v31, 0.0  ;;  %v213_v37 = vsub.f32 %v187_v19, %v209_v32 }
 0x177   :  { %v218_v36 = vmul.f32 %v214_v35, %v214_v35 }
 0x178   :  { %v211_v38 = vsub.f32 %v185_v22, %v207_v34  ;;  %v217_v43 = vsel %vm192_vm0, %v213_v37, 0.0 }
 0x179   :  { %222 = vadd.xlane.f32.xlu0 %v218_v36  ;;  %v221_v44 = vmul.f32 %v217_v43, %v217_v43 }
 0x17a   :  { %v215_v40 = vsel %vm192_vm0, %v211_v38, 0.0 }
 0x17b   :  { %v219_v42 = vmul.f32 %v215_v40, %v215_v40 }
 0x17d   :  { %226 = vadd.xlane.f32.xlu0 %v220_v41  ;;  %224 = vadd.xlane.f32.xlu1 %v219_v42 }
 0x181   :  { %228 = vadd.xlane.f32.xlu1 %v221_v44 }
 0x202   :  { %v223_v45 = vpop.xlane.xlu0 %222 }
 0x203   :  { %v230_v46 = vmul.f32 0.03125, %v223_v45 }
 0x205   :  { %v234_v47 = vadd.f32 1e-05, %v230_v46 }
 0x206   :  { %v225_v48 = vpop.xlane.xlu1 %224  ;;  %v227_v49 = vpop.xlane.xlu0 %226 }
 0x207   :  { %362 = vrsqrt.f32 %v234_v47  ;;  %v231_v50 = vmul.f32 0.03125, %v225_v48  ;;  %v232_v51 = vmul.f32 0.03125, %v227_v49 }
 0x209   :  { %v235_v52 = vadd.f32 1e-05, %v231_v50  ;;  %v236_v53 = vadd.f32 1e-05, %v232_v51 }
 0x20a   :  { %v229_v54 = vpop.xlane.xlu1 %228 }
 0x20b   :  { %364 = vrsqrt.f32 %v235_v52  ;;  %v233_v55 = vmul.f32 0.03125, %v229_v54 }
 0x20c   :  { %366 = vrsqrt.f32 %v236_v53 }
 0x20d   :  { %v237_v56 = vadd.f32 1e-05, %v233_v55 }
 0x20f   :  { %368 = vrsqrt.f32 %v237_v56 }
 0x214   :  { %v363_v57 = vpop.eup %362 }
 0x215   :  { %v242_v58 = vmul.f32 %v363_v57, %v210_v31 }
 0x217   :  { %v252_v62 = vmul.f32 %v301_v59, %v242_v58 }
 0x218   :  { %v365_v60 = vpop.eup %364 }
 0x219   :  { %v367_v61 = vpop.eup %366  ;;  %v243_v63 = vmul.f32 %v365_v60, %v211_v38  ;;  %v262_v4 = vadd.f32 %v302_v0, %v252_v62 }
 0x21a   :  { %v244_v1 = vmul.f32 %v367_v61, %v212_v30 }
 0x21b   :  { %v253_v2 = vmul.f32 %v301_v59, %v243_v63 }
 0x21c   :  { %v369_v3 = vpop.eup %368  ;;  %v254_v6 = vmul.f32 %v301_v59, %v244_v1 }
 0x21d   :  { %v263_v5 = vadd.f32 %v302_v0, %v253_v2  ;;  %v245_v7 = vmul.f32 %v369_v3, %v213_v37 }
 0x21e   :  { %v264_v10 = vadd.f32 %v302_v0, %v254_v6 }
 0x21f   :  { %v314_v8 = vpack.c.bf16 %v263_v5, %v262_v4  ;;  %v255_v9 = vmul.f32 %v301_v59, %v245_v7 }
 0x221   :  { %315 = vst [vmem:[%s458_s5] sm:$0xff] %v314_v8   ;;  %v265_v11 = vadd.f32 %v302_v0, %v255_v9 }
 0x223   :  { %v319_v12 = vpack.c.bf16 %v265_v11, %v264_v10 }
 0x225   :  { %321 = vst [vmem:[%s458_s5 + $0x8] sm:$0xff] %v319_v12  }

// kernel: pvt_stage_forward.22
= control target key start
LH: loop header
LB: loop body
LE: loop exit
PB: predicated region body
PF: predicated region fallthrough
CT: control target
= control target key end

     0   :  { %s705_s1 = inlined_call_operand.vmem [shape: bf16[128,128], index: 1, kind: input, shape index: {}]   ;;  %s706_s0 = inlined_call_operand.vmem [shape: bf16[128,128], index: 0, kind: input, shape index: {}]   ;;  %s707_s2 = inlined_call_operand.vmem [shape: f32[1,128], index: 2, kind: input, shape index: {}]   ;;  %s708_s3 = inlined_call_operand.vmem [shape: bf16[128,128], index: 3, kind: output, shape index: {}]  }
   0x1   :  { %v594_v0 = vld [vmem:[%s705_s1 + $0x38] sm:$0xff]   ;;  %v595_v1 = vld [vmem:[%s705_s1 + $0x30] sm:$0xff]   ;;  %v596_v2 = vld [vmem:[%s705_s1 + $0x28] sm:$0xff]  }
   0x2   :  { %546 = vmatprep.subr.bf16.mxu0 %v594_v0  ;;  %578 = vmatprep.subr.bf16.mxu1 %v594_v0  ;;  %v597_v3 = vld [vmem:[%s705_s1 + $0x20] sm:$0xff]   ;;  %v598_v6 = vld [vmem:[%s705_s1 + $0x18] sm:$0xff]   ;;  %v599_v7 = vld [vmem:[%s705_s1 + $0x10] sm:$0xff]  }
   0x3   :  { %547 = vmatpush3.bf16.msra.mxu0 %v594_v0  ;;  %586 = vmatpush3.bf16.msra.mxu1 %v594_v0  ;;  %v602_v4 = vld [vmem:[%s706_s0] sm:$0xff]   ;;  %v600_v8 = vld [vmem:[%s705_s1 + $0x8] sm:$0xff]   ;;  %v606_v12 = vld [vmem:[%s706_s0 + $0x10] sm:$0xff]  }
   0x4   :  { %548 = vmatprep.subr.bf16.mxu0 %v595_v1  ;;  %579 = vmatprep.subr.bf16.mxu1 %v595_v1  ;;  %v603_v5 = vld [vmem:[%s706_s0 + $0x20] sm:$0xff]   ;;  %v604_v10 = vld [vmem:[%s706_s0 + $0x8] sm:$0xff]   ;;  %v607_v13 = vld [vmem:[%s706_s0 + $0x30] sm:$0xff]  }
   0x5   :  { %562 = vmatprep.mubr.bf16.mxu0 %v602_v4  ;;  %570 = vmatprep.mubr.bf16.mxu1 %v603_v5  ;;  %v601_v9 = vld [vmem:[%s705_s1] sm:$0xff]   ;;  %v605_v11 = vld [vmem:[%s706_s0 + $0x28] sm:$0xff]   ;;  %v608_v14 = vld [vmem:[%s706_s0 + $0x18] sm:$0xff]  }
   0x6   :  { %v609_v15 = vld [vmem:[%s706_s0 + $0x38] sm:$0xff]   ;;  %v450_v18 = vld [vmem:[%s707_s2] ss:$0 sm:$0xff] }
   0x7   :  { %549 = vmatpush3.bf16.msra.mxu0 %v595_v1  ;;  %587 = vmatpush3.bf16.msra.mxu1 %v595_v1 }
   0x8   :  { %550 = vmatprep.subr.bf16.mxu0 %v596_v2  ;;  %580 = vmatprep.subr.bf16.mxu1 %v596_v2 }
   0xb   :  { %551 = vmatpush3.bf16.msra.mxu0 %v596_v2  ;;  %588 = vmatpush3.bf16.msra.mxu1 %v596_v2 }
   0xc   :  { %552 = vmatprep.subr.bf16.mxu0 %v597_v3  ;;  %581 = vmatprep.subr.bf16.mxu1 %v597_v3 }
   0xf   :  { %553 = vmatpush3.bf16.msra.mxu0 %v597_v3  ;;  %589 = vmatpush3.bf16.msra.mxu1 %v597_v3 }
  0x10   :  { %554 = vmatprep.subr.bf16.mxu0 %v598_v6  ;;  %582 = vmatprep.subr.bf16.mxu1 %v598_v6 }
  0x13   :  { %555 = vmatpush3.bf16.msra.mxu0 %v598_v6  ;;  %590 = vmatpush3.bf16.msra.mxu1 %v598_v6 }
  0x14   :  { %556 = vmatprep.subr.bf16.mxu0 %v599_v7  ;;  %583 = vmatprep.subr.bf16.mxu1 %v599_v7 }
  0x17   :  { %557 = vmatpush3.bf16.msra.mxu0 %v599_v7  ;;  %591 = vmatpush3.bf16.msra.mxu1 %v599_v7 }
  0x18   :  { %558 = vmatprep.subr.bf16.mxu0 %v600_v8  ;;  %584 = vmatprep.subr.bf16.mxu1 %v600_v8 }
  0x1b   :  { %559 = vmatpush3.bf16.msra.mxu0 %v600_v8  ;;  %592 = vmatpush3.bf16.msra.mxu1 %v600_v8 }
  0x1c   :  { %560 = vmatprep.subr.bf16.mxu0 %v601_v9  ;;  %585 = vmatprep.subr.bf16.mxu1 %v601_v9 }
  0x1f   :  { %561 = vmatpush3.bf16.msra.mxu0 %v601_v9  ;;  %593 = vmatpush3.bf16.msra.mxu1 %v601_v9 }
  0x22   :  { %563 = vmatmul.mubr.bf16.vlgmr.msra.gmra.mxu0 %v604_v10  ;;  %571 = vmatmul.mubr.bf16.vlgmr.msra.gmra.mxu1 %v605_v11 }
  0x23   :  { %566 = vmatprep.mubr.bf16.mxu0 %v606_v12  ;;  %574 = vmatprep.mubr.bf16.mxu1 %v607_v13 }
  0x2a   :  { %567 = vmatmul.mubr.bf16.gmra.mxu0 %v608_v14  ;;  %575 = vmatmul.mubr.bf16.gmra.mxu1 %v609_v15 }
  0xe2   :  { %v564_v16 = vpop.f32.mrf.mxu0  ;;  %v572_v17 = vpop.f32.mrf.mxu1 }
  0xe3   :  { %v336_v23 = vadd.f32 %v564_v16, %v450_v18  ;;  %v344_v24 = vadd.f32 %v572_v17, %v450_v18 }
  0xe4   :  { %v213_v19 = vpop.f32.mrf.mxu0  ;;  %v245_v20 = vpop.f32.mrf.mxu1 }
  0xe5   :  { %v334_v27 = vadd.f32 %v450_v18, %v213_v19  ;;  %v342_v28 = vadd.f32 %v450_v18, %v245_v20 }
  0xe6   :  { %v565_v21 = vpop.f32.mrf.mxu0  ;;  %v573_v22 = vpop.f32.mrf.mxu1 }
  0xe7   :  { %v337_v25 = vadd.f32 %v565_v21, %v450_v18  ;;  %v345_v26 = vadd.f32 %v573_v22, %v450_v18 }
  0xe8   :  { %v216_v29 = vpop.f32.mrf.mxu0  ;;  %v248_v30 = vpop.f32.mrf.mxu1 }
  0xe9   :  { %v491_v31 = vpack.c.bf16 %v337_v25, %v336_v23  ;;  %v511_v32 = vpack.c.bf16 %v345_v26, %v344_v24  ;;  %v335_v33 = vadd.f32 %v450_v18, %v216_v29  ;;  %v343_v34 = vadd.f32 %v450_v18, %v248_v30 }
  0xea   :  { %v568_v35 = vpop.f32.mrf.mxu0  ;;  %v576_v36 = vpop.f32.mrf.mxu1 }
  0xeb   :  { %523 = vst [vmem:[%s708_s3 + $0x8] sm:$0xff] %v491_v31   ;;  %527 = vst [vmem:[%s708_s3 + $0x28] sm:$0xff] %v511_v32   ;;  %v486_v37 = vpack.c.bf16 %v335_v33, %v334_v27  ;;  %v506_v38 = vpack.c.bf16 %v343_v34, %v342_v28  ;;  %v340_v43 = vadd.f32 %v568_v35, %v450_v18 }
  0xec   :  { %v229_v39 = vpop.f32.mrf.mxu0  ;;  %v261_v40 = vpop.f32.mrf.mxu1  ;;  %v348_v44 = vadd.f32 %v576_v36, %v450_v18 }
  0xed   :  { %487 = vst [vmem:[%s708_s3] sm:$0xff] %v486_v37   ;;  %526 = vst [vmem:[%s708_s3 + $0x20] sm:$0xff] %v506_v38   ;;  %v338_v47 = vadd.f32 %v450_v18, %v229_v39  ;;  %v346_v48 = vadd.f32 %v450_v18, %v261_v40 }
  0xee   :  { %v569_v41 = vpop.f32.mrf.mxu0  ;;  %v577_v42 = vpop.f32.mrf.mxu1 }
  0xef   :  { %v341_v45 = vadd.f32 %v569_v41, %v450_v18  ;;  %v349_v46 = vadd.f32 %v577_v42, %v450_v18 }
  0xf0   :  { %v232_v49 = vpop.f32.mrf.mxu0  ;;  %v264_v50 = vpop.f32.mrf.mxu1 }
  0xf1   :  { %v501_v51 = vpack.c.bf16 %v341_v45, %v340_v43  ;;  %v521_v52 = vpack.c.bf16 %v349_v46, %v348_v44  ;;  %v339_v53 = vadd.f32 %v450_v18, %v232_v49  ;;  %v347_v54 = vadd.f32 %v450_v18, %v264_v50 }
  0xf3   :  { %525 = vst [vmem:[%s708_s3 + $0x18] sm:$0xff] %v501_v51   ;;  %529 = vst [vmem:[%s708_s3 + $0x38] sm:$0xff] %v521_v52   ;;  %v496_v55 = vpack.c.bf16 %v339_v53, %v338_v47  ;;  %v516_v56 = vpack.c.bf16 %v347_v54, %v346_v48 }
  0xf5   :  { %524 = vst [vmem:[%s708_s3 + $0x10] sm:$0xff] %v496_v55   ;;  %528 = vst [vmem:[%s708_s3 + $0x30] sm:$0xff] %v516_v56  }

// kernel: pvt_stage_forward.25
= control target key start
LH: loop header
LB: loop body
LE: loop exit
PB: predicated region body
PF: predicated region fallthrough
CT: control target
= control target key end

     0   :  { %s1237_s9 = smov 0   ;;  %s1239_s10 = smov 0   ;;  %s1438_s0 = inlined_call_operand.vmem [shape: bf16[2,64,32], index: 0, kind: input, shape index: {}]   ;;  %s1439_s1 = inlined_call_operand.vmem [shape: bf16[2,16,64], index: 1, kind: input, shape index: {}]   ;;  %s1440_s2 = inlined_call_operand.vmem [shape: bf16[2,64,32], index: 2, kind: output, shape index: {}]  }
   0x1   :  { %s1241_s11 = smov 0  }
   0x2 LB: > { %s24_s12 = sadd.s32 1, %s1212_s10  ;;  %p959_p0 = scmp.ge.s32.totalorder %s1216_s11, 1  ;;  %s1216_s11 = sphi %s1241_s11, %s12_s11   ;;  %s1212_s10 = sphi %s1239_s10, %s1442_s10   ;;  %s1208_s9 = sphi %s1237_s9, %s1441_s9  }
   0x3   : > { %p26_p1 = scmp.ge.s32.totalorder %s24_s12, 2  ;;  %p143_p2 = scmp.lt.s32.totalorder %s1216_s11, 3 }
   0x5   : > { %s1444_s12 = smov (%p26_p1, %s24_s12), 0  ;;  %p144_p3 = pnand %p959_p0, %p143_p2 }
   0x6   : > { %p179_p4 = scmp.lt.s32.totalorder (!%p144_p3), %s1208_s9, 1  ;;  %s1218_s21 = smov (!%p144_p3), 112  }
   0x7   : > { %147 = sbr.rel (%p144_p3) target bundleno = 1095 (0x447), region = 28  ;;  %s1219_s22 = smov (!%p144_p3), 96  }
   0x8   : > { %s1220_s23 = smov (!%p144_p3), 80   ;;  %s1221_s27 = smov (!%p144_p3), 16  }
   0xc   : > { %s1446_s9 = smov (!%p179_p4, %s1208_s9), 1  ;;  %vm239_vm0 = vcmask 130048   ;;  %vm524_vm1 = vcmask 125952   ;;  %vm847_vm2 = vcmask 257152  }
   0xd   : > { %s1002_s13 = sshll.u32 %s1446_s9, 3  ;;  %s1001_s14 = sshll.u32 %s1446_s9, 5 }
   0xe   : > { %s192_s17 = scalar_lea.vmem %s1439_s1, %s1002_s13  ;;  %s186_s20 = scalar_lea.vmem %s1438_s0, %s1001_s14 }
   0xf   : > { %v1267_v0 = vld [vmem:[%s192_s17] sm:$0xff]   ;;  %v1036_v2 = vld [vmem:[%s186_s20 + $0x8] sm:$0xff]   ;;  %v1037_v3 = vld [vmem:[%s186_s20 + $0x10] sm:$0xff]   ;;  %s1380_s26 = scalar_lea.vmem %s1440_s2, %s1001_s14 }
  0x10   : > { %v1021_v1 = vld [vmem:[%s186_s20] sm:$0xff]   ;;  %1099 = vmatprep.subr.msk.bf16.mxu0 %vm239_vm0, %v1267_v0  ;;  %v253_v4 = vsel %vm239_vm0, %v1267_v0, 0  ;;  %v1026_v7 = vunpack.c.l.bf16 %v1036_v2  ;;  %v1027_v8 = vunpack.c.h.bf16 %v1036_v2  ;;  %v1030_v9 = vunpack.c.l.bf16 %v1037_v3  ;;  %v1038_v11 = vld [vmem:[%s186_s20 + $0x18] sm:$0xff]  }
  0x11   : > { %v1022_v5 = vunpack.c.l.bf16 %v1021_v1  ;;  %v1023_v6 = vunpack.c.h.bf16 %v1021_v1  ;;  %1060 = vmatpush3.bf16.xpose.msra.mxu0 %v253_v4  ;;  %v1031_v10 = vunpack.c.h.bf16 %v1037_v3  ;;  %v1034_v19 = vunpack.c.l.bf16 %v1038_v11 }
  0x12   : > { %v224_v14 = vmul.f32 0.25, %v1026_v7  ;;  %v225_v15 = vmul.f32 0.25, %v1027_v8  ;;  %v226_v16 = vmul.f32 0.25, %v1030_v9  ;;  %v1035_v20 = vunpack.c.h.bf16 %v1038_v11 }
  0x13   : > { %v222_v12 = vmul.f32 0.25, %v1022_v5  ;;  %v223_v13 = vmul.f32 0.25, %v1023_v6  ;;  %v227_v17 = vmul.f32 0.25, %v1031_v10  ;;  %v228_v23 = vmul.f32 0.25, %v1034_v19 }
  0x14   : > { %v231_v21 = vpack.c.bf16 %v225_v15, %v224_v14  ;;  %v229_v24 = vmul.f32 0.25, %v1035_v20 }
  0x15   : > { %v230_v18 = vpack.c.bf16 %v223_v13, %v222_v12  ;;  %v232_v22 = vpack.c.bf16 %v227_v17, %v226_v16 }
  0x16   : > { %v233_v25 = vpack.c.bf16 %v229_v24, %v228_v23 }
  0x17   : > { %1061 = vmatprep.mubr.msk.bf16.mxu0 %vm239_vm0, %v230_v18 }
  0x18   : > { %1062 = vmatmul.mubr.msk.bf16.vlgmr.msra.gmra.mxu0 %vm239_vm0, %v231_v21 }
  0x19   : > { %1065 = vmatprep.mubr.msk.bf16.mxu0 %vm239_vm0, %v232_v22 }
  0x20   : > { %1066 = vmatmul.mubr.msk.bf16.gmra.mxu0 %vm239_vm0, %v233_v25 }
  0xd8   : > { %v1063_v26 = vpop.f32.mrf.mxu0 }
  0xd9   : > { %v326_v27 = vsel %vm239_vm0, %v1063_v26, -inf }
  0xda   : > { %327 = vmax.xlane.f32.xlu1 %v326_v27  ;;  %v289_v28 = vpop.f32.mrf.mxu0 }
  0xdb   : > { %v320_v29 = vsel %vm239_vm0, %v289_v28, -inf }
  0xdc   : > { %321 = vmax.xlane.f32.xlu0 %v320_v29  ;;  %v1064_v30 = vpop.f32.mrf.mxu0 }
  0xdd   : > { %v329_v31 = vsel %vm239_vm0, %v1064_v30, -inf }
  0xde   : > { %330 = vmax.xlane.f32.xlu1 %v329_v31  ;;  %v292_v32 = vpop.f32.mrf.mxu0 }
  0xdf   : > { %v323_v33 = vsel %vm239_vm0, %v292_v32, -inf }
  0xe0   : > { %324 = vmax.xlane.f32.xlu0 %v323_v33  ;;  %v1067_v34 = vpop.f32.mrf.mxu0 }
  0xe1   : > { %v338_v36 = vsel %vm239_vm0, %v1067_v34, -inf }
  0xe2   : > { %v305_v35 = vpop.f32.mrf.mxu0 }
  0xe3   : > { %v332_v40 = vsel %vm239_vm0, %v305_v35, -inf }
  0xe4   : > { %339 = vmax.xlane.f32.xlu0 %v338_v36  ;;  %v1068_v37 = vpop.f32.mrf.mxu0 }
  0xe5   : > { %v341_v38 = vsel %vm239_vm0, %v1068_v37, -inf }
  0xe6   : > { %342 = vmax.xlane.f32.xlu1 %v341_v38  ;;  %v308_v39 = vpop.f32.mrf.mxu0 }
  0xe7   : > { %v335_v41 = vsel %vm239_vm0, %v308_v39, -inf }
  0xe8   : > { %333 = vmax.xlane.f32.xlu0 %v332_v40 }
  0xea   : > { %336 = vmax.xlane.f32.xlu1 %v335_v41 }
  0xfb   : > { %545 = vrot.lane.b32.xlu1 %v1267_v0, %s1218_s21 }
  0xfe   : > { %396 = vrot.lane.b32.xlu0 %v1267_v0, %s1219_s22 }
  0xff   : > { %537 = vrot.lane.b32.xlu1 %v230_v18, %s1218_s21 }
 0x102   : > { %541 = vrot.lane.b32.xlu0 %v232_v22, %s1218_s21 }
 0x103   : > { %539 = vrot.lane.b32.xlu1 %v231_v21, %s1218_s21 }
 0x107   : > { %543 = vrot.lane.b32.xlu1 %v233_v25, %s1218_s21 }
 0x163   : > { %v328_v42 = vpop.xlane.xlu1 %327 }
 0x164   : > { %v346_v45 = vsub.f32 %v1063_v26, %v328_v42 }
 0x165   : > { %v322_v43 = vpop.xlane.xlu0 %321 }
 0x166   : > { %v344_v44 = vsub.f32 %v289_v28, %v322_v43  ;;  %v356_v52 = vmul.f32 1.442695, %v346_v45 }
 0x167   : > { %v331_v46 = vpop.xlane.xlu1 %330 }
 0x168   : > { %v352_v47 = vmul.f32 1.442695, %v344_v44  ;;  %v347_v48 = vsub.f32 %v1064_v30, %v331_v46 }
 0x169   : > { %v325_v49 = vpop.xlane.xlu0 %324 }
 0x16a   : > { %v358_v50 = vmul.f32 1.442695, %v347_v48  ;;  %v345_v51 = vsub.f32 %v292_v32, %v325_v49  ;;  %1130 = vpow2.f32 %v352_v47 }
 0x16c   : > { %v354_v53 = vmul.f32 1.442695, %v345_v51  ;;  %1132 = vpow2.f32 %v358_v50 }
 0x16d   : > { %v340_v54 = vpop.xlane.xlu0 %339 }
 0x16e   : > { %1134 = vpow2.f32 %v354_v53  ;;  %v350_v57 = vsub.f32 %v1067_v34, %v340_v54 }
 0x16f   : > { %1136 = vpow2.f32 %v356_v52  ;;  %v343_v55 = vpop.xlane.xlu1 %342 }
 0x170   : > { %v351_v56 = vsub.f32 %v1068_v37, %v343_v55  ;;  %v364_v1 = vmul.f32 1.442695, %v350_v57 }
 0x171   : > { %v334_v58 = vpop.xlane.xlu0 %333 }
 0x172   : > { %v366_v59 = vmul.f32 1.442695, %v351_v56  ;;  %v348_v60 = vsub.f32 %v305_v35, %v334_v58 }
 0x173   : > { %v337_v61 = vpop.xlane.xlu1 %336 }
 0x174   : > { %v360_v62 = vmul.f32 1.442695, %v348_v60  ;;  %v349_v63 = vsub.f32 %v308_v39, %v337_v61  ;;  %1138 = vpow2.f32 %v366_v59 }
 0x175   : > { %v397_v2 = vpop.permute.xlu0 %396 }
 0x176   : > { %v362_v3 = vmul.f32 1.442695, %v349_v63  ;;  %1069 = vmatprep.subr.bf16.mxu1 %v397_v2  ;;  %1140 = vpow2.f32 %v360_v62 }
 0x177   : > { %1070 = vmatpush3.bf16.msra.mxu1 %v397_v2  ;;  %v546_v4 = vpop.permute.xlu1 %545  ;;  %v1288_v5 = vpop.eup %1130 }
 0x178   : > { %1142 = vpow2.f32 %v362_v3  ;;  %1100 = vmatprep.subr.msk.bf16.mxu1 %vm239_vm0, %v546_v4  ;;  %v560_v11 = vsel %vm239_vm0, %v546_v4, 0 }
 0x179   : > { %1144 = vpow2.f32 %v364_v1  ;;  %v1290_v6 = vpop.eup %1132  ;;  %v542_v20 = vpop.permute.xlu0 %541 }
 0x17b   : > { %v1292_v7 = vpop.eup %1134  ;;  %v538_v18 = vpop.permute.xlu1 %537 }
 0x17c   : > { %v1294_v8 = vpop.eup %1136  ;;  %v392_v9 = vpack.c.bf16 %v1292_v7, %v1288_v5 }
 0x17d   : > { %v393_v10 = vpack.c.bf16 %v1290_v6, %v1294_v8 }
 0x17e   : > { %1071 = vmatprep.mubr.msk.bf16.mxu1 %vm239_vm0, %v392_v9 }
 0x17f   : > { %1072 = vmatmul.mubr.msk.bf16.vlgmr.msra.gmra.mxu1 %vm239_vm0, %v393_v10  ;;  %v540_v19 = vpop.permute.xlu1 %539 }
 0x180   : > { %1080 = vmatpush3.bf16.xpose.msra.mxu1 %v560_v11 }
 0x181   : > { %v1303_v12 = vpop.eup %1138 }
 0x183   : > { %v1305_v13 = vpop.eup %1140  ;;  %v544_v21 = vpop.permute.xlu1 %543 }
 0x185   : > { %v1307_v14 = vpop.eup %1142 }
 0x186   : > { %v1309_v15 = vpop.eup %1144  ;;  %v394_v16 = vpack.c.bf16 %v1307_v14, %v1305_v13 }
 0x187   : > { %v395_v17 = vpack.c.bf16 %v1303_v12, %v1309_v15 }
 0x188   : > { %1075 = vmatprep.mubr.msk.bf16.mxu1 %vm239_vm0, %v394_v16 }
 0x189   : > { %1076 = vmatmul.mubr.msk.bf16.gmra.mxu1 %vm239_vm0, %v395_v17 }
 0x18a   : > { %1081 = vmatprep.mubr.msk.bf16.mxu1 %vm239_vm0, %v538_v18 }
 0x191   : > { %1082 = vmatmul.mubr.msk.bf16.vlgmr.msra.gmra.mxu1 %vm239_vm0, %v540_v19 }
 0x192   : > { %1085 = vmatprep.mubr.msk.bf16.mxu1 %vm239_vm0, %v542_v20 }
 0x199   : > { %1086 = vmatmul.mubr.msk.bf16.gmra.mxu1 %vm239_vm0, %v544_v21 }
 0x23f   : > { %v1321_v22 = vpop.f32.mrf.mxu1 }
 0x241   : > { %v1323_v23 = vpop.f32.mrf.mxu1 }
 0x243   : > { %v1325_v24 = vpop.f32.mrf.mxu1 }
 0x245   : > { %v1327_v25 = vpop.f32.mrf.mxu1 }
 0x249   : > { %v1329_v26 = vpop.f32.mrf.mxu1 }
 0x24b   : > { %v1331_v27 = vpop.f32.mrf.mxu1 }
 0x24d   : > { %v1333_v28 = vpop.f32.mrf.mxu1 }
 0x24f   : > { %v1335_v29 = vpop.f32.mrf.mxu1 }
 0x251   : > { %v1083_v30 = vpop.f32.mrf.mxu1 }
 0x252   : > { %v633_v35 = vsel %vm239_vm0, %v1083_v30, -inf }
 0x253   : > { %v596_v31 = vpop.f32.mrf.mxu1 }
 0x254   : > { %v627_v32 = vsel %vm239_vm0, %v596_v31, -inf }
 0x255   : > { %628 = vmax.xlane.f32.xlu0 %v627_v32  ;;  %v1084_v33 = vpop.f32.mrf.mxu1 }
 0x256   : > { %v636_v39 = vsel %vm239_vm0, %v1084_v33, -inf }
 0x257   : > { %v599_v34 = vpop.f32.mrf.mxu1 }
 0x258   : > { %v630_v36 = vsel %vm239_vm0, %v599_v34, -inf }
 0x259   : > { %634 = vmax.xlane.f32.xlu0 %v633_v35  ;;  %631 = vmax.xlane.f32.xlu1 %v630_v36  ;;  %v1087_v37 = vpop.f32.mrf.mxu1 }
 0x25a   : > { %v645_v42 = vsel %vm239_vm0, %v1087_v37, -inf }
 0x25b   : > { %v612_v38 = vpop.f32.mrf.mxu1 }
 0x25c   : > { %v639_v44 = vsel %vm239_vm0, %v612_v38, -inf }
 0x25d   : > { %637 = vmax.xlane.f32.xlu0 %v636_v39  ;;  %v1088_v40 = vpop.f32.mrf.mxu1 }
 0x25e   : > { %v648_v45 = vsel %vm239_vm0, %v1088_v40, -inf }
 0x25f   : > { %v615_v41 = vpop.f32.mrf.mxu1 }
 0x260   : > { %v642_v43 = vsel %vm239_vm0, %v615_v41, -inf }
 0x261   : > { %646 = vmax.xlane.f32.xlu0 %v645_v42  ;;  %643 = vmax.xlane.f32.xlu1 %v642_v43 }
 0x265   : > { %640 = vmax.xlane.f32.xlu0 %v639_v44  ;;  %649 = vmax.xlane.f32.xlu1 %v648_v45  ;;  %v371_v44 = vsel %vm239_vm0, %v1292_v7, 0.0  ;;  %v374_v45 = vsel %vm239_vm0, %v1294_v8, 0.0  ;;  %v386_v7 = vsel %vm239_vm0, %v1309_v15, 0.0 }
 0x27b   : > { %703 = vrot.lane.b32.xlu0 %v1267_v0, %s1220_s23 }
 0x2de   : > { %v629_v46 = vpop.xlane.xlu0 %628 }
 0x2df   : > { %v651_v47 = vsub.f32 %v596_v31, %v629_v46  ;;  %v377_v46 = vsel %vm239_vm0, %v1290_v6, 0.0 }
 0x2e1   : > { %v659_v48 = vmul.f32 1.442695, %v651_v47  ;;  %v380_v47 = vsel %vm239_vm0, %v1305_v13, 0.0 }
 0x2e2   : > { %v635_v49 = vpop.xlane.xlu0 %634  ;;  %v632_v50 = vpop.xlane.xlu1 %631 }
 0x2e3   : > { %v653_v51 = vsub.f32 %v1083_v30, %v635_v49  ;;  %v652_v52 = vsub.f32 %v599_v34, %v632_v50  ;;  %1146 = vpow2.f32 %v659_v48 }
 0x2e5   : > { %v663_v53 = vmul.f32 1.442695, %v653_v51  ;;  %v661_v54 = vmul.f32 1.442695, %v652_v52 }
 0x2e6   : > { %v638_v55 = vpop.xlane.xlu0 %637 }
 0x2e7   : > { %1148 = vpow2.f32 %v663_v53  ;;  %v654_v56 = vsub.f32 %v1084_v33, %v638_v55 }
 0x2e8   : > { %1150 = vpow2.f32 %v661_v54 }
 0x2e9   : > { %v665_v57 = vmul.f32 1.442695, %v654_v56 }
 0x2ea   : > { %v647_v58 = vpop.xlane.xlu0 %646  ;;  %v644_v59 = vpop.xlane.xlu1 %643 }
 0x2eb   : > { %1152 = vpow2.f32 %v665_v57  ;;  %v657_v60 = vsub.f32 %v1087_v37, %v647_v58  ;;  %v656_v0 = vsub.f32 %v615_v41, %v644_v59  ;;  %v389_v37 = vsel %vm239_vm0, %v1303_v12, 0.0 }
 0x2ec   : > { %v368_v12 = vsel %vm239_vm0, %v1288_v5, 0.0  ;;  %v383_v5 = vsel %vm239_vm0, %v1307_v14, 0.0 }
 0x2ed   : > { %v671_v61 = vmul.f32 1.442695, %v657_v60  ;;  %v669_v62 = vmul.f32 1.442695, %v656_v0 }
 0x2ee   : > { %v641_v63 = vpop.xlane.xlu0 %640  ;;  %v650_v1 = vpop.xlane.xlu1 %649 }
 0x2ef   : > { %1154 = vpow2.f32 %v671_v61  ;;  %v655_v2 = vsub.f32 %v612_v38, %v641_v63  ;;  %v658_v3 = vsub.f32 %v1088_v40, %v650_v1 }
 0x2f0   : > { %1156 = vpow2.f32 %v669_v62  ;;  %v1147_v11 = vpop.eup %1146 }
 0x2f1   : > { %v667_v4 = vmul.f32 1.442695, %v655_v2  ;;  %v673_v9 = vmul.f32 1.442695, %v658_v3  ;;  %v675_v30 = vsel %vm239_vm0, %v1147_v11, 0.0 }
 0x2f2   : > { %v704_v10 = vpop.permute.xlu0 %703 }
 0x2f3   : > { %1158 = vpow2.f32 %v667_v4  ;;  %1089 = vmatprep.subr.bf16.mxu0 %v704_v10 }
 0x2f4   : > { %v1149_v16 = vpop.eup %1148  ;;  %1160 = vpow2.f32 %v673_v9  ;;  %1090 = vmatpush3.bf16.msra.mxu0 %v704_v10 }
 0x2f5   : > { %v1151_v17 = vpop.eup %1150  ;;  %v681_v18 = vsel %vm239_vm0, %v1149_v16, 0.0 }
 0x2f6   : > { %682 = vadd.xlane.f32.xlu1 %v681_v18  ;;  %v699_v19 = vpack.c.bf16 %v1151_v17, %v1147_v11  ;;  %v678_v38 = vsel %vm239_vm0, %v1151_v17, 0.0 }
 0x2f8   : > { %v1153_v20 = vpop.eup %1152  ;;  %1091 = vmatprep.mubr.msk.bf16.mxu0 %vm239_vm0, %v699_v19 }
 0x2f9   : > { %v700_v21 = vpack.c.bf16 %v1153_v20, %v1149_v16  ;;  %v684_v33 = vsel %vm239_vm0, %v1153_v20, 0.0 }
 0x2fa   : > { %676 = vadd.xlane.f32.xlu1 %v675_v30 }
 0x2fb   : > { %1092 = vmatmul.mubr.msk.bf16.vlgmr.msra.gmra.mxu0 %vm239_vm0, %v700_v21 }
 0x2fc   : > { %v1155_v31 = vpop.eup %1154 }
 0x2fd   : > { %v693_v32 = vsel %vm239_vm0, %v1155_v31, 0.0  ;;  %v1157_v34 = vpop.eup %1156 }
 0x2fe   : > { %694 = vadd.xlane.f32.xlu0 %v693_v32  ;;  %685 = vadd.xlane.f32.xlu1 %v684_v33  ;;  %v690_v42 = vsel %vm239_vm0, %v1157_v34, 0.0 }
 0x300   : > { %v1159_v35 = vpop.eup %1158 }
 0x301   : > { %v1161_v36 = vpop.eup %1160  ;;  %v701_v39 = vpack.c.bf16 %v1157_v34, %v1159_v35  ;;  %v687_v41 = vsel %vm239_vm0, %v1159_v35, 0.0 }
 0x302   : > { %390 = vadd.xlane.f32.xlu0 %v389_v37  ;;  %679 = vadd.xlane.f32.xlu1 %v678_v38  ;;  %v702_v40 = vpack.c.bf16 %v1161_v36, %v1155_v31  ;;  %v696_v43 = vsel %vm239_vm0, %v1161_v36, 0.0 }
 0x303   : > { %1095 = vmatprep.mubr.msk.bf16.mxu0 %vm239_vm0, %v701_v39 }
 0x304   : > { %1096 = vmatmul.mubr.msk.bf16.gmra.mxu0 %vm239_vm0, %v702_v40 }
 0x306   : > { %688 = vadd.xlane.f32.xlu1 %v687_v41 }
 0x30a   : > { %691 = vadd.xlane.f32.xlu1 %v690_v42 }
 0x30e   : > { %697 = vadd.xlane.f32.xlu1 %v696_v43 }
 0x312   : > { %369 = vadd.xlane.f32.xlu1 %v368_v12 }
 0x316   : > { %372 = vadd.xlane.f32.xlu1 %v371_v44 }
 0x31a   : > { %375 = vadd.xlane.f32.xlu1 %v374_v45 }
 0x31e   : > { %378 = vadd.xlane.f32.xlu1 %v377_v46 }
 0x322   : > { %381 = vadd.xlane.f32.xlu1 %v380_v47 }
 0x326   : > { %384 = vadd.xlane.f32.xlu1 %v383_v5 }
 0x32a   : > { %387 = vadd.xlane.f32.xlu1 %v386_v7 }
 0x37f   : > { %v683_v48 = vpop.xlane.xlu1 %682 }
 0x383   : > { %v677_v8 = vpop.xlane.xlu1 %676 }
 0x387   : > { %v695_v49 = vpop.xlane.xlu0 %694  ;;  %v686_v50 = vpop.xlane.xlu1 %685 }
 0x38b   : > { %v391_v51 = vpop.xlane.xlu0 %390  ;;  %v680_v6 = vpop.xlane.xlu1 %679 }
 0x38c   : > { %1162 = vrcp.f32 %v391_v51 }
 0x38f   : > { %v689_v52 = vpop.xlane.xlu1 %688 }
 0x393   : > { %v692_v53 = vpop.xlane.xlu1 %691 }
 0x397   : > { %v698_v13 = vpop.xlane.xlu1 %697 }
 0x399   : > { %v1163_v54 = vpop.eup %1162 }
 0x39a   : > { %v491_v55 = vmul.f32 %v1163_v54, %v1333_v28 }
 0x39b   : > { %v370_v14 = vpop.xlane.xlu1 %369 }
 0x39c   : > { %1164 = vrcp.f32 %v370_v14  ;;  %v1011_v15 = vpack.c.bf16 %v491_v55, %v491_v55 }
 0x39e   : > { %532 = vst.msk [vmem:[%s1380_s26 + $0x1c] sm:$0xf] %vm524_vm1, %v1011_v15 }
 0x39f   : > { %v373_v56 = vpop.xlane.xlu1 %372 }
 0x3a0   : > { %1166 = vrcp.f32 %v373_v56 }
 0x3a3   : > { %v376_v57 = vpop.xlane.xlu1 %375 }
 0x3a4   : > { %1168 = vrcp.f32 %v376_v57 }
 0x3a7   : > { %v379_v58 = vpop.xlane.xlu1 %378 }
 0x3a8   : > { %1170 = vrcp.f32 %v379_v58 }
 0x3a9   : > { %v1165_v28 = vpop.eup %1164 }
 0x3aa   : > { %v477_v59 = vmul.f32 %v1165_v28, %v1323_v23 }
 0x3ab   : > { %v382_v60 = vpop.xlane.xlu1 %381 }
 0x3ac   : > { %1172 = vrcp.f32 %v382_v60  ;;  %v1004_v0 = vpack.c.bf16 %v477_v59, %v477_v59 }
 0x3ad   : > { %v1167_v61 = vpop.eup %1166  ;;  %1174 = vrcp.f32 %v683_v48 }
 0x3ae   : > { %525 = vst.msk [vmem:[%s1380_s26] sm:$0xf] %vm524_vm1, %v1004_v0  ;;  %v479_v62 = vmul.f32 %v1167_v61, %v1327_v25  ;;  %1176 = vrcp.f32 %v677_v8 }
 0x3af   : > { %v385_v63 = vpop.xlane.xlu1 %384 }
 0x3b0   : > { %1178 = vrcp.f32 %v385_v63  ;;  %v1005_v1 = vpack.c.bf16 %v479_v62, %v479_v62 }
 0x3b1   : > { %v1169_v2 = vpop.eup %1168  ;;  %1180 = vrcp.f32 %v686_v50 }
 0x3b2   : > { %v481_v3 = vmul.f32 %v1169_v2, %v1321_v22  ;;  %526 = vst.msk [vmem:[%s1380_s26 + $0x4] sm:$0xf] %vm524_vm1, %v1005_v1  ;;  %1182 = vrcp.f32 %v680_v6 }
 0x3b3   : > { %v388_v23 = vpop.xlane.xlu1 %387 }
 0x3b4   : > { %1184 = vrcp.f32 %v388_v23  ;;  %v1006_v4 = vpack.c.bf16 %v481_v3, %v481_v3 }
 0x3b5   : > { %v1171_v9 = vpop.eup %1170  ;;  %1186 = vrcp.f32 %v689_v52 }
 0x3b6   : > { %527 = vst.msk [vmem:[%s1380_s26 + $0x8] sm:$0xf] %vm524_vm1, %v1006_v4  ;;  %v483_v25 = vmul.f32 %v1171_v9, %v1325_v24  ;;  %1188 = vrcp.f32 %v695_v49 }
 0x3b7   : > { %1190 = vrcp.f32 %v692_v53 }
 0x3b8   : > { %v1007_v10 = vpack.c.bf16 %v483_v25, %v483_v25  ;;  %1192 = vrcp.f32 %v698_v13 }
 0x3b9   : > { %v1173_v11 = vpop.eup %1172 }
 0x3ba   : > { %528 = vst.msk [vmem:[%s1380_s26 + $0xc] sm:$0xf] %vm524_vm1, %v1007_v10  ;;  %v485_v16 = vmul.f32 %v1173_v11, %v1331_v27  ;;  %v1175_v22 = vpop.eup %1174 }
 0x3bb   : > { %v1093_v17 = vpop.f32.mrf.mxu0  ;;  %v1177_v18 = vpop.eup %1176 }
 0x3bc   : > { %v788_v19 = vmul.f32 %v1175_v22, %v1093_v17  ;;  %v1008_v20 = vpack.c.bf16 %v485_v16, %v485_v16 }
 0x3bd   : > { %v1179_v21 = vpop.eup %1178  ;;  %v752_v30 = vpop.f32.mrf.mxu0 }
 0x3be   : > { %v1014_v31 = vpack.c.bf16 %v788_v19, %v788_v19  ;;  %v784_v32 = vmul.f32 %v1177_v18, %v752_v30  ;;  %529 = vst.msk [vmem:[%s1380_s26 + $0x10] sm:$0xf] %vm524_vm1, %v1008_v20  ;;  %v487_v24 = vmul.f32 %v1179_v21, %v1335_v29  ;;  %v1181_v33 = vpop.eup %1180 }
 0x3bf   : > { %v1094_v34 = vpop.f32.mrf.mxu0  ;;  %v1183_v27 = vpop.eup %1182 }
 0x3c0   : > { %827 = vrot.lane.b32.xlu1 %v1014_v31, %s1221_s27  ;;  %v1009_v35 = vpack.c.bf16 %v487_v24, %v487_v24  ;;  %v1012_v38 = vpack.c.bf16 %v784_v32, %v784_v32  ;;  %v790_v39 = vmul.f32 %v1181_v33, %v1094_v34 }
 0x3c1   : > { %v1185_v36 = vpop.eup %1184  ;;  %v755_v37 = vpop.f32.mrf.mxu0 }
 0x3c2   : > { %v786_v40 = vmul.f32 %v1183_v27, %v755_v37  ;;  %v489_v41 = vmul.f32 %v1185_v36, %v1329_v26  ;;  %530 = vst.msk [vmem:[%s1380_s26 + $0x14] sm:$0xf] %vm524_vm1, %v1009_v35  ;;  %v1187_v12 = vpop.eup %1186  ;;  %v1015_v44 = vpack.c.bf16 %v790_v39, %v790_v39 }
 0x3c3   : > { %v1189_v47 = vpop.eup %1188 }
 0x3c4   : > { %v1013_v42 = vpack.c.bf16 %v786_v40, %v786_v40  ;;  %v1097_v29 = vpop.f32.mrf.mxu0  ;;  %823 = vrot.lane.b32.xlu1 %v1012_v38, %s1221_s27  ;;  %v1010_v43 = vpack.c.bf16 %v489_v41, %v489_v41  ;;  %v1191_v48 = vpop.eup %1190 }
 0x3c5   : > { %v796_v26 = vmul.f32 %v1189_v47, %v1097_v29  ;;  %v1193_v50 = vpop.eup %1192 }
 0x3c6   : > { %v768_v45 = vpop.f32.mrf.mxu0  ;;  %825 = vrot.lane.b32.xlu0 %v1013_v42, %s1221_s27  ;;  %531 = vst.msk [vmem:[%s1380_s26 + $0x18] sm:$0xf] %vm524_vm1, %v1010_v43 }
 0x3c7   : > { %v792_v46 = vmul.f32 %v1187_v12, %v768_v45  ;;  %v1018_v51 = vpack.c.bf16 %v796_v26, %v796_v26 }
 0x3c8   : > { %v1098_v5 = vpop.f32.mrf.mxu0  ;;  %829 = vrot.lane.b32.xlu1 %v1015_v44, %s1221_s27 }
 0x3c9   : > { %v1016_v7 = vpack.c.bf16 %v792_v46, %v792_v46  ;;  %v798_v6 = vmul.f32 %v1193_v50, %v1098_v5 }
 0x3ca   : > { %v771_v8 = vpop.f32.mrf.mxu0 }
 0x3cb   : > { %v794_v49 = vmul.f32 %v1191_v48, %v771_v8  ;;  %831 = vrot.lane.b32.xlu0 %v1016_v7, %s1221_s27  ;;  %v1019_v53 = vpack.c.bf16 %v798_v6, %v798_v6 }
 0x3cd   : > { %v1017_v52 = vpack.c.bf16 %v794_v49, %v794_v49 }
 0x3cf   : > { %835 = vrot.lane.b32.xlu0 %v1018_v51, %s1221_s27  ;;  %833 = vrot.lane.b32.xlu1 %v1017_v52, %s1221_s27 }
 0x3d3   : > { %837 = vrot.lane.b32.xlu1 %v1019_v53, %s1221_s27 }
 0x432   : > { %v828_v13 = vpop.permute.xlu1 %827 }
 0x433   : > { %850 = vst.msk [vmem:[%s1380_s26 + $0x8] sm:$0xf] %vm847_vm2, %v828_v13 }
 0x436   : > { %v824_v54 = vpop.permute.xlu1 %823 }
 0x437   : > { %848 = vst.msk [vmem:[%s1380_s26] sm:$0xf] %vm847_vm2, %v824_v54 }
 0x438   : > { %v826_v55 = vpop.permute.xlu0 %825 }
 0x439   : > { %849 = vst.msk [vmem:[%s1380_s26 + $0x4] sm:$0xf] %vm847_vm2, %v826_v55 }
 0x43a   : > { %v830_v14 = vpop.permute.xlu1 %829 }
 0x43b   : > { %851 = vst.msk [vmem:[%s1380_s26 + $0xc] sm:$0xf] %vm847_vm2, %v830_v14 }
 0x43d   : > { %v832_v15 = vpop.permute.xlu0 %831 }
 0x43e   : > { %852 = vst.msk [vmem:[%s1380_s26 + $0x10] sm:$0xf] %vm847_vm2, %v832_v15 }
 0x441   : > { %v836_v56 = vpop.permute.xlu0 %835  ;;  %v834_v57 = vpop.permute.xlu1 %833 }
 0x442   : > { %854 = vst.msk [vmem:[%s1380_s26 + $0x18] sm:$0xf] %vm847_vm2, %v836_v56  ;;  %853 = vst.msk [vmem:[%s1380_s26 + $0x14] sm:$0xf] %vm847_vm2, %v834_v57 }
 0x445   : > { %v838_v58 = vpop.permute.xlu1 %837 }
 0x446   : > { %855 = vst.msk [vmem:[%s1380_s26 + $0x1c] sm:$0xf] %vm847_vm2, %v838_v58 }
 0x447 PF: > { %s12_s11 = sadd.s32 1, %s1216_s11   ;;  %s1441_s9 = smov %s1212_s10 }
 0x448   : > { %p9_p5 = scmp.ge.s32.totalorder %s12_s11, 4   ;;  %s1442_s10 = smov %s1444_s12 }
 0x44a   :  { %11 = sbr.rel (!%p9_p5) target bundleno = 2 (0x2), region = 61 }

// kernel: pvt_stage_forward.26
= control target key start
LH: loop header
LB: loop body
LE: loop exit
PB: predicated region body
PF: predicated region fallthrough
CT: control target
= control target key end

     0   :  { %s842_s1 = inlined_call_operand.vmem [shape: bf16[128,128], index: 1, kind: input, shape index: {}]   ;;  %s843_s0 = inlined_call_operand.vmem [shape: bf16[128,128], index: 0, kind: input, shape index: {}]   ;;  %s844_s2 = inlined_call_operand.vmem [shape: f32[1,128], index: 2, kind: input, shape index: {}]   ;;  %s845_s3 = inlined_call_operand.vmem [shape: bf16[128,128], index: 3, kind: input, shape index: {}]   ;;  %s846_s4 = inlined_call_operand.vmem [shape: bf16[128,128], index: 4, kind: output, shape index: {}]  }
   0x1   :  { %v684_v0 = vld [vmem:[%s842_s1 + $0x38] sm:$0xff]   ;;  %v685_v1 = vld [vmem:[%s842_s1 + $0x30] sm:$0xff]   ;;  %v686_v2 = vld [vmem:[%s842_s1 + $0x28] sm:$0xff]  }
   0x2   :  { %636 = vmatprep.subr.bf16.mxu0 %v684_v0  ;;  %668 = vmatprep.subr.bf16.mxu1 %v684_v0  ;;  %v687_v3 = vld [vmem:[%s842_s1 + $0x20] sm:$0xff]   ;;  %v688_v6 = vld [vmem:[%s842_s1 + $0x18] sm:$0xff]   ;;  %v689_v7 = vld [vmem:[%s842_s1 + $0x10] sm:$0xff]  }
   0x3   :  { %637 = vmatpush3.bf16.msra.mxu0 %v684_v0  ;;  %676 = vmatpush3.bf16.msra.mxu1 %v684_v0  ;;  %v692_v4 = vld [vmem:[%s843_s0] sm:$0xff]   ;;  %v690_v8 = vld [vmem:[%s842_s1 + $0x8] sm:$0xff]   ;;  %v696_v12 = vld [vmem:[%s843_s0 + $0x10] sm:$0xff]  }
   0x4   :  { %638 = vmatprep.subr.bf16.mxu0 %v685_v1  ;;  %669 = vmatprep.subr.bf16.mxu1 %v685_v1  ;;  %v693_v5 = vld [vmem:[%s843_s0 + $0x20] sm:$0xff]   ;;  %v694_v10 = vld [vmem:[%s843_s0 + $0x8] sm:$0xff]   ;;  %v697_v13 = vld [vmem:[%s843_s0 + $0x30] sm:$0xff]  }
   0x5   :  { %652 = vmatprep.mubr.bf16.mxu0 %v692_v4  ;;  %660 = vmatprep.mubr.bf16.mxu1 %v693_v5  ;;  %v691_v9 = vld [vmem:[%s842_s1] sm:$0xff]   ;;  %v695_v11 = vld [vmem:[%s843_s0 + $0x28] sm:$0xff]   ;;  %v698_v14 = vld [vmem:[%s843_s0 + $0x18] sm:$0xff]  }
   0x6   :  { %v699_v15 = vld [vmem:[%s843_s0 + $0x38] sm:$0xff]   ;;  %v776_v16 = vld [vmem:[%s844_s2] ss:$0 sm:$0xff]  ;;  %v606_v17 = vld [vmem:[%s845_s3 + $0x8] sm:$0xff]  }
   0x7   :  { %639 = vmatpush3.bf16.msra.mxu0 %v685_v1  ;;  %677 = vmatpush3.bf16.msra.mxu1 %v685_v1  ;;  %v610_v18 = vld [vmem:[%s845_s3 + $0x28] sm:$0xff]   ;;  %v535_v21 = vld [vmem:[%s845_s3] sm:$0xff]   ;;  %v540_v24 = vunpack.c.l.bf16 %v606_v17  ;;  %v541_v29 = vunpack.c.h.bf16 %v606_v17  ;;  %v608_v49 = vld [vmem:[%s845_s3 + $0x18] sm:$0xff]  }
   0x8   :  { %640 = vmatprep.subr.bf16.mxu0 %v686_v2  ;;  %670 = vmatprep.subr.bf16.mxu1 %v686_v2  ;;  %v609_v22 = vld [vmem:[%s845_s3 + $0x20] sm:$0xff]   ;;  %v556_v26 = vunpack.c.l.bf16 %v610_v18  ;;  %v557_v30 = vunpack.c.h.bf16 %v610_v18  ;;  %v536_v32 = vunpack.c.l.bf16 %v535_v21  ;;  %v537_v39 = vunpack.c.h.bf16 %v535_v21  ;;  %v612_v50 = vld [vmem:[%s845_s3 + $0x38] sm:$0xff]   ;;  %v607_v59 = vld [vmem:[%s845_s3 + $0x10] sm:$0xff]  }
   0x9   :  { %v552_v34 = vunpack.c.l.bf16 %v609_v22  ;;  %v553_v40 = vunpack.c.h.bf16 %v609_v22  ;;  %v611_v60 = vld [vmem:[%s845_s3 + $0x30] sm:$0xff]   ;;  %v548_v62 = vunpack.c.l.bf16 %v608_v49  ;;  %v564_v0 = vunpack.c.l.bf16 %v612_v50 }
   0xa   :  { %v549_v5 = vunpack.c.h.bf16 %v608_v49  ;;  %v561_v17 = vunpack.c.h.bf16 %v611_v60 }
   0xb   :  { %641 = vmatpush3.bf16.msra.mxu0 %v686_v2  ;;  %678 = vmatpush3.bf16.msra.mxu1 %v686_v2 }
   0xc   :  { %642 = vmatprep.subr.bf16.mxu0 %v687_v3  ;;  %671 = vmatprep.subr.bf16.mxu1 %v687_v3 }
   0xf   :  { %643 = vmatpush3.bf16.msra.mxu0 %v687_v3  ;;  %679 = vmatpush3.bf16.msra.mxu1 %v687_v3 }
  0x10   :  { %644 = vmatprep.subr.bf16.mxu0 %v688_v6  ;;  %672 = vmatprep.subr.bf16.mxu1 %v688_v6 }
  0x13   :  { %645 = vmatpush3.bf16.msra.mxu0 %v688_v6  ;;  %680 = vmatpush3.bf16.msra.mxu1 %v688_v6  ;;  %v565_v6 = vunpack.c.h.bf16 %v612_v50 }
  0x14   :  { %646 = vmatprep.subr.bf16.mxu0 %v689_v7  ;;  %673 = vmatprep.subr.bf16.mxu1 %v689_v7 }
  0x17   :  { %647 = vmatpush3.bf16.msra.mxu0 %v689_v7  ;;  %681 = vmatpush3.bf16.msra.mxu1 %v689_v7 }
  0x18   :  { %648 = vmatprep.subr.bf16.mxu0 %v690_v8  ;;  %674 = vmatprep.subr.bf16.mxu1 %v690_v8 }
  0x1b   :  { %649 = vmatpush3.bf16.msra.mxu0 %v690_v8  ;;  %682 = vmatpush3.bf16.msra.mxu1 %v690_v8  ;;  %v544_v8 = vunpack.c.l.bf16 %v607_v59 }
  0x1c   :  { %650 = vmatprep.subr.bf16.mxu0 %v691_v9  ;;  %675 = vmatprep.subr.bf16.mxu1 %v691_v9 }
  0x1f   :  { %651 = vmatpush3.bf16.msra.mxu0 %v691_v9  ;;  %683 = vmatpush3.bf16.msra.mxu1 %v691_v9 }
  0x22   :  { %653 = vmatmul.mubr.bf16.vlgmr.msra.gmra.mxu0 %v694_v10  ;;  %661 = vmatmul.mubr.bf16.vlgmr.msra.gmra.mxu1 %v695_v11  ;;  %v560_v10 = vunpack.c.l.bf16 %v611_v60 }
  0x23   :  { %656 = vmatprep.mubr.bf16.mxu0 %v696_v12  ;;  %664 = vmatprep.mubr.bf16.mxu1 %v697_v13 }
  0x2a   :  { %657 = vmatmul.mubr.bf16.gmra.mxu0 %v698_v14  ;;  %665 = vmatmul.mubr.bf16.gmra.mxu1 %v699_v15  ;;  %v545_v15 = vunpack.c.h.bf16 %v607_v59 }
  0xe2   :  { %v654_v19 = vpop.f32.mrf.mxu0  ;;  %v662_v20 = vpop.f32.mrf.mxu1 }
  0xe3   :  { %v339_v23 = vadd.f32 %v654_v19, %v776_v16  ;;  %v347_v25 = vadd.f32 %v662_v20, %v776_v16 }
  0xe4   :  { %v216_v27 = vpop.f32.mrf.mxu0  ;;  %v248_v28 = vpop.f32.mrf.mxu1 }
  0xe5   :  { %v337_v31 = vadd.f32 %v776_v16, %v216_v27  ;;  %v345_v33 = vadd.f32 %v776_v16, %v248_v28  ;;  %v387_v41 = vadd.f32 %v540_v24, %v339_v23  ;;  %v395_v42 = vadd.f32 %v556_v26, %v347_v25 }
  0xe6   :  { %v655_v35 = vpop.f32.mrf.mxu0  ;;  %v663_v36 = vpop.f32.mrf.mxu1 }
  0xe7   :  { %v340_v37 = vadd.f32 %v655_v35, %v776_v16  ;;  %v348_v38 = vadd.f32 %v663_v36, %v776_v16  ;;  %v385_v51 = vadd.f32 %v536_v32, %v337_v31  ;;  %v393_v52 = vadd.f32 %v552_v34, %v345_v33 }
  0xe8   :  { %v219_v43 = vpop.f32.mrf.mxu0  ;;  %v251_v44 = vpop.f32.mrf.mxu1 }
  0xe9   :  { %v388_v45 = vadd.f32 %v541_v29, %v340_v37  ;;  %v396_v46 = vadd.f32 %v557_v30, %v348_v38  ;;  %v338_v47 = vadd.f32 %v776_v16, %v219_v43  ;;  %v346_v48 = vadd.f32 %v776_v16, %v251_v44 }
  0xea   :  { %v658_v53 = vpop.f32.mrf.mxu0  ;;  %v666_v54 = vpop.f32.mrf.mxu1 }
  0xeb   :  { %v574_v55 = vpack.c.bf16 %v388_v45, %v387_v41  ;;  %v594_v56 = vpack.c.bf16 %v396_v46, %v395_v42  ;;  %v386_v57 = vadd.f32 %v537_v39, %v338_v47  ;;  %v394_v58 = vadd.f32 %v553_v40, %v346_v48 }
  0xec   :  { %v343_v61 = vadd.f32 %v658_v53, %v776_v16  ;;  %v351_v63 = vadd.f32 %v666_v54, %v776_v16  ;;  %v232_v1 = vpop.f32.mrf.mxu0  ;;  %v264_v2 = vpop.f32.mrf.mxu1 }
  0xed   :  { %613 = vst [vmem:[%s846_s4 + $0x8] sm:$0xff] %v574_v55   ;;  %617 = vst [vmem:[%s846_s4 + $0x28] sm:$0xff] %v594_v56   ;;  %v569_v3 = vpack.c.bf16 %v386_v57, %v385_v51  ;;  %v589_v4 = vpack.c.bf16 %v394_v58, %v393_v52  ;;  %v341_v7 = vadd.f32 %v776_v16, %v232_v1 }
  0xee   :  { %v349_v9 = vadd.f32 %v776_v16, %v264_v2  ;;  %v659_v11 = vpop.f32.mrf.mxu0  ;;  %v667_v12 = vpop.f32.mrf.mxu1  ;;  %v391_v18 = vadd.f32 %v548_v62, %v343_v61  ;;  %v399_v19 = vadd.f32 %v564_v0, %v351_v63 }
  0xef   :  { %570 = vst [vmem:[%s846_s4] sm:$0xff] %v569_v3   ;;  %616 = vst [vmem:[%s846_s4 + $0x20] sm:$0xff] %v589_v4   ;;  %v344_v13 = vadd.f32 %v659_v11, %v776_v16  ;;  %v352_v14 = vadd.f32 %v667_v12, %v776_v16  ;;  %v389_v26 = vadd.f32 %v544_v8, %v341_v7 }
  0xf0   :  { %v235_v20 = vpop.f32.mrf.mxu0  ;;  %v267_v21 = vpop.f32.mrf.mxu1  ;;  %v397_v27 = vadd.f32 %v560_v10, %v349_v9 }
  0xf1   :  { %v392_v22 = vadd.f32 %v549_v5, %v344_v13  ;;  %v400_v23 = vadd.f32 %v565_v6, %v352_v14  ;;  %v342_v24 = vadd.f32 %v776_v16, %v235_v20  ;;  %v350_v25 = vadd.f32 %v776_v16, %v267_v21 }
  0xf3   :  { %v584_v28 = vpack.c.bf16 %v392_v22, %v391_v18  ;;  %v604_v29 = vpack.c.bf16 %v400_v23, %v399_v19  ;;  %v390_v30 = vadd.f32 %v545_v15, %v342_v24  ;;  %v398_v31 = vadd.f32 %v561_v17, %v350_v25 }
  0xf5   :  { %615 = vst [vmem:[%s846_s4 + $0x18] sm:$0xff] %v584_v28   ;;  %619 = vst [vmem:[%s846_s4 + $0x38] sm:$0xff] %v604_v29   ;;  %v579_v32 = vpack.c.bf16 %v390_v30, %v389_v26  ;;  %v599_v33 = vpack.c.bf16 %v398_v31, %v397_v27 }
  0xf7   :  { %614 = vst [vmem:[%s846_s4 + $0x10] sm:$0xff] %v579_v32   ;;  %618 = vst [vmem:[%s846_s4 + $0x30] sm:$0xff] %v599_v33  }

// kernel: pvt_stage_forward.27
= control target key start
LH: loop header
LB: loop body
LE: loop exit
PB: predicated region body
PF: predicated region fallthrough
CT: control target
= control target key end

     0   :  { %v75_v0 = vlaneseq  ;;  %s1273_s0 = inlined_call_operand.vmem [shape: bf16[128,128], index: 0, kind: input, shape index: {}]   ;;  %s1274_s1 = inlined_call_operand.vmem [shape: bf16[128,128], index: 1, kind: input, shape index: {}]   ;;  %s1275_s3 = inlined_call_operand.vmem [shape: f32[1,128], index: 3, kind: input, shape index: {}]   ;;  %s1276_s4 = inlined_call_operand.vmem [shape: f32[1,128], index: 4, kind: input, shape index: {}]   ;;  %s1277_s2 = inlined_call_operand.vmem [shape: f32[1,128], index: 2, kind: input, shape index: {}]   ;;  %s1278_s5 = inlined_call_operand.vmem [shape: bf16[128,128], index: 5, kind: output, shape index: {}]  }
   0x1   :  { %v940_v1 = vld [vmem:[%s1273_s0] sm:$0xff]   ;;  %v957_v8 = vld [vmem:[%s1273_s0 + $0x8] sm:$0xff]   ;;  %v991_v20 = vld [vmem:[%s1273_s0 + $0x10] sm:$0xff]  }
   0x2   :  { %v945_v2 = vld [vmem:[%s1273_s0 + $0x20] sm:$0xff]   ;;  %v719_v3 = vunpack.c.l.bf16 %v940_v1  ;;  %v948_v4 = vand.u32 127, %v75_v0  ;;  %v720_v6 = vunpack.c.h.bf16 %v940_v1  ;;  %v723_v13 = vunpack.c.l.bf16 %v957_v8  ;;  %v976_v15 = vld [vmem:[%s1273_s0 + $0x28] sm:$0xff]   ;;  %v1006_v25 = vld [vmem:[%s1273_s0 + $0x30] sm:$0xff]  }
   0x3   :  { %v735_v5 = vunpack.c.l.bf16 %v945_v2  ;;  %v736_v7 = vunpack.c.h.bf16 %v945_v2  ;;  %v724_v14 = vunpack.c.h.bf16 %v957_v8  ;;  %v739_v18 = vunpack.c.l.bf16 %v976_v15  ;;  %v1021_v30 = vld [vmem:[%s1273_s0 + $0x18] sm:$0xff]  }
   0x4   :  { %vm77_vm0 = vcmp.lt.s32.totalorder %v948_v4, 32  ;;  %v740_v19 = vunpack.c.h.bf16 %v976_v15  ;;  %v727_v23 = vunpack.c.l.bf16 %v991_v20  ;;  %v728_v24 = vunpack.c.h.bf16 %v991_v20  ;;  %v1036_v35 = vld [vmem:[%s1273_s0 + $0x38] sm:$0xff]  }
   0x5   :  { %v78_v9 = vsel %vm77_vm0, %v719_v3, 0.0  ;;  %v86_v10 = vsel %vm77_vm0, %v735_v5, 0.0  ;;  %v79_v11 = vsel %vm77_vm0, %v720_v6, 0.0  ;;  %v87_v12 = vsel %vm77_vm0, %v736_v7, 0.0  ;;  %v871_v4 = vld [vmem:[%s1274_s1 + $0x18] sm:$0xff]  }
   0x6   :  { %94 = vadd.xlane.f32.xlu0 %v78_v9  ;;  %110 = vadd.xlane.f32.xlu1 %v86_v10  ;;  %v80_v16 = vsel %vm77_vm0, %v723_v13, 0.0  ;;  %v81_v17 = vsel %vm77_vm0, %v724_v14, 0.0  ;;  %v88_v21 = vsel %vm77_vm0, %v739_v18, 0.0  ;;  %v89_v22 = vsel %vm77_vm0, %v740_v19, 0.0 }
   0x7   :  { %v82_v26 = vsel %vm77_vm0, %v727_v23, 0.0  ;;  %v83_v27 = vsel %vm77_vm0, %v728_v24, 0.0  ;;  %v743_v28 = vunpack.c.l.bf16 %v1006_v25  ;;  %v744_v29 = vunpack.c.h.bf16 %v1006_v25 }
   0x8   :  { %v731_v33 = vunpack.c.l.bf16 %v1021_v30  ;;  %v732_v34 = vunpack.c.h.bf16 %v1021_v30  ;;  %v747_v38 = vunpack.c.l.bf16 %v1036_v35  ;;  %v748_v39 = vunpack.c.h.bf16 %v1036_v35 }
   0x9   :  { %v90_v31 = vsel %vm77_vm0, %v743_v28, 0.0  ;;  %v91_v32 = vsel %vm77_vm0, %v744_v29, 0.0 }
   0xa   :  { %96 = vadd.xlane.f32.xlu0 %v79_v11  ;;  %112 = vadd.xlane.f32.xlu1 %v87_v12  ;;  %v84_v36 = vsel %vm77_vm0, %v731_v33, 0.0  ;;  %v85_v37 = vsel %vm77_vm0, %v732_v34, 0.0  ;;  %v92_v40 = vsel %vm77_vm0, %v747_v38, 0.0  ;;  %v93_v41 = vsel %vm77_vm0, %v748_v39, 0.0 }
   0xe   :  { %98 = vadd.xlane.f32.xlu0 %v80_v16  ;;  %100 = vadd.xlane.f32.xlu1 %v81_v17 }
  0x12   :  { %114 = vadd.xlane.f32.xlu0 %v88_v21  ;;  %116 = vadd.xlane.f32.xlu1 %v89_v22 }
  0x16   :  { %102 = vadd.xlane.f32.xlu0 %v82_v26  ;;  %104 = vadd.xlane.f32.xlu1 %v83_v27 }
  0x1a   :  { %118 = vadd.xlane.f32.xlu0 %v90_v31  ;;  %120 = vadd.xlane.f32.xlu1 %v91_v32 }
  0x1e   :  { %106 = vadd.xlane.f32.xlu0 %v84_v36  ;;  %108 = vadd.xlane.f32.xlu1 %v85_v37 }
  0x22   :  { %122 = vadd.xlane.f32.xlu0 %v92_v40  ;;  %124 = vadd.xlane.f32.xlu1 %v93_v41 }
  0x8f   :  { %v95_v42 = vpop.xlane.xlu0 %94  ;;  %v111_v43 = vpop.xlane.xlu1 %110 }
  0x90   :  { %v127_v44 = vmul.f32 0.03125, %v95_v42  ;;  %v135_v45 = vmul.f32 0.03125, %v111_v43  ;;  %v867_v43 = vld [vmem:[%s1274_s1 + $0x38] sm:$0xff]  }
  0x91   :  { %819 = vmatprep.subr.bf16.mxu0 %v867_v43  ;;  %851 = vmatprep.subr.bf16.mxu1 %v867_v43 }
  0x92   :  { %v1056_v46 = vsub.f32 %v719_v3, %v127_v44  ;;  %v1058_v47 = vsub.f32 %v735_v5, %v135_v45  ;;  %820 = vmatpush3.bf16.msra.mxu0 %v867_v43  ;;  %859 = vmatpush3.bf16.msra.mxu1 %v867_v43 }
  0x93   :  { %v97_v48 = vpop.xlane.xlu0 %96  ;;  %v113_v49 = vpop.xlane.xlu1 %112 }
  0x94   :  { %v128_v50 = vmul.f32 0.03125, %v97_v48  ;;  %v136_v51 = vmul.f32 0.03125, %v113_v49  ;;  %v159_v52 = vsel %vm77_vm0, %v1056_v46, 0.0  ;;  %v167_v53 = vsel %vm77_vm0, %v1058_v47, 0.0 }
  0x95   :  { %v175_v54 = vmul.f32 %v159_v52, %v159_v52  ;;  %v183_v59 = vmul.f32 %v167_v53, %v167_v53  ;;  %v868_v53 = vld [vmem:[%s1274_s1 + $0x30] sm:$0xff]  }
  0x96   :  { %v1068_v55 = vsub.f32 %v720_v6, %v128_v50  ;;  %v1072_v56 = vsub.f32 %v736_v7, %v136_v51  ;;  %821 = vmatprep.subr.bf16.mxu0 %v868_v53  ;;  %852 = vmatprep.subr.bf16.mxu1 %v868_v53 }
  0x97   :  { %191 = vadd.xlane.f32.xlu0 %v175_v54  ;;  %v99_v57 = vpop.xlane.xlu0 %98  ;;  %v101_v58 = vpop.xlane.xlu1 %100  ;;  %822 = vmatpush3.bf16.msra.mxu0 %v868_v53 }
  0x98   :  { %v129_v60 = vmul.f32 0.03125, %v99_v57  ;;  %v130_v61 = vmul.f32 0.03125, %v101_v58  ;;  %v160_v62 = vsel %vm77_vm0, %v1068_v55, 0.0  ;;  %v168_v63 = vsel %vm77_vm0, %v1072_v56, 0.0  ;;  %860 = vmatpush3.bf16.msra.mxu1 %v868_v53  ;;  %v1191_v53 = vld [vmem:[%s1275_s3] ss:$0 sm:$0xff] }
  0x99   :  { %v176_v0 = vmul.f32 %v160_v62, %v160_v62  ;;  %v184_v6 = vmul.f32 %v168_v63, %v168_v63  ;;  %v869_v63 = vld [vmem:[%s1274_s1 + $0x28] sm:$0xff]  }
  0x9a   :  { %v1082_v1 = vsub.f32 %v723_v13, %v129_v60  ;;  %v1086_v2 = vsub.f32 %v724_v14, %v130_v61  ;;  %823 = vmatprep.subr.bf16.mxu0 %v869_v63  ;;  %853 = vmatprep.subr.bf16.mxu1 %v869_v63 }
  0x9b   :  { %207 = vadd.xlane.f32.xlu0 %v183_v59  ;;  %193 = vadd.xlane.f32.xlu1 %v176_v0  ;;  %v115_v3 = vpop.xlane.xlu0 %114  ;;  %v117_v5 = vpop.xlane.xlu1 %116 }
  0x9c   :  { %v137_v7 = vmul.f32 0.03125, %v115_v3  ;;  %v138_v9 = vmul.f32 0.03125, %v117_v5  ;;  %v161_v10 = vsel %vm77_vm0, %v1082_v1, 0.0  ;;  %v162_v11 = vsel %vm77_vm0, %v1086_v2, 0.0  ;;  %824 = vmatpush3.bf16.msra.mxu0 %v869_v63  ;;  %861 = vmatpush3.bf16.msra.mxu1 %v869_v63 }
  0x9d   :  { %v177_v12 = vmul.f32 %v161_v10, %v161_v10  ;;  %v178_v17 = vmul.f32 %v162_v11, %v162_v11 }
  0x9e   :  { %v1096_v8 = vsub.f32 %v739_v18, %v137_v7  ;;  %v1100_v13 = vsub.f32 %v740_v19, %v138_v9  ;;  %v873_v7 = vld [vmem:[%s1274_s1 + $0x8] sm:$0xff]   ;;  %v874_v9 = vld [vmem:[%s1274_s1] sm:$0xff]  }
  0x9f   :  { %209 = vadd.xlane.f32.xlu1 %v184_v6  ;;  %195 = vadd.xlane.f32.xlu0 %v177_v12  ;;  %v103_v14 = vpop.xlane.xlu0 %102  ;;  %v105_v16 = vpop.xlane.xlu1 %104  ;;  %v872_v6 = vld [vmem:[%s1274_s1 + $0x10] sm:$0xff]  }
  0xa0   :  { %v131_v21 = vmul.f32 0.03125, %v103_v14  ;;  %v132_v22 = vmul.f32 0.03125, %v105_v16  ;;  %v169_v26 = vsel %vm77_vm0, %v1096_v8, 0.0  ;;  %v170_v18 = vsel %vm77_vm0, %v1100_v13, 0.0 }
  0xa1   :  { %v185_v27 = vmul.f32 %v169_v26, %v169_v26  ;;  %v186_v36 = vmul.f32 %v170_v18, %v170_v18 }
  0xa2   :  { %v1110_v15 = vsub.f32 %v727_v23, %v131_v21  ;;  %v1114_v19 = vsub.f32 %v728_v24, %v132_v22 }
  0xa3   :  { %197 = vadd.xlane.f32.xlu1 %v178_v17  ;;  %211 = vadd.xlane.f32.xlu0 %v185_v27  ;;  %v119_v31 = vpop.xlane.xlu0 %118  ;;  %v121_v32 = vpop.xlane.xlu1 %120 }
  0xa4   :  { %v139_v37 = vmul.f32 0.03125, %v119_v31  ;;  %v140_v40 = vmul.f32 0.03125, %v121_v32  ;;  %v163_v41 = vsel %vm77_vm0, %v1110_v15, 0.0  ;;  %v164_v23 = vsel %vm77_vm0, %v1114_v19, 0.0 }
  0xa5   :  { %v179_v42 = vmul.f32 %v163_v41, %v163_v41  ;;  %v180_v48 = vmul.f32 %v164_v23, %v164_v23 }
  0xa6   :  { %v1124_v20 = vsub.f32 %v743_v28, %v139_v37  ;;  %v1128_v24 = vsub.f32 %v744_v29, %v140_v40 }
  0xa7   :  { %213 = vadd.xlane.f32.xlu1 %v186_v36  ;;  %199 = vadd.xlane.f32.xlu0 %v179_v42  ;;  %v107_v44 = vpop.xlane.xlu0 %106  ;;  %v109_v45 = vpop.xlane.xlu1 %108 }
  0xa8   :  { %v133_v49 = vmul.f32 0.03125, %v107_v44  ;;  %v134_v50 = vmul.f32 0.03125, %v109_v45  ;;  %v171_v28 = vsel %vm77_vm0, %v1124_v20, 0.0  ;;  %v172_v25 = vsel %vm77_vm0, %v1128_v24, 0.0 }
  0xa9   :  { %v187_v29 = vmul.f32 %v171_v28, %v171_v28  ;;  %v188_v58 = vmul.f32 %v172_v25, %v172_v25 }
  0xaa   :  { %v1141_v51 = vsub.f32 %v731_v33, %v133_v49  ;;  %v1145_v52 = vsub.f32 %v732_v34, %v134_v50 }
  0xab   :  { %201 = vadd.xlane.f32.xlu1 %v180_v48  ;;  %215 = vadd.xlane.f32.xlu0 %v187_v29  ;;  %v123_v54 = vpop.xlane.xlu0 %122  ;;  %v125_v57 = vpop.xlane.xlu1 %124 }
  0xac   :  { %v141_v59 = vmul.f32 0.03125, %v123_v54  ;;  %v142_v60 = vmul.f32 0.03125, %v125_v57  ;;  %v165_v33 = vsel %vm77_vm0, %v1141_v51, 0.0  ;;  %v166_v30 = vsel %vm77_vm0, %v1145_v52, 0.0 }
  0xad   :  { %v181_v34 = vmul.f32 %v165_v33, %v165_v33  ;;  %v182_v0 = vmul.f32 %v166_v30, %v166_v30 }
  0xae   :  { %v1158_v61 = vsub.f32 %v747_v38, %v141_v59  ;;  %v1162_v62 = vsub.f32 %v748_v39, %v142_v60  ;;  %v870_v39 = vld [vmem:[%s1274_s1 + $0x20] sm:$0xff]  }
  0xaf   :  { %217 = vadd.xlane.f32.xlu1 %v188_v58  ;;  %203 = vadd.xlane.f32.xlu0 %v181_v34 }
  0xb0   :  { %v173_v3 = vsel %vm77_vm0, %v1158_v61, 0.0  ;;  %v174_v38 = vsel %vm77_vm0, %v1162_v62, 0.0  ;;  %825 = vmatprep.subr.bf16.mxu0 %v870_v39  ;;  %854 = vmatprep.subr.bf16.mxu1 %v870_v39 }
  0xb1   :  { %v189_v35 = vmul.f32 %v173_v3, %v173_v3  ;;  %v190_v5 = vmul.f32 %v174_v38, %v174_v38  ;;  %826 = vmatpush3.bf16.msra.mxu0 %v870_v39  ;;  %862 = vmatpush3.bf16.msra.mxu1 %v870_v39  ;;  %v1198_v3 = vld [vmem:[%s1276_s4] ss:$0 sm:$0xff] }
  0xb2   :  { %827 = vmatprep.subr.bf16.mxu0 %v871_v4  ;;  %855 = vmatprep.subr.bf16.mxu1 %v871_v4 }
  0xb3   :  { %205 = vadd.xlane.f32.xlu1 %v182_v0  ;;  %219 = vadd.xlane.f32.xlu0 %v189_v35 }
  0xb5   :  { %828 = vmatpush3.bf16.msra.mxu0 %v871_v4  ;;  %863 = vmatpush3.bf16.msra.mxu1 %v871_v4 }
  0xb6   :  { %829 = vmatprep.subr.bf16.mxu0 %v872_v6  ;;  %856 = vmatprep.subr.bf16.mxu1 %v872_v6 }
  0xb7   :  { %221 = vadd.xlane.f32.xlu1 %v190_v5 }
  0xb9   :  { %830 = vmatpush3.bf16.msra.mxu0 %v872_v6  ;;  %864 = vmatpush3.bf16.msra.mxu1 %v872_v6 }
  0xba   :  { %831 = vmatprep.subr.bf16.mxu0 %v873_v7  ;;  %857 = vmatprep.subr.bf16.mxu1 %v873_v7 }
  0xbd   :  { %832 = vmatpush3.bf16.msra.mxu0 %v873_v7  ;;  %865 = vmatpush3.bf16.msra.mxu1 %v873_v7 }
  0xbe   :  { %833 = vmatprep.subr.bf16.mxu0 %v874_v9  ;;  %858 = vmatprep.subr.bf16.mxu1 %v874_v9 }
  0xc1   :  { %834 = vmatpush3.bf16.msra.mxu0 %v874_v9  ;;  %866 = vmatpush3.bf16.msra.mxu1 %v874_v9 }
 0x120   :  { %v192_v10 = vpop.xlane.xlu0 %191 }
 0x121   :  { %v223_v11 = vmul.f32 0.03125, %v192_v10 }
 0x123   :  { %v239_v12 = vadd.f32 1e-06, %v223_v11 }
 0x124   :  { %v194_v14 = vpop.xlane.xlu1 %193  ;;  %v208_v16 = vpop.xlane.xlu0 %207 }
 0x125   :  { %875 = vrsqrt.f32 %v239_v12  ;;  %v224_v17 = vmul.f32 0.03125, %v194_v14  ;;  %v231_v21 = vmul.f32 0.03125, %v208_v16 }
 0x127   :  { %v240_v22 = vadd.f32 1e-06, %v224_v17  ;;  %v247_v26 = vadd.f32 1e-06, %v231_v21 }
 0x128   :  { %v210_v18 = vpop.xlane.xlu1 %209  ;;  %v196_v27 = vpop.xlane.xlu0 %195 }
 0x129   :  { %877 = vrsqrt.f32 %v240_v22  ;;  %v232_v31 = vmul.f32 0.03125, %v210_v18  ;;  %v225_v32 = vmul.f32 0.03125, %v196_v27 }
 0x12a   :  { %879 = vrsqrt.f32 %v247_v26 }
 0x12b   :  { %v248_v36 = vadd.f32 1e-06, %v232_v31  ;;  %v241_v37 = vadd.f32 1e-06, %v225_v32 }
 0x12c   :  { %v198_v40 = vpop.xlane.xlu1 %197  ;;  %v212_v41 = vpop.xlane.xlu0 %211 }
 0x12d   :  { %881 = vrsqrt.f32 %v248_v36  ;;  %v226_v23 = vmul.f32 0.03125, %v198_v40  ;;  %v233_v42 = vmul.f32 0.03125, %v212_v41 }
 0x12e   :  { %883 = vrsqrt.f32 %v241_v37 }
 0x12f   :  { %v242_v43 = vadd.f32 1e-06, %v226_v23  ;;  %v249_v44 = vadd.f32 1e-06, %v233_v42 }
 0x130   :  { %v214_v45 = vpop.xlane.xlu1 %213  ;;  %v200_v48 = vpop.xlane.xlu0 %199 }
 0x131   :  { %885 = vrsqrt.f32 %v242_v43  ;;  %v234_v49 = vmul.f32 0.03125, %v214_v45  ;;  %v227_v50 = vmul.f32 0.03125, %v200_v48 }
 0x132   :  { %v876_v28 = vpop.eup %875  ;;  %887 = vrsqrt.f32 %v249_v44 }
 0x133   :  { %v250_v25 = vadd.f32 1e-06, %v234_v49  ;;  %v243_v29 = vadd.f32 1e-06, %v227_v50  ;;  %v271_v54 = vmul.f32 %v876_v28, %v1056_v46 }
 0x134   :  { %v202_v57 = vpop.xlane.xlu1 %201  ;;  %v216_v58 = vpop.xlane.xlu0 %215 }
 0x135   :  { %889 = vrsqrt.f32 %v250_v25  ;;  %v228_v59 = vmul.f32 0.03125, %v202_v57  ;;  %v235_v60 = vmul.f32 0.03125, %v216_v58  ;;  %v293_v30 = vmul.f32 %v1191_v53, %v271_v54 }
 0x136   :  { %v878_v33 = vpop.eup %877  ;;  %891 = vrsqrt.f32 %v243_v29 }
 0x137   :  { %v880_v34 = vpop.eup %879  ;;  %v244_v63 = vadd.f32 1e-06, %v228_v59  ;;  %v251_v0 = vadd.f32 1e-06, %v235_v60  ;;  %v272_v38 = vmul.f32 %v878_v33, %v1068_v55  ;;  %v315_v9 = vadd.f32 %v1198_v3, %v293_v30 }
 0x138   :  { %v218_v46 = vpop.xlane.xlu1 %217  ;;  %v204_v35 = vpop.xlane.xlu0 %203  ;;  %v279_v39 = vmul.f32 %v880_v34, %v1058_v47 }
 0x139   :  { %893 = vrsqrt.f32 %v244_v63  ;;  %v236_v5 = vmul.f32 0.03125, %v218_v46  ;;  %v229_v4 = vmul.f32 0.03125, %v204_v35  ;;  %v294_v6 = vmul.f32 %v1191_v53, %v272_v38 }
 0x13a   :  { %v882_v7 = vpop.eup %881  ;;  %895 = vrsqrt.f32 %v251_v0  ;;  %v301_v47 = vmul.f32 %v1191_v53, %v279_v39 }
 0x13b   :  { %v884_v10 = vpop.eup %883  ;;  %v252_v11 = vadd.f32 1e-06, %v236_v5  ;;  %v245_v12 = vadd.f32 1e-06, %v229_v4  ;;  %v316_v14 = vadd.f32 %v1198_v3, %v294_v6  ;;  %v280_v55 = vmul.f32 %v882_v7, %v1072_v56 }
 0x13c   :  { %v206_v16 = vpop.xlane.xlu1 %205  ;;  %v220_v17 = vpop.xlane.xlu0 %219  ;;  %v273_v21 = vmul.f32 %v884_v10, %v1082_v1  ;;  %v323_v23 = vadd.f32 %v1198_v3, %v301_v47 }
 0x13d   :  { %897 = vrsqrt.f32 %v252_v11  ;;  %v230_v22 = vmul.f32 0.03125, %v206_v16  ;;  %v237_v26 = vmul.f32 0.03125, %v220_v17  ;;  %v331_v18 = vpack.c.bf16 %v316_v14, %v315_v9 }
 0x13e   :  { %v886_v27 = vpop.eup %885  ;;  %899 = vrsqrt.f32 %v245_v12  ;;  %v302_v31 = vmul.f32 %v1191_v53, %v280_v55  ;;  %v295_v32 = vmul.f32 %v1191_v53, %v273_v21 }
 0x13f   :  { %v888_v36 = vpop.eup %887  ;;  %v246_v37 = vadd.f32 1e-06, %v230_v22  ;;  %v253_v40 = vadd.f32 1e-06, %v237_v26  ;;  %835 = vmatprep.mubr.bf16.mxu0 %v331_v18  ;;  %v274_v56 = vmul.f32 %v886_v27, %v1086_v2 }
 0x140   :  { %v222_v41 = vpop.xlane.xlu1 %221  ;;  %v324_v1 = vadd.f32 %v1198_v3, %v302_v31  ;;  %v281_v42 = vmul.f32 %v888_v36, %v1096_v8  ;;  %v317_v49 = vadd.f32 %v1198_v3, %v295_v32  ;;  %v684_v31 = vld [vmem:[%s1277_s2] ss:$0 sm:$0xff] }
 0x141   :  { %901 = vrsqrt.f32 %v246_v37  ;;  %v238_v43 = vmul.f32 0.03125, %v222_v41  ;;  %v296_v44 = vmul.f32 %v1191_v53, %v274_v56 }
 0x142   :  { %v890_v45 = vpop.eup %889  ;;  %903 = vrsqrt.f32 %v253_v40  ;;  %v335_v48 = vpack.c.bf16 %v324_v1, %v323_v23  ;;  %v303_v29 = vmul.f32 %v1191_v53, %v281_v42 }
 0x143   :  { %v892_v50 = vpop.eup %891  ;;  %v254_v28 = vadd.f32 1e-06, %v238_v43  ;;  %v318_v2 = vadd.f32 %v1198_v3, %v296_v44  ;;  %v282_v25 = vmul.f32 %v890_v45, %v1100_v13 }
 0x144   :  { %843 = vmatprep.mubr.bf16.mxu1 %v335_v48  ;;  %v275_v8 = vmul.f32 %v892_v50, %v1110_v15  ;;  %v325_v60 = vadd.f32 %v1198_v3, %v303_v29 }
 0x145   :  { %905 = vrsqrt.f32 %v254_v28  ;;  %v332_v54 = vpack.c.bf16 %v318_v2, %v317_v49  ;;  %v304_v57 = vmul.f32 %v1191_v53, %v282_v25 }
 0x146   :  { %v894_v58 = vpop.eup %893  ;;  %v297_v13 = vmul.f32 %v1191_v53, %v275_v8 }
 0x147   :  { %v896_v59 = vpop.eup %895  ;;  %836 = vmatmul.mubr.bf16.vlgmr.msra.gmra.mxu0 %v332_v54  ;;  %v326_v33 = vadd.f32 %v1198_v3, %v304_v57  ;;  %v276_v30 = vmul.f32 %v894_v58, %v1114_v19 }
 0x148   :  { %v283_v34 = vmul.f32 %v896_v59, %v1124_v20  ;;  %v319_v46 = vadd.f32 %v1198_v3, %v297_v13 }
 0x149   :  { %v336_v63 = vpack.c.bf16 %v326_v33, %v325_v60  ;;  %v298_v15 = vmul.f32 %v1191_v53, %v276_v30 }
 0x14a   :  { %v898_v0 = vpop.eup %897  ;;  %v305_v5 = vmul.f32 %v1191_v53, %v283_v34 }
 0x14b   :  { %v900_v38 = vpop.eup %899  ;;  %844 = vmatmul.mubr.bf16.vlgmr.msra.gmra.mxu1 %v336_v63  ;;  %v320_v35 = vadd.f32 %v1198_v3, %v298_v15  ;;  %v284_v39 = vmul.f32 %v898_v0, %v1128_v24 }
 0x14c   :  { %v277_v19 = vmul.f32 %v900_v38, %v1141_v51  ;;  %v327_v9 = vadd.f32 %v1198_v3, %v305_v5 }
 0x14d   :  { %v333_v4 = vpack.c.bf16 %v320_v35, %v319_v46  ;;  %v306_v6 = vmul.f32 %v1191_v53, %v284_v39 }
 0x14e   :  { %v902_v20 = vpop.eup %901  ;;  %v299_v12 = vmul.f32 %v1191_v53, %v277_v19 }
 0x14f   :  { %v904_v7 = vpop.eup %903  ;;  %839 = vmatprep.mubr.bf16.mxu0 %v333_v4  ;;  %v328_v10 = vadd.f32 %v1198_v3, %v306_v6  ;;  %v278_v11 = vmul.f32 %v902_v20, %v1145_v52 }
 0x150   :  { %v285_v24 = vmul.f32 %v904_v7, %v1158_v61  ;;  %v321_v16 = vadd.f32 %v1198_v3, %v299_v12 }
 0x151   :  { %v337_v14 = vpack.c.bf16 %v328_v10, %v327_v9  ;;  %v300_v55 = vmul.f32 %v1191_v53, %v278_v11 }
 0x152   :  { %v906_v51 = vpop.eup %905  ;;  %v307_v21 = vmul.f32 %v1191_v53, %v285_v24 }
 0x153   :  { %847 = vmatprep.mubr.bf16.mxu1 %v337_v14  ;;  %v322_v17 = vadd.f32 %v1198_v3, %v300_v55  ;;  %v286_v47 = vmul.f32 %v906_v51, %v1162_v62 }
 0x154   :  { %v329_v26 = vadd.f32 %v1198_v3, %v307_v21 }
 0x155   :  { %v334_v22 = vpack.c.bf16 %v322_v17, %v321_v16  ;;  %v308_v52 = vmul.f32 %v1191_v53, %v286_v47 }
 0x157   :  { %840 = vmatmul.mubr.bf16.gmra.mxu0 %v334_v22  ;;  %v330_v61 = vadd.f32 %v1198_v3, %v308_v52 }
 0x159   :  { %v338_v18 = vpack.c.bf16 %v330_v61, %v329_v26 }
 0x15b   :  { %848 = vmatmul.mubr.bf16.gmra.mxu1 %v338_v18 }
 0x207   :  { %v837_v27 = vpop.f32.mrf.mxu0 }
 0x208   :  { %v576_v37 = vadd.f32 %v837_v27, %v684_v31 }
 0x209   :  { %v453_v32 = vpop.f32.mrf.mxu0 }
 0x20a   :  { %v574_v53 = vadd.f32 %v684_v31, %v453_v32 }
 0x20b   :  { %v838_v36 = vpop.f32.mrf.mxu0  ;;  %v845_v62 = vpop.f32.mrf.mxu1 }
 0x20c   :  { %v577_v40 = vadd.f32 %v838_v36, %v684_v31  ;;  %v584_v3 = vadd.f32 %v845_v62, %v684_v31 }
 0x20d   :  { %v456_v56 = vpop.f32.mrf.mxu0  ;;  %v485_v41 = vpop.f32.mrf.mxu1 }
 0x20e   :  { %v757_v23 = vpack.c.bf16 %v577_v40, %v576_v37  ;;  %v575_v1 = vadd.f32 %v684_v31, %v456_v56  ;;  %v582_v48 = vadd.f32 %v684_v31, %v485_v41 }
 0x20f   :  { %v846_v42 = vpop.f32.mrf.mxu1 }
 0x210   :  { %796 = vst [vmem:[%s1278_s5 + $0x8] sm:$0xff] %v757_v23   ;;  %v752_v43 = vpack.c.bf16 %v575_v1, %v574_v53  ;;  %v585_v44 = vadd.f32 %v846_v42, %v684_v31 }
 0x211   :  { %v488_v45 = vpop.f32.mrf.mxu1 }
 0x212   :  { %753 = vst [vmem:[%s1278_s5] sm:$0xff] %v752_v43   ;;  %v777_v49 = vpack.c.bf16 %v585_v44, %v584_v3  ;;  %v583_v50 = vadd.f32 %v684_v31, %v488_v45 }
 0x214   :  { %800 = vst [vmem:[%s1278_s5 + $0x28] sm:$0xff] %v777_v49   ;;  %v772_v28 = vpack.c.bf16 %v583_v50, %v582_v48 }
 0x216   :  { %799 = vst [vmem:[%s1278_s5 + $0x20] sm:$0xff] %v772_v28  }
 0x217   :  { %v841_v2 = vpop.f32.mrf.mxu0 }
 0x218   :  { %v580_v54 = vadd.f32 %v841_v2, %v684_v31 }
 0x219   :  { %v469_v25 = vpop.f32.mrf.mxu0 }
 0x21a   :  { %v578_v60 = vadd.f32 %v684_v31, %v469_v25 }
 0x21b   :  { %v842_v29 = vpop.f32.mrf.mxu0  ;;  %v849_v8 = vpop.f32.mrf.mxu1 }
 0x21c   :  { %v581_v57 = vadd.f32 %v842_v29, %v684_v31  ;;  %v588_v34 = vadd.f32 %v849_v8, %v684_v31 }
 0x21d   :  { %v472_v58 = vpop.f32.mrf.mxu0  ;;  %v501_v59 = vpop.f32.mrf.mxu1 }
 0x21e   :  { %v767_v33 = vpack.c.bf16 %v581_v57, %v580_v54  ;;  %v579_v30 = vadd.f32 %v684_v31, %v472_v58  ;;  %v586_v38 = vadd.f32 %v684_v31, %v501_v59 }
 0x21f   :  { %v850_v13 = vpop.f32.mrf.mxu1 }
 0x220   :  { %798 = vst [vmem:[%s1278_s5 + $0x18] sm:$0xff] %v767_v33   ;;  %v762_v63 = vpack.c.bf16 %v579_v30, %v578_v60  ;;  %v589_v15 = vadd.f32 %v850_v13, %v684_v31 }
 0x221   :  { %v504_v0 = vpop.f32.mrf.mxu1 }
 0x222   :  { %797 = vst [vmem:[%s1278_s5 + $0x10] sm:$0xff] %v762_v63   ;;  %v787_v46 = vpack.c.bf16 %v589_v15, %v588_v34  ;;  %v587_v35 = vadd.f32 %v684_v31, %v504_v0 }
 0x224   :  { %802 = vst [vmem:[%s1278_s5 + $0x38] sm:$0xff] %v787_v46   ;;  %v782_v39 = vpack.c.bf16 %v587_v35, %v586_v38 }
 0x226   :  { %801 = vst [vmem:[%s1278_s5 + $0x30] sm:$0xff] %v782_v39  }

// kernel: pvt_stage_forward.39
= control target key start
LH: loop header
LB: loop body
LE: loop exit
PB: predicated region body
PF: predicated region fallthrough
CT: control target
= control target key end

     0   :  { %vm49_vm0 = vcmask 261120   ;;  %s741_s0 = inlined_call_operand.vmem [shape: bf16[128,32], index: 0, kind: input, shape index: {}]   ;;  %s742_s1 = inlined_call_operand.vmem [shape: f32[1,32], index: 1, kind: input, shape index: {}]   ;;  %s743_s2 = inlined_call_operand.vmem [shape: f32[1,32], index: 2, kind: input, shape index: {}]   ;;  %s744_s3 = inlined_call_operand.hbm [shape: f32[128,32], index: 3, kind: output, shape index: {}]  }
   0x1   :  { %v459_v0 = vld [vmem:[%s741_s0] sm:$0xff]   ;;  %v464_v1 = vld [vmem:[%s741_s0 + $0x8] sm:$0xff]   ;;  %v473_v6 = vld [vmem:[%s741_s0 + $0x10] sm:$0xff]  }
   0x2   :  { %v339_v2 = vunpack.c.l.bf16 %v459_v0  ;;  %v343_v3 = vunpack.c.l.bf16 %v464_v1  ;;  %v340_v4 = vunpack.c.h.bf16 %v459_v0  ;;  %v344_v5 = vunpack.c.h.bf16 %v464_v1 }
   0x3   :  { %8 = vsyncpa [#allocation3], 0  ;;  %v347_v11 = vunpack.c.l.bf16 %v473_v6  ;;  %v348_v12 = vunpack.c.h.bf16 %v473_v6  ;;  %v488_v13 = vld [vmem:[%s741_s0 + $0x18] sm:$0xff]   ;;  %v501_v18 = vld [vmem:[%s741_s0 + $0x20] sm:$0xff]  }
   0x4   :  { %v50_v7 = vsel %vm49_vm0, %v339_v2, 0.0  ;;  %v56_v8 = vsel %vm49_vm0, %v343_v3, 0.0  ;;  %v53_v9 = vsel %vm49_vm0, %v340_v4, 0.0  ;;  %v59_v10 = vsel %vm49_vm0, %v344_v5, 0.0  ;;  %v514_v23 = vld [vmem:[%s741_s0 + $0x28] sm:$0xff]   ;;  %v527_v28 = vld [vmem:[%s741_s0 + $0x30] sm:$0xff]  }
   0x5   :  { %51 = vadd.xlane.f32.xlu0 %v50_v7  ;;  %57 = vadd.xlane.f32.xlu1 %v56_v8  ;;  %v62_v14 = vsel %vm49_vm0, %v347_v11, 0.0  ;;  %v65_v15 = vsel %vm49_vm0, %v348_v12, 0.0  ;;  %v351_v16 = vunpack.c.l.bf16 %v488_v13  ;;  %v352_v17 = vunpack.c.h.bf16 %v488_v13  ;;  %v540_v33 = vld [vmem:[%s741_s0 + $0x38] sm:$0xff]  }
   0x6   :  { %v355_v21 = vunpack.c.l.bf16 %v501_v18  ;;  %v356_v22 = vunpack.c.h.bf16 %v501_v18  ;;  %v359_v26 = vunpack.c.l.bf16 %v514_v23  ;;  %v360_v27 = vunpack.c.h.bf16 %v514_v23 }
   0x7   :  { %v68_v19 = vsel %vm49_vm0, %v351_v16, 0.0  ;;  %v71_v20 = vsel %vm49_vm0, %v352_v17, 0.0  ;;  %v363_v31 = vunpack.c.l.bf16 %v527_v28  ;;  %v364_v32 = vunpack.c.h.bf16 %v527_v28 }
   0x8   :  { %v74_v24 = vsel %vm49_vm0, %v355_v21, 0.0  ;;  %v77_v25 = vsel %vm49_vm0, %v356_v22, 0.0  ;;  %v80_v29 = vsel %vm49_vm0, %v359_v26, 0.0  ;;  %v83_v30 = vsel %vm49_vm0, %v360_v27, 0.0 }
   0x9   :  { %54 = vadd.xlane.f32.xlu0 %v53_v9  ;;  %60 = vadd.xlane.f32.xlu1 %v59_v10  ;;  %v86_v34 = vsel %vm49_vm0, %v363_v31, 0.0  ;;  %v89_v35 = vsel %vm49_vm0, %v364_v32, 0.0  ;;  %v367_v36 = vunpack.c.l.bf16 %v540_v33  ;;  %v368_v37 = vunpack.c.h.bf16 %v540_v33 }
   0xb   :  { %v92_v38 = vsel %vm49_vm0, %v367_v36, 0.0  ;;  %v95_v39 = vsel %vm49_vm0, %v368_v37, 0.0 }
   0xd   :  { %63 = vadd.xlane.f32.xlu0 %v62_v14  ;;  %66 = vadd.xlane.f32.xlu1 %v65_v15 }
  0x11   :  { %69 = vadd.xlane.f32.xlu0 %v68_v19  ;;  %72 = vadd.xlane.f32.xlu1 %v71_v20 }
  0x15   :  { %75 = vadd.xlane.f32.xlu0 %v74_v24  ;;  %78 = vadd.xlane.f32.xlu1 %v77_v25 }
  0x19   :  { %81 = vadd.xlane.f32.xlu0 %v80_v29  ;;  %84 = vadd.xlane.f32.xlu1 %v83_v30 }
  0x1d   :  { %87 = vadd.xlane.f32.xlu0 %v86_v34  ;;  %90 = vadd.xlane.f32.xlu1 %v89_v35 }
  0x21   :  { %93 = vadd.xlane.f32.xlu0 %v92_v38  ;;  %96 = vadd.xlane.f32.xlu1 %v95_v39 }
  0x8e   :  { %v52_v40 = vpop.xlane.xlu0 %51  ;;  %v58_v41 = vpop.xlane.xlu1 %57 }
  0x8f   :  { %v99_v42 = vmul.f32 0.03125, %v52_v40  ;;  %v101_v43 = vmul.f32 0.03125, %v58_v41 }
  0x91   :  { %v556_v44 = vsub.f32 %v339_v2, %v99_v42  ;;  %v558_v45 = vsub.f32 %v343_v3, %v101_v43 }
  0x92   :  { %v55_v46 = vpop.xlane.xlu0 %54  ;;  %v61_v47 = vpop.xlane.xlu1 %60 }
  0x93   :  { %v100_v48 = vmul.f32 0.03125, %v55_v46  ;;  %v102_v49 = vmul.f32 0.03125, %v61_v47  ;;  %v131_v50 = vmul.f32 %v556_v44, %v556_v44  ;;  %v133_v51 = vmul.f32 %v558_v45, %v558_v45 }
  0x95   :  { %v566_v52 = vsub.f32 %v340_v4, %v100_v48  ;;  %v570_v53 = vsub.f32 %v344_v5, %v102_v49  ;;  %v147_v54 = vsel %vm49_vm0, %v131_v50, 0.0  ;;  %v153_v57 = vsel %vm49_vm0, %v133_v51, 0.0 }
  0x96   :  { %148 = vadd.xlane.f32.xlu0 %v147_v54  ;;  %v64_v55 = vpop.xlane.xlu0 %63  ;;  %v67_v56 = vpop.xlane.xlu1 %66 }
  0x97   :  { %v103_v58 = vmul.f32 0.03125, %v64_v55  ;;  %v104_v59 = vmul.f32 0.03125, %v67_v56  ;;  %v132_v60 = vmul.f32 %v566_v52, %v566_v52  ;;  %v134_v61 = vmul.f32 %v570_v53, %v570_v53 }
  0x99   :  { %v580_v62 = vsub.f32 %v347_v11, %v103_v58  ;;  %v584_v63 = vsub.f32 %v348_v12, %v104_v59  ;;  %v150_v0 = vsel %vm49_vm0, %v132_v60, 0.0  ;;  %v156_v3 = vsel %vm49_vm0, %v134_v61, 0.0 }
  0x9a   :  { %154 = vadd.xlane.f32.xlu0 %v153_v57  ;;  %151 = vadd.xlane.f32.xlu1 %v150_v0  ;;  %v70_v1 = vpop.xlane.xlu0 %69  ;;  %v73_v2 = vpop.xlane.xlu1 %72 }
  0x9b   :  { %v105_v4 = vmul.f32 0.03125, %v70_v1  ;;  %v106_v5 = vmul.f32 0.03125, %v73_v2  ;;  %v135_v7 = vmul.f32 %v580_v62, %v580_v62  ;;  %v136_v8 = vmul.f32 %v584_v63, %v584_v63 }
  0x9d   :  { %v594_v6 = vsub.f32 %v351_v16, %v105_v4  ;;  %v598_v9 = vsub.f32 %v352_v17, %v106_v5  ;;  %v159_v10 = vsel %vm49_vm0, %v135_v7, 0.0  ;;  %v162_v14 = vsel %vm49_vm0, %v136_v8, 0.0 }
  0x9e   :  { %157 = vadd.xlane.f32.xlu1 %v156_v3  ;;  %160 = vadd.xlane.f32.xlu0 %v159_v10  ;;  %v76_v11 = vpop.xlane.xlu0 %75  ;;  %v79_v12 = vpop.xlane.xlu1 %78 }
  0x9f   :  { %v107_v15 = vmul.f32 0.03125, %v76_v11  ;;  %v108_v19 = vmul.f32 0.03125, %v79_v12  ;;  %v137_v20 = vmul.f32 %v594_v6, %v594_v6  ;;  %v138_v16 = vmul.f32 %v598_v9, %v598_v9 }
  0xa1   :  { %v608_v13 = vsub.f32 %v355_v21, %v107_v15  ;;  %v612_v17 = vsub.f32 %v356_v22, %v108_v19  ;;  %v165_v24 = vsel %vm49_vm0, %v137_v20, 0.0  ;;  %v168_v30 = vsel %vm49_vm0, %v138_v16, 0.0 }
  0xa2   :  { %163 = vadd.xlane.f32.xlu1 %v162_v14  ;;  %166 = vadd.xlane.f32.xlu0 %v165_v24  ;;  %v82_v25 = vpop.xlane.xlu0 %81  ;;  %v85_v29 = vpop.xlane.xlu1 %84 }
  0xa3   :  { %v109_v34 = vmul.f32 0.03125, %v82_v25  ;;  %v110_v35 = vmul.f32 0.03125, %v85_v29  ;;  %v139_v38 = vmul.f32 %v608_v13, %v608_v13  ;;  %v140_v21 = vmul.f32 %v612_v17, %v612_v17 }
  0xa5   :  { %v622_v18 = vsub.f32 %v359_v26, %v109_v34  ;;  %v626_v22 = vsub.f32 %v360_v27, %v110_v35  ;;  %v171_v39 = vsel %vm49_vm0, %v139_v38, 0.0  ;;  %v174_v42 = vsel %vm49_vm0, %v140_v21, 0.0 }
  0xa6   :  { %169 = vadd.xlane.f32.xlu1 %v168_v30  ;;  %172 = vadd.xlane.f32.xlu0 %v171_v39  ;;  %v88_v40 = vpop.xlane.xlu0 %87  ;;  %v91_v41 = vpop.xlane.xlu1 %90  ;;  %v667_v39 = vld [vmem:[%s742_s1] ss:$0 sm:$0xff]  ;;  %s433_s1 = smov [#allocation2]  }
  0xa7   :  { %v111_v43 = vmul.f32 0.03125, %v88_v40  ;;  %v112_v46 = vmul.f32 0.03125, %v91_v41  ;;  %v141_v47 = vmul.f32 %v622_v18, %v622_v18  ;;  %v142_v26 = vmul.f32 %v626_v22, %v626_v22 }
  0xa9   :  { %v636_v23 = vsub.f32 %v363_v31, %v111_v43  ;;  %v640_v27 = vsub.f32 %v364_v32, %v112_v46  ;;  %v177_v48 = vsel %vm49_vm0, %v141_v47, 0.0  ;;  %v180_v51 = vsel %vm49_vm0, %v142_v26, 0.0  ;;  %v673_v43 = vld [vmem:[%s743_s2] ss:$0 sm:$0xff]  ;;  %s324_s2 = sshll.u32 %s433_s1, 4  ;;  %s325_s2 = int_to_ptr.vmem [resolvable:$true] %s324_s2 }
  0xaa   :  { %175 = vadd.xlane.f32.xlu1 %v174_v42  ;;  %178 = vadd.xlane.f32.xlu0 %v177_v48  ;;  %v94_v49 = vpop.xlane.xlu0 %93  ;;  %v97_v50 = vpop.xlane.xlu1 %96  ;;  %s411_s4 = scalar_lea.vmem %s325_s2, 2048  ;;  %p416_p1 = scmp.lt.s32.totalorder %s325_s2, %s325_s2 }
  0xab   :  { %v113_v54 = vmul.f32 0.03125, %v94_v49  ;;  %v114_v55 = vmul.f32 0.03125, %v97_v50  ;;  %v143_v56 = vmul.f32 %v636_v23, %v636_v23  ;;  %v144_v31 = vmul.f32 %v640_v27, %v640_v27  ;;  %p412_p0 = scmp.ne.s32.totalorder %s325_s2, %s411_s4  ;;  %p417_p2 = scmp.lt.s32.totalorder %s411_s4, %s411_s4 }
  0xad   :  { %v650_v28 = vsub.f32 %v367_v36, %v113_v54  ;;  %v654_v32 = vsub.f32 %v368_v37, %v114_v55  ;;  %v183_v57 = vsel %vm49_vm0, %v143_v56, 0.0  ;;  %v186_v58 = vsel %vm49_vm0, %v144_v31, 0.0  ;;  %p418_p3 = por %p417_p2, %p416_p1 }
  0xae   :  { %181 = vadd.xlane.f32.xlu1 %v180_v51  ;;  %184 = vadd.xlane.f32.xlu0 %v183_v57 }
  0xaf   :  { %v145_v59 = vmul.f32 %v650_v28, %v650_v28  ;;  %v146_v60 = vmul.f32 %v654_v32, %v654_v32  ;;  %p419_p4 = pnand %p418_p3, %p412_p0 }
  0xb1   :  { %v189_v61 = vsel %vm49_vm0, %v145_v59, 0.0  ;;  %v192_v33 = vsel %vm49_vm0, %v146_v60, 0.0 }
  0xb2   :  { %187 = vadd.xlane.f32.xlu1 %v186_v58  ;;  %190 = vadd.xlane.f32.xlu0 %v189_v61 }
  0xb6   :  { %193 = vadd.xlane.f32.xlu1 %v192_v33 }
 0x11f   :  { %v149_v36 = vpop.xlane.xlu0 %148 }
 0x120   :  { %v195_v37 = vmul.f32 0.03125, %v149_v36 }
 0x122   :  { %v211_v0 = vadd.f32 1e-06, %v195_v37 }
 0x123   :  { %v152_v1 = vpop.xlane.xlu1 %151  ;;  %v155_v2 = vpop.xlane.xlu0 %154 }
 0x124   :  { %379 = vrsqrt.f32 %v211_v0  ;;  %v196_v3 = vmul.f32 0.03125, %v152_v1  ;;  %v197_v4 = vmul.f32 0.03125, %v155_v2 }
 0x126   :  { %v212_v5 = vadd.f32 1e-06, %v196_v3  ;;  %v213_v7 = vadd.f32 1e-06, %v197_v4 }
 0x127   :  { %v158_v8 = vpop.xlane.xlu1 %157  ;;  %v161_v10 = vpop.xlane.xlu0 %160 }
 0x128   :  { %381 = vrsqrt.f32 %v212_v5  ;;  %v198_v11 = vmul.f32 0.03125, %v158_v8  ;;  %v199_v12 = vmul.f32 0.03125, %v161_v10 }
 0x129   :  { %383 = vrsqrt.f32 %v213_v7 }
 0x12a   :  { %v214_v14 = vadd.f32 1e-06, %v198_v11  ;;  %v215_v15 = vadd.f32 1e-06, %v199_v12 }
 0x12b   :  { %v164_v19 = vpop.xlane.xlu1 %163  ;;  %v167_v20 = vpop.xlane.xlu0 %166 }
 0x12c   :  { %385 = vrsqrt.f32 %v214_v14  ;;  %v200_v16 = vmul.f32 0.03125, %v164_v19  ;;  %v201_v24 = vmul.f32 0.03125, %v167_v20 }
 0x12d   :  { %387 = vrsqrt.f32 %v215_v15 }
 0x12e   :  { %v216_v25 = vadd.f32 1e-06, %v200_v16  ;;  %v217_v29 = vadd.f32 1e-06, %v201_v24 }
 0x12f   :  { %v170_v30 = vpop.xlane.xlu1 %169  ;;  %v173_v34 = vpop.xlane.xlu0 %172 }
 0x130   :  { %389 = vrsqrt.f32 %v216_v25  ;;  %v202_v35 = vmul.f32 0.03125, %v170_v30  ;;  %v203_v38 = vmul.f32 0.03125, %v173_v34 }
 0x131   :  { %v380_v21 = vpop.eup %379  ;;  %391 = vrsqrt.f32 %v217_v29 }
 0x132   :  { %v243_v40 = vmul.f32 %v380_v21, %v556_v44  ;;  %v218_v41 = vadd.f32 1e-06, %v202_v35  ;;  %v219_v42 = vadd.f32 1e-06, %v203_v38 }
 0x133   :  { %v176_v46 = vpop.xlane.xlu1 %175  ;;  %v179_v47 = vpop.xlane.xlu0 %178 }
 0x134   :  { %v265_v26 = vmul.f32 %v667_v39, %v243_v40  ;;  %393 = vrsqrt.f32 %v218_v41  ;;  %v204_v48 = vmul.f32 0.03125, %v176_v46  ;;  %v205_v49 = vmul.f32 0.03125, %v179_v47 }
 0x135   :  { %v382_v50 = vpop.eup %381  ;;  %395 = vrsqrt.f32 %v219_v42 }
 0x136   :  { %v384_v51 = vpop.eup %383  ;;  %v287_v54 = vadd.f32 %v673_v43, %v265_v26  ;;  %v244_v44 = vmul.f32 %v382_v50, %v566_v52  ;;  %v220_v55 = vadd.f32 1e-06, %v204_v48  ;;  %v221_v56 = vadd.f32 1e-06, %v205_v49 }
 0x137   :  { %v245_v31 = vmul.f32 %v384_v51, %v558_v45  ;;  %v182_v57 = vpop.xlane.xlu1 %181  ;;  %v185_v58 = vpop.xlane.xlu0 %184 }
 0x138   :  { %303 = vst.msk [vmem:[#allocation2] sm:$0xff] %vm49_vm0, %v287_v54  ;;  %v266_v59 = vmul.f32 %v667_v39, %v244_v44  ;;  %397 = vrsqrt.f32 %v220_v55  ;;  %v206_v60 = vmul.f32 0.03125, %v182_v57  ;;  %v207_v61 = vmul.f32 0.03125, %v185_v58 }
 0x139   :  { %v386_v33 = vpop.eup %385  ;;  %v267_v36 = vmul.f32 %v667_v39, %v245_v31  ;;  %399 = vrsqrt.f32 %v221_v56 }
 0x13a   :  { %v388_v37 = vpop.eup %387  ;;  %v288_v52 = vadd.f32 %v673_v43, %v266_v59  ;;  %v246_v0 = vmul.f32 %v386_v33, %v570_v53  ;;  %v222_v1 = vadd.f32 1e-06, %v206_v60  ;;  %v223_v45 = vadd.f32 1e-06, %v207_v61 }
 0x13b   :  { %v289_v2 = vadd.f32 %v673_v43, %v267_v36  ;;  %v247_v3 = vmul.f32 %v388_v37, %v580_v62  ;;  %v188_v4 = vpop.xlane.xlu1 %187  ;;  %v191_v5 = vpop.xlane.xlu0 %190 }
 0x13c   :  { %304 = vst.msk [vmem:[#allocation2 + $0x8] sm:$0xff] %vm49_vm0, %v288_v52  ;;  %v268_v7 = vmul.f32 %v667_v39, %v246_v0  ;;  %401 = vrsqrt.f32 %v222_v1  ;;  %v208_v8 = vmul.f32 0.03125, %v188_v4  ;;  %v209_v10 = vmul.f32 0.03125, %v191_v5 }
 0x13d   :  { %v390_v11 = vpop.eup %389  ;;  %305 = vst.msk [vmem:[#allocation2 + $0x10] sm:$0xff] %vm49_vm0, %v289_v2  ;;  %v269_v53 = vmul.f32 %v667_v39, %v247_v3  ;;  %403 = vrsqrt.f32 %v223_v45 }
 0x13e   :  { %v392_v12 = vpop.eup %391  ;;  %v290_v14 = vadd.f32 %v673_v43, %v268_v7  ;;  %v248_v62 = vmul.f32 %v390_v11, %v584_v63  ;;  %v224_v15 = vadd.f32 1e-06, %v208_v8  ;;  %v225_v19 = vadd.f32 1e-06, %v209_v10 }
 0x13f   :  { %v291_v20 = vadd.f32 %v673_v43, %v269_v53  ;;  %v249_v16 = vmul.f32 %v392_v12, %v594_v6  ;;  %v194_v24 = vpop.xlane.xlu1 %193 }
 0x140   :  { %306 = vst.msk [vmem:[#allocation2 + $0x18] sm:$0xff] %vm49_vm0, %v290_v14  ;;  %v270_v25 = vmul.f32 %v667_v39, %v248_v62  ;;  %405 = vrsqrt.f32 %v224_v15  ;;  %v210_v29 = vmul.f32 0.03125, %v194_v24 }
 0x141   :  { %v394_v30 = vpop.eup %393  ;;  %307 = vst.msk [vmem:[#allocation2 + $0x20] sm:$0xff] %vm49_vm0, %v291_v20  ;;  %v271_v34 = vmul.f32 %v667_v39, %v249_v16  ;;  %407 = vrsqrt.f32 %v225_v19 }
 0x142   :  { %v396_v63 = vpop.eup %395  ;;  %v292_v35 = vadd.f32 %v673_v43, %v270_v25  ;;  %v250_v38 = vmul.f32 %v394_v30, %v598_v9  ;;  %v226_v21 = vadd.f32 1e-06, %v210_v29 }
 0x143   :  { %v293_v6 = vadd.f32 %v673_v43, %v271_v34  ;;  %v251_v40 = vmul.f32 %v396_v63, %v608_v13 }
 0x144   :  { %308 = vst.msk [vmem:[#allocation2 + $0x28] sm:$0xff] %vm49_vm0, %v292_v35  ;;  %v272_v41 = vmul.f32 %v667_v39, %v250_v38  ;;  %409 = vrsqrt.f32 %v226_v21 }
 0x145   :  { %v398_v42 = vpop.eup %397  ;;  %309 = vst.msk [vmem:[#allocation2 + $0x30] sm:$0xff] %vm49_vm0, %v293_v6  ;;  %v273_v46 = vmul.f32 %v667_v39, %v251_v40 }
 0x146   :  { %v400_v47 = vpop.eup %399  ;;  %v294_v26 = vadd.f32 %v673_v43, %v272_v41  ;;  %v252_v9 = vmul.f32 %v398_v42, %v612_v17 }
 0x147   :  { %v295_v48 = vadd.f32 %v673_v43, %v273_v46  ;;  %v253_v49 = vmul.f32 %v400_v47, %v622_v18 }
 0x148   :  { %310 = vst.msk [vmem:[#allocation2 + $0x38] sm:$0xff] %vm49_vm0, %v294_v26  ;;  %v274_v13 = vmul.f32 %v667_v39, %v252_v9 }
 0x149   :  { %v402_v50 = vpop.eup %401  ;;  %311 = vst.msk [vmem:[#allocation2 + $0x40] sm:$0xff] %vm49_vm0, %v295_v48  ;;  %v275_v51 = vmul.f32 %v667_v39, %v253_v49 }
 0x14a   :  { %v404_v54 = vpop.eup %403  ;;  %v296_v44 = vadd.f32 %v673_v43, %v274_v13  ;;  %v254_v55 = vmul.f32 %v402_v50, %v626_v22 }
 0x14b   :  { %v297_v17 = vadd.f32 %v673_v43, %v275_v51  ;;  %v255_v56 = vmul.f32 %v404_v54, %v636_v23 }
 0x14c   :  { %312 = vst.msk [vmem:[#allocation2 + $0x48] sm:$0xff] %vm49_vm0, %v296_v44  ;;  %v276_v18 = vmul.f32 %v667_v39, %v254_v55 }
 0x14d   :  { %v406_v31 = vpop.eup %405  ;;  %313 = vst.msk [vmem:[#allocation2 + $0x50] sm:$0xff] %vm49_vm0, %v297_v17  ;;  %v277_v57 = vmul.f32 %v667_v39, %v255_v56 }
 0x14e   :  { %v408_v58 = vpop.eup %407  ;;  %v298_v59 = vadd.f32 %v673_v43, %v276_v18  ;;  %v256_v60 = vmul.f32 %v406_v31, %v640_v27 }
 0x14f   :  { %v299_v22 = vadd.f32 %v673_v43, %v277_v57  ;;  %v257_v61 = vmul.f32 %v408_v58, %v650_v28 }
 0x150   :  { %314 = vst.msk [vmem:[#allocation2 + $0x58] sm:$0xff] %vm49_vm0, %v298_v59  ;;  %v278_v23 = vmul.f32 %v667_v39, %v256_v60 }
 0x151   :  { %v410_v33 = vpop.eup %409  ;;  %315 = vst.msk [vmem:[#allocation2 + $0x60] sm:$0xff] %vm49_vm0, %v299_v22  ;;  %v279_v36 = vmul.f32 %v667_v39, %v257_v61 }
 0x152   :  { %v300_v37 = vadd.f32 %v673_v43, %v278_v23  ;;  %v258_v52 = vmul.f32 %v410_v33, %v654_v32 }
 0x153   :  { %v301_v0 = vadd.f32 %v673_v43, %v279_v36 }
 0x154   :  { %316 = vst.msk [vmem:[#allocation2 + $0x68] sm:$0xff] %vm49_vm0, %v300_v37  ;;  %v280_v27 = vmul.f32 %v667_v39, %v258_v52 }
 0x155   :  { %317 = vst.msk [vmem:[#allocation2 + $0x70] sm:$0xff] %vm49_vm0, %v301_v0 }
 0x156   :  { %v302_v28 = vadd.f32 %v673_v43, %v280_v27 }
 0x158   :  { %318 = vst.msk [vmem:[#allocation2 + $0x78] sm:$0xff] %vm49_vm0, %v302_v28 }
 0x159   :  { %422 = shalt.err (!%p419_p4)
}
 0x15a   :  { %s434_s5 = smov 128   ;;  %s435_s6 = smov 8  }
 0x15b   :  { %330 = dma.vmem_to_hbm [thread:$0]  %s325_s2, 2048, %s744_s3, [#allocation3], %s434_s5, %s434_s5, %s435_s6  }
 0x15c   :  { %431 = dma.done.wait [#allocation3], 2048  }
 0x15d   :  { %432 = vsyncadd [#allocation3], 4294965248 }
 0x15e   :  { %334 = vsyncpa [#allocation3], 1 }

// kernel: pvt_stage_forward.28
= control target key start
LH: loop header
LB: loop body
LE: loop exit
PB: predicated region body
PF: predicated region fallthrough
CT: control target
= control target key end

     0   :  { %s1133_s12 = smov 0   ;;  %s1135_s13 = smov 0   ;;  %s1554_s0 = inlined_call_operand.vmem [shape: bf16[2,10,10,128], index: 0, kind: input, shape index: {}]   ;;  %s1555_s1 = inlined_call_operand.vmem [shape: f32[3,3,128], index: 1, kind: input, shape index: {}]   ;;  %s1556_s2 = inlined_call_operand.vmem [shape: f32[1,1,128], index: 2, kind: input, shape index: {}]   ;;  %s1557_s3 = inlined_call_operand.vmem [shape: bf16[2,8,8,128], index: 3, kind: output, shape index: {}]  }
   0x1   :  { %s1137_s14 = smov 0  }
   0x2 LB: > { %s25_s15 = sadd.s32 1, %s1107_s13  ;;  %p1017_p0 = scmp.ge.s32.totalorder %s1111_s14, 1  ;;  %s1111_s14 = sphi %s1137_s14, %s13_s14   ;;  %s1107_s13 = sphi %s1135_s13, %s1570_s13   ;;  %s1103_s12 = sphi %s1133_s12, %s1569_s12  }
   0x3   : > { %p27_p1 = scmp.ge.s32.totalorder %s25_s15, 2  ;;  %p173_p2 = scmp.lt.s32.totalorder %s1111_s14, 3 }
   0x5   : > { %s1572_s15 = smov (%p27_p1, %s25_s15), 0  ;;  %p174_p3 = pnand %p1017_p0, %p173_p2 }
   0x7   : > { %177 = sbr.rel (%p174_p3) target bundleno = 147 (0x93), region = 32 }
   0xc   : > { %p210_p4 = scmp.lt.s32.totalorder %s1103_s12, 1  ;;  %v280_v0 = vlaneseq  ;;  %v233_v2 = vld [vmem:[%s1555_s1] sm:$0x7]  ;;  %v234_v3 = vld [vmem:[%s1555_s1 + $0x4] sm:$0x7]  ;;  %vm336_vm0 = vcmask 1046528  }
   0xd   : > { %v1163_v4 = vld [vmem:[%s1555_s1 + $0x8] sm:$0x7]  ;;  %vm413_vm1 = vcmask 1045504  }
   0xe   : > { %s1574_s12 = smov (!%p210_p4, %s1103_s12), 1  ;;  %v281_v1 = vshrl.u32 %v280_v0, 7  ;;  %1562 = vst [vmem:[#allocation2_spill] sm:$0xff] %v1163_v4 }
   0xf   : > { %s1048_s20 = smul.u32 80, %s1574_s12  ;;  %s1024_s28 = sshll.u32 %s1574_s12, 5 }
  0x10   : > { %v282_v5 = vsub.s32 0, %v281_v1  ;;  %v302_v6 = vsub.s32 1, %v281_v1  ;;  %v1165_v7 = vsub.s32 2, %v281_v1  ;;  %s232_s4 = scalar_lea.vmem %s1557_s3, %s1024_s28 }
  0x11   : > { %s1170_s25 = scalar_lea.vmem %s1554_s0, %s1048_s20 }
  0x12   : > { %1563 = vst [vmem:[#allocation3_spill] sm:$0xff] %v1165_v7  ;;  %v283_v8 = vrot.slane %v233_v2, %v282_v5  ;;  %v1172_v9 = vrot.slane %v233_v2, %v302_v6  ;;  %v1175_v10 = vrot.slane %v233_v2, %v1165_v7  ;;  %v240_v11 = vld [vmem:[%s1170_s25] ss:$8 sps:$4 sm:$0xff]   ;;  %v1179_v12 = vld [vmem:[%s1170_s25 + $0x4] sm:$0x1]  ;;  %v1182_v14 = vrot.slane %v234_v3, %v282_v5 }
  0x13   : > { %v243_v13 = vld [vmem:[%s1170_s25 + $0xc] sm:$0x1]  ;;  %v1184_v15 = vrot.slane %v234_v3, %v302_v6  ;;  %v1187_v16 = vrot.slane %v234_v3, %v1165_v7  ;;  %v1190_v17 = vrot.slane %v1163_v4, %v282_v5  ;;  %v244_v18 = vld [vmem:[%s1170_s25 + $0x10] ss:$8 sps:$4 sm:$0xff]   ;;  %v245_v19 = vld [vmem:[%s1170_s25 + $0x14] sm:$0x1]  ;;  %v1195_v21 = vunpack.c.l.bf16 %v240_v11 }
  0x14   : > { %v247_v20 = vld [vmem:[%s1170_s25 + $0x1c] sm:$0x1]  ;;  %v1558_v22 = vunpack.c.l.bf16 %v1179_v12  ;;  %v1198_v23 = vunpack.c.h.bf16 %v240_v11  ;;  %v1201_v24 = vrot.slane %v1163_v4, %v302_v6  ;;  %v248_v25 = vld [vmem:[%s1170_s25 + $0x20] ss:$8 sps:$4 sm:$0xff]   ;;  %v249_v26 = vld [vmem:[%s1170_s25 + $0x24] sm:$0x1]  ;;  %v1206_v28 = vunpack.c.l.bf16 %v243_v13 }
  0x15   : > { %v251_v27 = vld [vmem:[%s1170_s25 + $0x2c] sm:$0x1]  ;;  %v1208_v29 = vunpack.c.l.bf16 %v244_v18  ;;  %v1210_v30 = vunpack.c.l.bf16 %v245_v19  ;;  %v1212_v31 = vunpack.c.h.bf16 %v244_v18  ;;  %v252_v32 = vld [vmem:[%s1170_s25 + $0x30] ss:$8 sps:$4 sm:$0xff]   ;;  %v253_v33 = vld [vmem:[%s1170_s25 + $0x34] sm:$0x1]  ;;  %v1217_v35 = vunpack.c.l.bf16 %v247_v20 }
  0x16   : > { %1564 = vst [vmem:[#allocation4_spill] sm:$0xff] %v1201_v24  ;;  %v255_v34 = vld [vmem:[%s1170_s25 + $0x3c] sm:$0x1]  ;;  %v1219_v36 = vunpack.c.l.bf16 %v248_v25  ;;  %v1221_v37 = vunpack.c.l.bf16 %v249_v26  ;;  %v1223_v38 = vunpack.c.h.bf16 %v248_v25  ;;  %v256_v39 = vld [vmem:[%s1170_s25 + $0x40] ss:$8 sps:$4 sm:$0xff]   ;;  %v1227_v41 = vunpack.c.l.bf16 %v251_v27 }
  0x17   : > { %v257_v40 = vld [vmem:[%s1170_s25 + $0x44] sm:$0x1]  ;;  %v1229_v42 = vunpack.c.l.bf16 %v252_v32  ;;  %v1231_v43 = vunpack.c.l.bf16 %v253_v33  ;;  %v1233_v44 = vunpack.c.h.bf16 %v252_v32  ;;  %v1235_v45 = vunpack.c.l.bf16 %v255_v34 }
  0x18   : > { %v1237_v46 = vunpack.c.l.bf16 %v256_v39  ;;  %v1239_v47 = vunpack.c.l.bf16 %v257_v40  ;;  %v1241_v48 = vunpack.c.h.bf16 %v256_v39  ;;  %v284_v49 = vmul.f32 %v283_v8, %v1195_v21 }
  0x19   : > { %v285_v50 = vmul.f32 %v283_v8, %v1198_v23  ;;  %v286_v51 = vmul.f32 %v283_v8, %v1208_v29  ;;  %v287_v52 = vmul.f32 %v283_v8, %v1212_v31  ;;  %v288_v53 = vmul.f32 %v283_v8, %v1219_v36 }
  0x1a   : > { %v289_v54 = vmul.f32 %v283_v8, %v1223_v38  ;;  %v290_v55 = vmul.f32 %v283_v8, %v1229_v42  ;;  %v291_v56 = vmul.f32 %v283_v8, %v1233_v44  ;;  %v304_v57 = vmul.f32 %v1172_v9, %v1195_v21 }
  0x1b   : > { %v305_v58 = vmul.f32 %v1172_v9, %v1558_v22  ;;  %v306_v59 = vmul.f32 %v1172_v9, %v1198_v23  ;;  %v307_v60 = vmul.f32 %v1172_v9, %v1206_v28  ;;  %v308_v61 = vmul.f32 %v1172_v9, %v1208_v29 }
  0x1c   : > { %v309_v62 = vmul.f32 %v1172_v9, %v1210_v30  ;;  %v310_v63 = vmul.f32 %v1172_v9, %v1212_v31  ;;  %v311_v0 = vmul.f32 %v1172_v9, %v1217_v35  ;;  %v312_v1 = vmul.f32 %v1172_v9, %v1219_v36 }
  0x1d   : > { %v313_v2 = vmul.f32 %v1172_v9, %v1221_v37  ;;  %v314_v3 = vmul.f32 %v1172_v9, %v1223_v38  ;;  %v315_v5 = vmul.f32 %v1172_v9, %v1227_v41  ;;  %v316_v6 = vmul.f32 %v1172_v9, %v1229_v42 }
  0x1e   : > { %v317_v8 = vmul.f32 %v1172_v9, %v1231_v43  ;;  %v318_v11 = vmul.f32 %v1172_v9, %v1233_v44  ;;  %v319_v13 = vmul.f32 %v1172_v9, %v1235_v45  ;;  %v337_v18 = vrot.slane %v304_v57, 1 }
  0x1f   : > { %v338_v19 = vrot.slane %v305_v58, 1  ;;  %v340_v20 = vrot.slane %v306_v59, 1  ;;  %v341_v25 = vrot.slane %v307_v60, 1  ;;  %v343_v26 = vrot.slane %v308_v61, 1 }
  0x20   : > { %v344_v27 = vrot.slane %v309_v62, 1  ;;  %v346_v32 = vrot.slane %v310_v63, 1  ;;  %v347_v33 = vrot.slane %v311_v0, 1  ;;  %v349_v40 = vrot.slane %v312_v1, 1 }
  0x21   : > { %v339_v34 = vsel %vm336_vm0, %v337_v18, %v338_v19  ;;  %v342_v39 = vsel %vm336_vm0, %v340_v20, %v341_v25  ;;  %v350_v22 = vrot.slane %v313_v2, 1  ;;  %v352_v24 = vrot.slane %v314_v3, 1 }
  0x22   : > { %v345_v4 = vsel %vm336_vm0, %v343_v26, %v344_v27  ;;  %v348_v7 = vsel %vm336_vm0, %v346_v32, %v347_v33  ;;  %v353_v9 = vrot.slane %v315_v5, 1  ;;  %v355_v58 = vrot.slane %v316_v6, 1 }
  0x23   : > { %v351_v57 = vsel %vm336_vm0, %v349_v40, %v350_v22  ;;  %v356_v59 = vrot.slane %v317_v8, 1  ;;  %v358_v60 = vrot.slane %v318_v11, 1  ;;  %v359_v62 = vrot.slane %v319_v13, 1 }
  0x24   : > { %v354_v61 = vsel %vm336_vm0, %v352_v24, %v353_v9  ;;  %v369_v63 = vadd.f32 %v339_v34, %v284_v49  ;;  %v370_v0 = vadd.f32 %v342_v39, %v285_v50  ;;  %v371_v2 = vadd.f32 %v345_v4, %v286_v51 }
  0x25   : > { %v357_v1 = vsel %vm336_vm0, %v355_v58, %v356_v59  ;;  %v372_v18 = vadd.f32 %v348_v7, %v287_v52  ;;  %v373_v19 = vadd.f32 %v351_v57, %v288_v53  ;;  %v360_v20 = vsel %vm336_vm0, %v358_v60, %v359_v62 }
  0x26   : > { %v374_v3 = vadd.f32 %v354_v61, %v289_v54  ;;  %v375_v5 = vadd.f32 %v357_v1, %v290_v55  ;;  %v381_v22 = vmul.f32 %v1175_v10, %v1195_v21  ;;  %v376_v6 = vadd.f32 %v360_v20, %v291_v56 }
  0x27   : > { %v1565_v8 = vunpack.c.l.bf16 %v1179_v12  ;;  %v383_v49 = vmul.f32 %v1175_v10, %v1198_v23  ;;  %v384_v4 = vmul.f32 %v1175_v10, %v1206_v28  ;;  %v385_v7 = vmul.f32 %v1175_v10, %v1208_v29 }
  0x28   : > { %v386_v50 = vmul.f32 %v1175_v10, %v1210_v30  ;;  %v387_v21 = vmul.f32 %v1175_v10, %v1212_v31  ;;  %v388_v12 = vmul.f32 %v1175_v10, %v1217_v35  ;;  %v389_v51 = vmul.f32 %v1175_v10, %v1219_v36 }
  0x29   : > { %v382_v24 = vmul.f32 %v1175_v10, %v1565_v8  ;;  %v390_v52 = vmul.f32 %v1175_v10, %v1221_v37  ;;  %v391_v53 = vmul.f32 %v1175_v10, %v1223_v38  ;;  %v392_v54 = vmul.f32 %v1175_v10, %v1227_v41 }
  0x2a   : > { %v393_v55 = vmul.f32 %v1175_v10, %v1229_v42  ;;  %v394_v56 = vmul.f32 %v1175_v10, %v1231_v43  ;;  %v395_v11 = vmul.f32 %v1175_v10, %v1233_v44  ;;  %v396_v13 = vmul.f32 %v1175_v10, %v1235_v45 }
  0x2b   : > { %v414_v25 = vrot.slane %v381_v22, 2  ;;  %v415_v26 = vrot.slane %v382_v24, 2  ;;  %v417_v27 = vrot.slane %v383_v49, 2  ;;  %v418_v32 = vrot.slane %v384_v4, 2 }
  0x2c   : > { %v420_v33 = vrot.slane %v385_v7, 2  ;;  %v421_v34 = vrot.slane %v386_v50, 2  ;;  %v423_v39 = vrot.slane %v387_v21, 2  ;;  %v424_v40 = vrot.slane %v388_v12, 2 }
  0x2d   : > { %v416_v9 = vsel %vm413_vm1, %v414_v25, %v415_v26  ;;  %v419_v57 = vsel %vm413_vm1, %v417_v27, %v418_v32  ;;  %v426_v58 = vrot.slane %v389_v51, 2  ;;  %v427_v59 = vrot.slane %v390_v52, 2 }
  0x2e   : > { %v422_v60 = vsel %vm413_vm1, %v420_v33, %v421_v34  ;;  %v425_v61 = vsel %vm413_vm1, %v423_v39, %v424_v40  ;;  %v429_v62 = vrot.slane %v391_v53, 2  ;;  %v430_v10 = vrot.slane %v392_v54, 2 }
  0x2f   : > { %v428_v1 = vsel %vm413_vm1, %v426_v58, %v427_v59  ;;  %v432_v20 = vrot.slane %v393_v55, 2  ;;  %v433_v22 = vrot.slane %v394_v56, 2  ;;  %v435_v8 = vrot.slane %v395_v11, 2 }
  0x30   : > { %v431_v24 = vsel %vm413_vm1, %v429_v62, %v430_v10  ;;  %v436_v49 = vrot.slane %v396_v13, 2  ;;  %v446_v4 = vadd.f32 %v416_v9, %v369_v63  ;;  %v447_v7 = vadd.f32 %v419_v57, %v370_v0 }
  0x31   : > { %v434_v50 = vsel %vm413_vm1, %v432_v20, %v433_v22  ;;  %v448_v21 = vadd.f32 %v422_v60, %v371_v2  ;;  %v449_v12 = vadd.f32 %v425_v61, %v372_v18  ;;  %v450_v51 = vadd.f32 %v428_v1, %v373_v19 }
  0x32   : > { %v437_v52 = vsel %vm413_vm1, %v435_v8, %v436_v49  ;;  %v451_v25 = vadd.f32 %v431_v24, %v374_v3  ;;  %v452_v53 = vadd.f32 %v434_v50, %v375_v5  ;;  %v458_v54 = vmul.f32 %v1182_v14, %v1198_v23 }
  0x33   : > { %v453_v55 = vadd.f32 %v437_v52, %v376_v6  ;;  %v459_v56 = vmul.f32 %v1182_v14, %v1208_v29  ;;  %v460_v63 = vmul.f32 %v1182_v14, %v1212_v31  ;;  %v461_v0 = vmul.f32 %v1182_v14, %v1219_v36 }
  0x34   : > { %v462_v2 = vmul.f32 %v1182_v14, %v1223_v38  ;;  %v463_v18 = vmul.f32 %v1182_v14, %v1229_v42  ;;  %v464_v19 = vmul.f32 %v1182_v14, %v1233_v44  ;;  %v465_v3 = vmul.f32 %v1182_v14, %v1237_v46 }
  0x35   : > { %v466_v5 = vadd.f32 %v458_v54, %v446_v4  ;;  %v467_v6 = vadd.f32 %v459_v56, %v447_v7  ;;  %v468_v11 = vadd.f32 %v460_v63, %v448_v21  ;;  %v469_v13 = vadd.f32 %v461_v0, %v449_v12 }
  0x36   : > { %v470_v26 = vadd.f32 %v462_v2, %v450_v51  ;;  %v471_v27 = vadd.f32 %v463_v18, %v451_v25  ;;  %v472_v32 = vadd.f32 %v464_v19, %v452_v53  ;;  %v473_v33 = vadd.f32 %v465_v3, %v453_v55 }
  0x37   : > { %v478_v34 = vmul.f32 %v1184_v15, %v1198_v23  ;;  %v479_v39 = vmul.f32 %v1184_v15, %v1206_v28  ;;  %v480_v40 = vmul.f32 %v1184_v15, %v1208_v29  ;;  %v481_v14 = vmul.f32 %v1184_v15, %v1210_v30 }
  0x38   : > { %v482_v9 = vmul.f32 %v1184_v15, %v1212_v31  ;;  %v483_v57 = vmul.f32 %v1184_v15, %v1217_v35  ;;  %v484_v58 = vmul.f32 %v1184_v15, %v1219_v36  ;;  %v485_v59 = vmul.f32 %v1184_v15, %v1221_v37 }
  0x39   : > { %v486_v60 = vmul.f32 %v1184_v15, %v1223_v38  ;;  %v487_v61 = vmul.f32 %v1184_v15, %v1227_v41  ;;  %v488_v62 = vmul.f32 %v1184_v15, %v1229_v42  ;;  %v489_v10 = vmul.f32 %v1184_v15, %v1231_v43 }
  0x3a   : > { %v490_v1 = vmul.f32 %v1184_v15, %v1233_v44  ;;  %v491_v20 = vmul.f32 %v1184_v15, %v1235_v45  ;;  %v492_v22 = vmul.f32 %v1184_v15, %v1237_v46  ;;  %v493_v8 = vmul.f32 %v1184_v15, %v1239_v47 }
  0x3b   : > { %v510_v24 = vrot.slane %v478_v34, 1  ;;  %v511_v49 = vrot.slane %v479_v39, 1  ;;  %v513_v4 = vrot.slane %v480_v40, 1  ;;  %v514_v7 = vrot.slane %v481_v14, 1 }
  0x3c   : > { %v516_v50 = vrot.slane %v482_v9, 1  ;;  %v517_v21 = vrot.slane %v483_v57, 1  ;;  %v519_v12 = vrot.slane %v484_v58, 1  ;;  %v520_v51 = vrot.slane %v485_v59, 1 }
  0x3d   : > { %v512_v52 = vsel %vm336_vm0, %v510_v24, %v511_v49  ;;  %v515_v25 = vsel %vm336_vm0, %v513_v4, %v514_v7  ;;  %v522_v53 = vrot.slane %v486_v60, 1  ;;  %v523_v54 = vrot.slane %v487_v61, 1 }
  0x3e   : > { %v518_v55 = vsel %vm336_vm0, %v516_v50, %v517_v21  ;;  %v521_v56 = vsel %vm336_vm0, %v519_v12, %v520_v51  ;;  %v525_v63 = vrot.slane %v488_v62, 1  ;;  %v526_v15 = vrot.slane %v489_v10, 1 }
  0x3f   : > { %v524_v0 = vsel %vm336_vm0, %v522_v53, %v523_v54  ;;  %v528_v2 = vrot.slane %v490_v1, 1  ;;  %v529_v18 = vrot.slane %v491_v20, 1  ;;  %v531_v19 = vrot.slane %v492_v22, 1 }
  0x40   : > { %v527_v3 = vsel %vm336_vm0, %v525_v63, %v526_v15  ;;  %v532_v34 = vrot.slane %v493_v8, 1  ;;  %v542_v39 = vadd.f32 %v512_v52, %v466_v5  ;;  %v543_v40 = vadd.f32 %v515_v25, %v467_v6 }
  0x41   : > { %v530_v14 = vsel %vm336_vm0, %v528_v2, %v529_v18  ;;  %v544_v9 = vadd.f32 %v518_v55, %v468_v11  ;;  %v545_v57 = vadd.f32 %v521_v56, %v469_v13  ;;  %v546_v58 = vadd.f32 %v524_v0, %v470_v26 }
  0x42   : > { %v533_v59 = vsel %vm336_vm0, %v531_v19, %v532_v34  ;;  %v547_v60 = vadd.f32 %v527_v3, %v471_v27  ;;  %v548_v61 = vadd.f32 %v530_v14, %v472_v32  ;;  %v554_v62 = vmul.f32 %v1187_v16, %v1198_v23  ;;  %v1427_v3 = vld [vmem:[%s1170_s25 + $0x4c] sm:$0x1] }
  0x43   : > { %v549_v10 = vadd.f32 %v533_v59, %v473_v33  ;;  %v555_v1 = vmul.f32 %v1187_v16, %v1206_v28  ;;  %v556_v5 = vmul.f32 %v1187_v16, %v1208_v29  ;;  %v557_v6 = vmul.f32 %v1187_v16, %v1210_v30 }
  0x44   : > { %v558_v11 = vmul.f32 %v1187_v16, %v1212_v31  ;;  %v559_v13 = vmul.f32 %v1187_v16, %v1217_v35  ;;  %v560_v26 = vmul.f32 %v1187_v16, %v1219_v36  ;;  %v561_v23 = vmul.f32 %v1187_v16, %v1221_v37 }
  0x45   : > { %v562_v28 = vmul.f32 %v1187_v16, %v1223_v38  ;;  %v563_v27 = vmul.f32 %v1187_v16, %v1227_v41  ;;  %v564_v32 = vmul.f32 %v1187_v16, %v1229_v42  ;;  %v565_v33 = vmul.f32 %v1187_v16, %v1231_v43 }
  0x46   : > { %v566_v20 = vmul.f32 %v1187_v16, %v1233_v44  ;;  %v567_v22 = vmul.f32 %v1187_v16, %v1235_v45  ;;  %v568_v8 = vmul.f32 %v1187_v16, %v1237_v46  ;;  %v569_v24 = vmul.f32 %v1187_v16, %v1239_v47 }
  0x47   : > { %v586_v49 = vrot.slane %v554_v62, 2  ;;  %v587_v4 = vrot.slane %v555_v1, 2  ;;  %v589_v7 = vrot.slane %v556_v5, 2  ;;  %v590_v50 = vrot.slane %v557_v6, 2 }
  0x48   : > { %v592_v21 = vrot.slane %v558_v11, 2  ;;  %v593_v12 = vrot.slane %v559_v13, 2  ;;  %v595_v51 = vrot.slane %v560_v26, 2  ;;  %v596_v52 = vrot.slane %v561_v23, 2 }
  0x49   : > { %v588_v25 = vsel %vm413_vm1, %v586_v49, %v587_v4  ;;  %v591_v53 = vsel %vm413_vm1, %v589_v7, %v590_v50  ;;  %v598_v54 = vrot.slane %v562_v28, 2  ;;  %v599_v55 = vrot.slane %v563_v27, 2 }
  0x4a   : > { %v594_v56 = vsel %vm413_vm1, %v592_v21, %v593_v12  ;;  %v597_v63 = vsel %vm413_vm1, %v595_v51, %v596_v52  ;;  %v601_v16 = vrot.slane %v564_v32, 2  ;;  %v602_v15 = vrot.slane %v565_v33, 2 }
  0x4b   : > { %v600_v0 = vsel %vm413_vm1, %v598_v54, %v599_v55  ;;  %v604_v2 = vrot.slane %v566_v20, 2  ;;  %v605_v18 = vrot.slane %v567_v22, 2  ;;  %v607_v19 = vrot.slane %v568_v8, 2 }
  0x4c   : > { %v603_v34 = vsel %vm413_vm1, %v601_v16, %v602_v15  ;;  %v608_v14 = vrot.slane %v569_v24, 2  ;;  %v618_v59 = vadd.f32 %v588_v25, %v542_v39  ;;  %v619_v62 = vadd.f32 %v591_v53, %v543_v40 }
  0x4d   : > { %v606_v1 = vsel %vm413_vm1, %v604_v2, %v605_v18  ;;  %v620_v5 = vadd.f32 %v594_v56, %v544_v9  ;;  %v621_v6 = vadd.f32 %v597_v63, %v545_v57  ;;  %v622_v11 = vadd.f32 %v600_v0, %v546_v58 }
  0x4e   : > { %v609_v13 = vsel %vm413_vm1, %v607_v19, %v608_v14  ;;  %v623_v26 = vadd.f32 %v603_v34, %v547_v60  ;;  %v624_v23 = vadd.f32 %v606_v1, %v548_v61  ;;  %v630_v28 = vmul.f32 %v1190_v17, %v1208_v29 }
  0x4f   : > { %v279_v27 = vunpack.c.l.bf16 %v1427_v3  ;;  %v631_v32 = vmul.f32 %v1190_v17, %v1212_v31  ;;  %v632_v39 = vmul.f32 %v1190_v17, %v1219_v36  ;;  %v633_v40 = vmul.f32 %v1190_v17, %v1223_v38 }
  0x50   : > { %v625_v9 = vadd.f32 %v609_v13, %v549_v10  ;;  %v634_v57 = vmul.f32 %v1190_v17, %v1229_v42  ;;  %v635_v58 = vmul.f32 %v1190_v17, %v1233_v44  ;;  %v636_v60 = vmul.f32 %v1190_v17, %v1237_v46  ;;  %v1566_v10 = vld [vmem:[#allocation4_spill] sm:$0xff] }
  0x51   : > { %v637_v61 = vmul.f32 %v1190_v17, %v1241_v48  ;;  %v638_v33 = vadd.f32 %v630_v28, %v618_v59  ;;  %v639_v20 = vadd.f32 %v631_v32, %v619_v62  ;;  %v640_v22 = vadd.f32 %v632_v39, %v620_v5 }
  0x52   : > { %v641_v8 = vadd.f32 %v633_v40, %v621_v6  ;;  %v642_v24 = vadd.f32 %v634_v57, %v622_v11  ;;  %v643_v49 = vadd.f32 %v635_v58, %v623_v26  ;;  %v644_v4 = vadd.f32 %v636_v60, %v624_v23 }
  0x53   : > { %v650_v7 = vmul.f32 %v1566_v10, %v1208_v29  ;;  %v651_v50 = vmul.f32 %v1566_v10, %v1210_v30  ;;  %v652_v21 = vmul.f32 %v1566_v10, %v1212_v31  ;;  %v653_v12 = vmul.f32 %v1566_v10, %v1217_v35 }
  0x54   : > { %v654_v17 = vmul.f32 %v1566_v10, %v1219_v36  ;;  %v655_v51 = vmul.f32 %v1566_v10, %v1221_v37  ;;  %v656_v52 = vmul.f32 %v1566_v10, %v1223_v38  ;;  %v657_v25 = vmul.f32 %v1566_v10, %v1227_v41 }
  0x55   : > { %v658_v53 = vmul.f32 %v1566_v10, %v1229_v42  ;;  %v659_v54 = vmul.f32 %v1566_v10, %v1231_v43  ;;  %v660_v55 = vmul.f32 %v1566_v10, %v1233_v44  ;;  %v661_v56 = vmul.f32 %v1566_v10, %v1235_v45 }
  0x56   : > { %v662_v63 = vmul.f32 %v1566_v10, %v1237_v46  ;;  %v663_v16 = vmul.f32 %v1566_v10, %v1239_v47  ;;  %v664_v15 = vmul.f32 %v1566_v10, %v1241_v48  ;;  %v665_v0 = vmul.f32 %v1566_v10, %v279_v27 }
  0x57   : > { %v682_v2 = vrot.slane %v650_v7, 1  ;;  %v683_v18 = vrot.slane %v651_v50, 1  ;;  %v685_v19 = vrot.slane %v652_v21, 1  ;;  %v686_v34 = vrot.slane %v653_v12, 1 }
  0x58   : > { %v688_v14 = vrot.slane %v654_v17, 1  ;;  %v689_v59 = vrot.slane %v655_v51, 1  ;;  %v691_v62 = vrot.slane %v656_v52, 1  ;;  %v692_v1 = vrot.slane %v657_v25, 1  ;;  %v1567_v51 = vld [vmem:[#allocation3_spill] sm:$0xff]  ;;  %v1568_v52 = vld [vmem:[#allocation2_spill] sm:$0xff] }
  0x59   : > { %v645_v5 = vadd.f32 %v637_v61, %v625_v9  ;;  %v684_v6 = vsel %vm336_vm0, %v682_v2, %v683_v18  ;;  %v694_v11 = vrot.slane %v658_v53, 1  ;;  %v695_v13 = vrot.slane %v659_v54, 1 }
  0x5a   : > { %v687_v26 = vsel %vm336_vm0, %v685_v19, %v686_v34  ;;  %v690_v23 = vsel %vm336_vm0, %v688_v14, %v689_v59  ;;  %v697_v28 = vrot.slane %v660_v55, 1  ;;  %v698_v32 = vrot.slane %v661_v56, 1  ;;  %v1021_v14 = vld [vmem:[%s1556_s2] ss:$0 sm:$0xff] }
  0x5b   : > { %v693_v39 = vsel %vm336_vm0, %v691_v62, %v692_v1  ;;  %v700_v40 = vrot.slane %v662_v63, 1  ;;  %v701_v57 = vrot.slane %v663_v16, 1  ;;  %v703_v58 = vrot.slane %v664_v15, 1 }
  0x5c   : > { %v696_v60 = vsel %vm336_vm0, %v694_v11, %v695_v13  ;;  %v699_v10 = vsel %vm336_vm0, %v697_v28, %v698_v32  ;;  %v704_v9 = vrot.slane %v665_v0, 1  ;;  %v714_v7 = vadd.f32 %v684_v6, %v638_v33 }
  0x5d   : > { %v702_v61 = vsel %vm336_vm0, %v700_v40, %v701_v57  ;;  %v715_v50 = vadd.f32 %v687_v26, %v639_v20  ;;  %v716_v12 = vadd.f32 %v690_v23, %v640_v22  ;;  %v717_v17 = vadd.f32 %v693_v39, %v641_v8 }
  0x5e   : > { %v705_v21 = vsel %vm336_vm0, %v703_v58, %v704_v9  ;;  %v725_v25 = vrot.slane %v1568_v52, %v1567_v51  ;;  %v718_v53 = vadd.f32 %v696_v60, %v642_v24  ;;  %v719_v54 = vadd.f32 %v699_v10, %v643_v49 }
  0x5f   : > { %v720_v55 = vadd.f32 %v702_v61, %v644_v4  ;;  %v721_v56 = vadd.f32 %v705_v21, %v645_v5 }
  0x60   : > { %v726_v63 = vmul.f32 %v725_v25, %v1208_v29  ;;  %v727_v16 = vmul.f32 %v725_v25, %v1210_v30  ;;  %v728_v15 = vmul.f32 %v725_v25, %v1212_v31  ;;  %v729_v33 = vmul.f32 %v725_v25, %v1217_v35 }
  0x61   : > { %v730_v20 = vmul.f32 %v725_v25, %v1219_v36  ;;  %v731_v22 = vmul.f32 %v725_v25, %v1221_v37  ;;  %v732_v8 = vmul.f32 %v725_v25, %v1223_v38  ;;  %v733_v0 = vmul.f32 %v725_v25, %v1227_v41 }
  0x62   : > { %v734_v24 = vmul.f32 %v725_v25, %v1229_v42  ;;  %v735_v49 = vmul.f32 %v725_v25, %v1231_v43  ;;  %v736_v29 = vmul.f32 %v725_v25, %v1233_v44  ;;  %v737_v30 = vmul.f32 %v725_v25, %v1235_v45 }
  0x63   : > { %v738_v31 = vmul.f32 %v725_v25, %v1237_v46  ;;  %v739_v35 = vmul.f32 %v725_v25, %v1239_v47  ;;  %v740_v36 = vmul.f32 %v725_v25, %v1241_v48  ;;  %v741_v37 = vmul.f32 %v725_v25, %v279_v27 }
  0x64   : > { %v758_v38 = vrot.slane %v726_v63, 2  ;;  %v759_v4 = vrot.slane %v727_v16, 2  ;;  %v761_v41 = vrot.slane %v728_v15, 2  ;;  %v762_v2 = vrot.slane %v729_v33, 2 }
  0x65   : > { %v764_v42 = vrot.slane %v730_v20, 2  ;;  %v765_v18 = vrot.slane %v731_v22, 2  ;;  %v767_v43 = vrot.slane %v732_v8, 2  ;;  %v768_v19 = vrot.slane %v733_v0, 2 }
  0x66   : > { %v760_v44 = vsel %vm413_vm1, %v758_v38, %v759_v4  ;;  %v763_v45 = vsel %vm413_vm1, %v761_v41, %v762_v2  ;;  %v770_v46 = vrot.slane %v734_v24, 2  ;;  %v771_v34 = vrot.slane %v735_v49, 2 }
  0x67   : > { %v766_v47 = vsel %vm413_vm1, %v764_v42, %v765_v18  ;;  %v769_v48 = vsel %vm413_vm1, %v767_v43, %v768_v19  ;;  %v773_v3 = vrot.slane %v736_v29, 2  ;;  %v774_v27 = vrot.slane %v737_v30, 2 }
  0x68   : > { %v772_v59 = vsel %vm413_vm1, %v770_v46, %v771_v34  ;;  %v776_v62 = vrot.slane %v738_v31, 2  ;;  %v777_v1 = vrot.slane %v739_v35, 2  ;;  %v779_v5 = vrot.slane %v740_v36, 2 }
  0x69   : > { %v775_v6 = vsel %vm413_vm1, %v773_v3, %v774_v27  ;;  %v780_v11 = vrot.slane %v741_v37, 2  ;;  %v790_v13 = vadd.f32 %v760_v44, %v714_v7  ;;  %v791_v26 = vadd.f32 %v763_v45, %v715_v50 }
  0x6a   : > { %v778_v23 = vsel %vm413_vm1, %v776_v62, %v777_v1  ;;  %v792_v28 = vadd.f32 %v766_v47, %v716_v12  ;;  %v793_v32 = vadd.f32 %v769_v48, %v717_v17  ;;  %v794_v39 = vadd.f32 %v772_v59, %v718_v53 }
  0x6b   : > { %v781_v40 = vsel %vm413_vm1, %v779_v5, %v780_v11  ;;  %v795_v57 = vadd.f32 %v775_v6, %v719_v54  ;;  %v796_v58 = vadd.f32 %v778_v23, %v720_v55  ;;  %v804_v60 = vadd.f32 %v1021_v14, %v790_v13 }
  0x6c   : > { %v797_v10 = vadd.f32 %v781_v40, %v721_v56  ;;  %v805_v9 = vadd.f32 %v1021_v14, %v791_v26  ;;  %v806_v61 = vadd.f32 %v1021_v14, %v792_v28  ;;  %v807_v21 = vadd.f32 %v1021_v14, %v793_v32 }
  0x6d   : > { %v808_v51 = vadd.f32 %v1021_v14, %v794_v39  ;;  %v1520_v52 = vadd.f32 %v1021_v14, %v795_v57  ;;  %v1522_v25 = vadd.f32 %v1021_v14, %v796_v58  ;;  %v820_v50 = vmul.f32 0.044715, %v804_v60 }
  0x6e   : > { %v1524_v7 = vadd.f32 %v1021_v14, %v797_v10  ;;  %v821_v12 = vmul.f32 0.044715, %v805_v9  ;;  %v822_v17 = vmul.f32 0.044715, %v806_v61  ;;  %v823_v53 = vmul.f32 0.044715, %v807_v21 }
  0x6f   : > { %v824_v63 = vmul.f32 0.044715, %v808_v51  ;;  %v825_v54 = vmul.f32 0.044715, %v1520_v52  ;;  %v828_v55 = vmul.f32 %v820_v50, %v804_v60  ;;  %v826_v56 = vmul.f32 0.044715, %v1522_v25 }
  0x70   : > { %v827_v16 = vmul.f32 0.044715, %v1524_v7  ;;  %v829_v15 = vmul.f32 %v821_v12, %v805_v9  ;;  %v830_v33 = vmul.f32 %v822_v17, %v806_v61  ;;  %v831_v20 = vmul.f32 %v823_v53, %v807_v21 }
  0x71   : > { %v832_v22 = vmul.f32 %v824_v63, %v808_v51  ;;  %v833_v8 = vmul.f32 %v825_v54, %v1520_v52  ;;  %v836_v0 = vmul.f32 %v828_v55, %v804_v60  ;;  %v834_v24 = vmul.f32 %v826_v56, %v1522_v25 }
  0x72   : > { %v835_v49 = vmul.f32 %v827_v16, %v1524_v7  ;;  %v837_v29 = vmul.f32 %v829_v15, %v805_v9  ;;  %v838_v30 = vmul.f32 %v830_v33, %v806_v61  ;;  %v839_v31 = vmul.f32 %v831_v20, %v807_v21 }
  0x73   : > { %v840_v35 = vmul.f32 %v832_v22, %v808_v51  ;;  %v841_v36 = vmul.f32 %v833_v8, %v1520_v52  ;;  %v844_v37 = vadd.f32 %v836_v0, %v804_v60  ;;  %v842_v38 = vmul.f32 %v834_v24, %v1522_v25 }
  0x74   : > { %v843_v4 = vmul.f32 %v835_v49, %v1524_v7  ;;  %v845_v41 = vadd.f32 %v837_v29, %v805_v9  ;;  %v846_v2 = vadd.f32 %v838_v30, %v806_v61  ;;  %v847_v42 = vadd.f32 %v839_v31, %v807_v21 }
  0x75   : > { %v848_v18 = vadd.f32 %v840_v35, %v808_v51  ;;  %v849_v43 = vadd.f32 %v841_v36, %v1520_v52  ;;  %v852_v19 = vmul.f32 0.7978846, %v844_v37  ;;  %v850_v44 = vadd.f32 %v842_v38, %v1522_v25 }
  0x76   : > { %v851_v45 = vadd.f32 %v843_v4, %v1524_v7  ;;  %v853_v46 = vmul.f32 0.7978846, %v845_v41  ;;  %v854_v34 = vmul.f32 0.7978846, %v846_v2  ;;  %v855_v47 = vmul.f32 0.7978846, %v847_v42 }
  0x77   : > { %v856_v48 = vmul.f32 0.7978846, %v848_v18  ;;  %1073 = vtanh.f32 %v852_v19  ;;  %v857_v3 = vmul.f32 0.7978846, %v849_v43  ;;  %v858_v27 = vmul.f32 0.7978846, %v850_v44 }
  0x78   : > { %1075 = vtanh.f32 %v853_v46  ;;  %v859_v14 = vmul.f32 0.7978846, %v851_v45  ;;  %v812_v59 = vmul.f32 0.5, %v804_v60  ;;  %v813_v1 = vmul.f32 0.5, %v805_v9 }
  0x79   : > { %1077 = vtanh.f32 %v854_v34  ;;  %v814_v6 = vmul.f32 0.5, %v806_v61  ;;  %v815_v26 = vmul.f32 0.5, %v807_v21  ;;  %v816_v32 = vmul.f32 0.5, %v808_v51 }
  0x7a   : > { %1079 = vtanh.f32 %v855_v47  ;;  %v817_v58 = vmul.f32 0.5, %v1520_v52  ;;  %v818_v60 = vmul.f32 0.5, %v1522_v25  ;;  %v819_v17 = vmul.f32 0.5, %v1524_v7 }
  0x7b   : > { %1081 = vtanh.f32 %v856_v48 }
  0x7c   : > { %1083 = vtanh.f32 %v857_v3 }
  0x7d   : > { %1085 = vtanh.f32 %v858_v27 }
  0x7e   : > { %1087 = vtanh.f32 %v859_v14 }
  0x84   : > { %v1074_v62 = vpop.eup %1073 }
  0x85   : > { %v1076_v5 = vpop.eup %1075  ;;  %v868_v11 = vadd.f32 1.0, %v1074_v62 }
  0x86   : > { %v1078_v13 = vpop.eup %1077  ;;  %v869_v23 = vadd.f32 1.0, %v1076_v5 }
  0x87   : > { %v1080_v28 = vpop.eup %1079  ;;  %v870_v39 = vadd.f32 1.0, %v1078_v13  ;;  %v876_v40 = vmul.f32 %v868_v11, %v812_v59 }
  0x88   : > { %v1082_v57 = vpop.eup %1081  ;;  %v871_v10 = vadd.f32 1.0, %v1080_v28  ;;  %v877_v50 = vmul.f32 %v869_v23, %v813_v1 }
  0x89   : > { %v1084_v12 = vpop.eup %1083  ;;  %v872_v9 = vadd.f32 1.0, %v1082_v57  ;;  %v878_v61 = vmul.f32 %v870_v39, %v814_v6 }
  0x8a   : > { %v1086_v21 = vpop.eup %1085  ;;  %v873_v51 = vadd.f32 1.0, %v1084_v12  ;;  %v879_v53 = vmul.f32 %v871_v10, %v815_v26  ;;  %v1028_v63 = vpack.c.bf16 %v877_v50, %v876_v40 }
  0x8b   : > { %v1088_v54 = vpop.eup %1087  ;;  %v874_v55 = vadd.f32 1.0, %v1086_v21  ;;  %v880_v52 = vmul.f32 %v872_v9, %v816_v32 }
  0x8c   : > { %v875_v56 = vadd.f32 1.0, %v1088_v54  ;;  %v881_v16 = vmul.f32 %v873_v51, %v817_v58  ;;  %1029 = vst [vmem:[%s232_s4] sm:$0xff] %v1028_v63   ;;  %v1033_v15 = vpack.c.bf16 %v879_v53, %v878_v61 }
  0x8d   : > { %v882_v33 = vmul.f32 %v874_v55, %v818_v60 }
  0x8e   : > { %v883_v20 = vmul.f32 %v875_v56, %v819_v17  ;;  %1045 = vst [vmem:[%s232_s4 + $0x8] sm:$0xff] %v1033_v15   ;;  %v1038_v22 = vpack.c.bf16 %v881_v16, %v880_v52 }
  0x90   : > { %1046 = vst [vmem:[%s232_s4 + $0x10] sm:$0xff] %v1038_v22   ;;  %v1043_v25 = vpack.c.bf16 %v883_v20, %v882_v33 }
  0x92   : > { %1047 = vst [vmem:[%s232_s4 + $0x18] sm:$0xff] %v1043_v25  }
  0x93 PF: > { %s13_s14 = sadd.s32 1, %s1111_s14   ;;  %s1569_s12 = smov %s1107_s13 }
  0x94   : > { %p10_p5 = scmp.ge.s32.totalorder %s13_s14, 4   ;;  %s1570_s13 = smov %s1572_s15 }
  0x96   :  { %12 = sbr.rel (!%p10_p5) target bundleno = 2 (0x2), region = 69 }

</bundles_post_ra>
